<compile_context>
chip_gen: v5e
topology: v5e:2x2
jax: 0.10.0
libtpu: 0.0.40
codegen_flags: <defaults>
</compile_context>

<pallas_src>
import functools

import numpy as np

import jax
import jax.numpy as jnp
from jax.experimental import pallas as pl
from jax.experimental.pallas import tpu as pltpu


def _round_up(x, m):
    return (x + m - 1) // m * m


# --------------------------------------------------------------------------
# One fused kernel: backbone + RPN head + box head, per image (grid over batch)
# --------------------------------------------------------------------------

def _rcnn_fused_kernel(
    patches_ref,                                   # (HW1, Kp)   bf16  conv1 patches
    w1_ref, b1_ref,                                # (Kp,16) bf16, (1,16) f32
    g2_ref, w2_ref, b2_ref,                        # (9,64,256) bf16, (9,16,32) bf16, (1,32) f32
    gr_ref, wr_ref, br_ref,                        # (9,64,64)  bf16, (9,32,32) bf16, (1,32) f32
    wrh_ref, brh_ref,                              # (32,16) bf16, (1,16) f32
    wf1_ref, bf1_ref, wf2_ref, bf2_ref,            # fc weights/biases
    wp_ref, bp_ref,                                # predictor [cls|box] (32,16) bf16, (1,16) f32
    rpn_ref, det_ref,                              # outputs (64,16) f32, (1,16) f32
):
    dotf = functools.partial(jnp.dot, preferred_element_type=jnp.float32)

    # ---- conv1 (3x3, stride 2): implicit GEMM on pre-built input patches ----
    f1 = jnp.maximum(dotf(patches_ref[...], w1_ref[...]) + b1_ref[...], 0.0)
    f1 = f1.astype(jnp.bfloat16)                                   # (256, 16)

    # ---- conv2 (3x3, stride 2): per-tap gather matmuls, all VMEM resident ----
    n_taps = g2_ref.shape[0]
    acc2 = jnp.zeros((g2_ref.shape[1], w2_ref.shape[2]), jnp.float32)
    for k in range(n_taps):
        g = dotf(g2_ref[k], f1).astype(jnp.bfloat16)               # (64, 16)
        acc2 = acc2 + dotf(g, w2_ref[k])
    f2 = jnp.maximum(acc2 + b2_ref[...], 0.0)                      # (64, 32)
    f2 = f2.astype(jnp.bfloat16)

    # ---- rpn_conv (3x3, stride 1): same implicit-GEMM pattern ----
    accr = jnp.zeros((gr_ref.shape[1], wr_ref.shape[2]), jnp.float32)
    for k in range(n_taps):
        g = dotf(gr_ref[k], f2).astype(jnp.bfloat16)               # (64, 32)
        accr = accr + dotf(g, wr_ref[k])
    rpn = jnp.maximum(accr + br_ref[...], 0.0).astype(jnp.bfloat16)

    # ---- fused RPN objectness(3) + bbox(12) 1x1 heads -> 16 lanes ----
    rpn_ref[...] = dotf(rpn, wrh_ref[...]) + brh_ref[...]

    # ---- box head: RoI mean pool (as MXU matmul) -> fc1 -> fc2 -> [cls|box] ----
    # TODO(synk): RoIAlign bilinear sampling replaced by a spatial mean pool
    # over the feature map (proposal-agnostic stand-in).
    hw2 = f2.shape[0]
    pool = jnp.full((1, hw2), 1.0 / hw2, jnp.bfloat16)
    pooled = dotf(pool, f2).astype(jnp.bfloat16)                   # (1, 32)
    h = jnp.maximum(dotf(pooled, wf1_ref[...]) + bf1_ref[...], 0.0)
    h = jnp.maximum(dotf(h.astype(jnp.bfloat16), wf2_ref[...]) + bf2_ref[...], 0.0)
    det_ref[...] = dotf(h.astype(jnp.bfloat16), wp_ref[...]) + bp_ref[...]


def _rcnn_fused_call(patches, p):
    """patches: (n, HW1, Kp) bf16. Returns (rpn (n,64,16) f32, det (n,1,16) f32)."""
    n, hw1, kp = patches.shape

    def _full_spec(arr):
        nd = arr.ndim
        return pl.BlockSpec(arr.shape, lambda b: (0,) * nd)

    weights = [p["w1"], p["b1"],
               p["g2"], p["w2"], p["b2"],
               p["gr"], p["wr"], p["br"],
               p["wrh"], p["brh"],
               p["wf1"], p["bf1"], p["wf2"], p["bf2"],
               p["wp"], p["bp"]]

    return pl.pallas_call(
        _rcnn_fused_kernel,
        out_shape=(jax.ShapeDtypeStruct((n, 64, 16), jnp.float32),
                   jax.ShapeDtypeStruct((n, 1, 16), jnp.float32)),
        grid=(n,),
        in_specs=[pl.BlockSpec((None, hw1, kp), lambda b: (b, 0, 0))]
                 + [_full_spec(w) for w in weights],
        out_specs=(pl.BlockSpec((None, 64, 16), lambda b: (b, 0, 0)),
                   pl.BlockSpec((None, 1, 16), lambda b: (b, 0, 0))),
        compiler_params=pltpu.CompilerParams(
            dimension_semantics=("parallel",)),
    )(patches, *weights)


# --------------------------------------------------------------------------
# Host-side (init-time) constant construction — hoisted out of the forward path
# --------------------------------------------------------------------------

def _conv3x3_gather(h_in, w_in, stride):
    """0/1 row-gather matrices implementing a pad=1 3x3 conv tap on a flattened
    (h*w, C) feature map; out-of-bounds taps are all-zero rows (implicit zero pad)."""
    h_out = (h_in - 1) // stride + 1
    w_out = (w_in - 1) // stride + 1
    mats = np.zeros((9, h_out * w_out, h_in * w_in), np.float32)
    taps = [(i, j) for i in range(3) for j in range(3)]
    for k, (di, dj) in enumerate(taps):
        for oy in range(h_out):
            for ox in range(w_out):
                sy = oy * stride + di - 1
                sx = ox * stride + dj - 1
                if 0 <= sy < h_in and 0 <= sx < w_in:
                    mats[k, oy * w_out + ox, sy * w_in + sx] = 1.0
    return jnp.asarray(mats, jnp.bfloat16)


def init_params():
    key = jax.random.PRNGKey(0)
    ks = jax.random.split(key, 9)

    def nrm(k, shape, s=0.05):
        return jax.random.normal(k, shape, jnp.float32) * s

    # Raw (PyTorch-layout) synthetic weights for the scaled-down stand-in.
    conv1_w = nrm(ks[0], (16, 3, 3, 3));   conv1_b = jnp.zeros((16,), jnp.float32)
    conv2_w = nrm(ks[1], (32, 16, 3, 3));  conv2_b = jnp.zeros((32,), jnp.float32)
    rpnc_w = nrm(ks[2], (32, 32, 3, 3));   rpnc_b = jnp.zeros((32,), jnp.float32)
    rpn_cls_w = nrm(ks[3], (3, 32, 1, 1));  rpn_cls_b = jnp.zeros((3,), jnp.float32)
    rpn_box_w = nrm(ks[4], (12, 32, 1, 1)); rpn_box_b = jnp.zeros((12,), jnp.float32)
    fc1_w = nrm(ks[5], (32, 32)); fc1_b = jnp.zeros((32,), jnp.float32)
    fc2_w = nrm(ks[6], (32, 32)); fc2_b = jnp.zeros((32,), jnp.float32)
    cls_w = nrm(ks[7], (2, 32));  cls_b = jnp.zeros((2,), jnp.float32)
    box_w = nrm(ks[8], (8, 32));  box_b = jnp.zeros((8,), jnp.float32)

    bf = jnp.bfloat16

    # conv1 weight -> MXU-ready [K=9*Cin (padded to mult of 16), Cout] bf16.
    w1 = conv1_w.transpose(2, 3, 1, 0).reshape(27, 16)
    w1 = jnp.pad(w1, ((0, _round_up(27, 16) - 27), (0, 0))).astype(bf)

    # per-tap conv weights (kh, kw, Cin, Cout) -> (9, Cin, Cout) bf16.
    w2 = conv2_w.transpose(2, 3, 1, 0).reshape(9, 16, 32).astype(bf)
    wr = rpnc_w.transpose(2, 3, 1, 0).reshape(9, 32, 32).astype(bf)

    # fused RPN head: [obj(3) | bbox(12)] -> 16 lanes.
    wrh = jnp.concatenate([rpn_cls_w.reshape(3, 32).T,
                           rpn_box_w.reshape(12, 32).T], axis=1)     # (32, 15)
    wrh = jnp.pad(wrh, ((0, 0), (0, 1))).astype(bf)
    brh = jnp.pad(jnp.concatenate([rpn_cls_b, rpn_box_b]), (0, 1)).reshape(1, 16)

    # fused predictor: [cls(2) | box(8)] -> 16 lanes.
    wp = jnp.concatenate([cls_w.T, box_w.T], axis=1)                 # (32, 10)
    wp = jnp.pad(wp, ((0, 0), (0, 6))).astype(bf)
    bp = jnp.pad(jnp.concatenate([cls_b, box_b]), (0, 6)).reshape(1, 16)

    return {
        "w1": w1, "b1": conv1_b.reshape(1, 16),
        "g2": _conv3x3_gather(16, 16, stride=2),   # conv2 taps on 16x16 -> 8x8
        "w2": w2, "b2": conv2_b.reshape(1, 32),
        "gr": _conv3x3_gather(8, 8, stride=1),     # rpn_conv taps on 8x8 -> 8x8
        "wr": wr, "br": rpnc_b.reshape(1, 32),
        "wrh": wrh, "brh": brh,
        "wf1": fc1_w.T.astype(bf), "bf1": fc1_b.reshape(1, 32),
        "wf2": fc2_w.T.astype(bf), "bf2": fc2_b.reshape(1, 32),
        "wp": wp, "bp": bp,
    }


# --------------------------------------------------------------------------
# XLA glue: im2col of the raw input image only (tiny) + detection post-process
# --------------------------------------------------------------------------

def _im2col_input(x_nhwc):
    """3x3 / stride 2 / pad 1 im2col of the raw image, K padded to mult of 16, bf16."""
    n, h, w, c = x_nhwc.shape
    xb = x_nhwc.astype(jnp.bfloat16)
    xp = jnp.pad(xb, ((0, 0), (1, 1), (1, 1), (0, 0)))
    oh = (h - 1) // 2 + 1
    ow = (w - 1) // 2 + 1
    cols = []
    for i in range(3):
        for j in range(3):
            cols.append(xp[:, i:i + 2 * oh:2, j:j + 2 * ow:2, :])
    patches = jnp.concatenate(cols, axis=-1).reshape(n, oh * ow, 9 * c)
    kp = _round_up(9 * c, 16)
    patches = jnp.pad(patches, ((0, 0), (0, 0), (0, kp - 9 * c)))
    return patches, oh, ow


ANCHOR_SIZES = jnp.array([8.0, 16.0, 32.0], jnp.float32)


def rcnn_forward(images, p):
    n, _, img_h, img_w = images.shape
    # TODO(synk): torchvision's GeneralizedRCNNTransform (resize + ImageNet
    # normalization) is skipped; images are consumed as-is.
    x = images.transpose(0, 2, 3, 1)               # single NCHW->NHWC transpose
    patches, h1, w1 = _im2col_input(x)             # only XLA im2col: raw input

    rpn_out, det_out = _rcnn_fused_call(patches, p)

    hf = (h1 - 1) // 2 + 1                         # 8
    wf = (w1 - 1) // 2 + 1                         # 8
    a = 3
    obj = rpn_out[:, :, :a]                        # (n, 64, 3)
    deltas = rpn_out[:, :, a:a + 4 * a].reshape(n, hf * wf, a, 4)

    stride_y = img_h / hf
    stride_x = img_w / wf

    # Top-1 proposal per image (box_detections_per_img=1).
    # TODO(synk): full RPN (multi-level anchors, NMS, top-k per level) has no
    # clean Pallas equivalent; we keep the single best-scoring anchor.
    flat = obj.reshape(n, -1)
    idx = jnp.argmax(flat, axis=1)
    a_idx = idx % a
    pos = idx // a
    yy = pos // wf
    xx = pos % wf
    cx = (xx.astype(jnp.float32) + 0.5) * stride_x
    cy = (yy.astype(jnp.float32) + 0.5) * stride_y
    size = ANCHOR_SIZES[a_idx]
    d = deltas[jnp.arange(n), pos, a_idx]          # (n, 4)
    pcx = cx + d[:, 0] * size
    pcy = cy + d[:, 1] * size
    pw = size * jnp.exp(d[:, 2])
    ph = size * jnp.exp(d[:, 3])
    lim = jnp.array([img_w, img_h, img_w, img_h], jnp.float32)
    proposals = jnp.stack(
        [pcx - pw / 2, pcy - ph / 2, pcx + pw / 2, pcy + ph / 2], axis=1)
    proposals = jnp.clip(proposals, 0.0, lim)

    cls_logits = det_out[:, 0, :2]                 # (n, 2)
    box_reg = det_out[:, 0, 2:10]                  # (n, 8)

    scores = jax.nn.softmax(cls_logits, axis=-1)[:, 1]
    # decode class-1 regression on top of the proposal box
    bd = box_reg[:, 4:8]
    px = (proposals[:, 0] + proposals[:, 2]) / 2
    py = (proposals[:, 1] + proposals[:, 3]) / 2
    pwd = proposals[:, 2] - proposals[:, 0]
    phd = proposals[:, 3] - proposals[:, 1]
    fcx = px + bd[:, 0] * pwd
    fcy = py + bd[:, 1] * phd
    fw = pwd * jnp.exp(bd[:, 2])
    fh = phd * jnp.exp(bd[:, 3])
    boxes = jnp.stack(
        [fcx - fw / 2, fcy - fh / 2, fcx + fw / 2, fcy + fh / 2], axis=1)
    boxes = jnp.clip(boxes, 0.0, lim)

    # torchvision returns a list of per-image dicts; here batched arrays.
    return {
        "boxes": boxes[:, None, :],                # (n, 1, 4)
        "labels": jnp.ones((n, 1), jnp.int32),     # (n, 1)
        "scores": scores[:, None],                 # (n, 1)
    }


if __name__ == "__main__":
    key = jax.random.PRNGKey(0)
    images = jax.random.uniform(key, (2, 3, 32, 32), dtype=jnp.float32)
    params = init_params()
    out = jax.jit(rcnn_forward)(images, params)
    jax.block_until_ready(out)
    assert out["boxes"].shape == (2, 1, 4)
    assert out["scores"].shape == (2, 1)
    assert out["labels"].shape == (2, 1)
    print("KERNEL_OK")
</pallas_src>

<mosaic_0001>
module attributes {stable_mosaic.version = 11 : i64} {
  func.func @_rcnn_fused_kernel(%arg0: i32, %arg1: memref<1x256x32xbf16, #tpu.memory_space<vmem>>, %arg2: memref<32x16xbf16, #tpu.memory_space<vmem>>, %arg3: memref<1x16xf32, #tpu.memory_space<vmem>>, %arg4: memref<9x64x256xbf16, #tpu.memory_space<vmem>>, %arg5: memref<9x16x32xbf16, #tpu.memory_space<vmem>>, %arg6: memref<1x32xf32, #tpu.memory_space<vmem>>, %arg7: memref<9x64x64xbf16, #tpu.memory_space<vmem>>, %arg8: memref<9x32x32xbf16, #tpu.memory_space<vmem>>, %arg9: memref<1x32xf32, #tpu.memory_space<vmem>>, %arg10: memref<32x16xbf16, #tpu.memory_space<vmem>>, %arg11: memref<1x16xf32, #tpu.memory_space<vmem>>, %arg12: memref<32x32xbf16, #tpu.memory_space<vmem>>, %arg13: memref<1x32xf32, #tpu.memory_space<vmem>>, %arg14: memref<32x32xbf16, #tpu.memory_space<vmem>>, %arg15: memref<1x32xf32, #tpu.memory_space<vmem>>, %arg16: memref<32x16xbf16, #tpu.memory_space<vmem>>, %arg17: memref<1x16xf32, #tpu.memory_space<vmem>>, %arg18: memref<1x64x16xf32, #tpu.memory_space<vmem>>, %arg19: memref<1x1x16xf32, #tpu.memory_space<vmem>>) attributes {dimension_semantics = [#tpu.dimension_semantics<parallel>], iteration_bounds = array<i64: 2>, scalar_prefetch = 0 : i64, scratch_operands = 0 : i64, tpu.core_type = #tpu.core_type<tc>, window_params = [{transform_indices = @transform_0, window_bounds = array<i64: 1, 256, 32>}, {pipeline_mode = #tpu.pipeline_mode<synchronous>, transform_indices = @transform_1, window_bounds = array<i64: 32, 16>}, {pipeline_mode = #tpu.pipeline_mode<synchronous>, transform_indices = @transform_2, window_bounds = array<i64: 1, 16>}, {pipeline_mode = #tpu.pipeline_mode<synchronous>, transform_indices = @transform_3, window_bounds = array<i64: 9, 64, 256>}, {pipeline_mode = #tpu.pipeline_mode<synchronous>, transform_indices = @transform_4, window_bounds = array<i64: 9, 16, 32>}, {pipeline_mode = #tpu.pipeline_mode<synchronous>, transform_indices = @transform_5, window_bounds = array<i64: 1, 32>}, {pipeline_mode = #tpu.pipeline_mode<synchronous>, transform_indices = @transform_6, window_bounds = array<i64: 9, 64, 64>}, {pipeline_mode = #tpu.pipeline_mode<synchronous>, transform_indices = @transform_7, window_bounds = array<i64: 9, 32, 32>}, {pipeline_mode = #tpu.pipeline_mode<synchronous>, transform_indices = @transform_8, window_bounds = array<i64: 1, 32>}, {pipeline_mode = #tpu.pipeline_mode<synchronous>, transform_indices = @transform_9, window_bounds = array<i64: 32, 16>}, {pipeline_mode = #tpu.pipeline_mode<synchronous>, transform_indices = @transform_10, window_bounds = array<i64: 1, 16>}, {pipeline_mode = #tpu.pipeline_mode<synchronous>, transform_indices = @transform_11, window_bounds = array<i64: 32, 32>}, {pipeline_mode = #tpu.pipeline_mode<synchronous>, transform_indices = @transform_12, window_bounds = array<i64: 1, 32>}, {pipeline_mode = #tpu.pipeline_mode<synchronous>, transform_indices = @transform_13, window_bounds = array<i64: 32, 32>}, {pipeline_mode = #tpu.pipeline_mode<synchronous>, transform_indices = @transform_14, window_bounds = array<i64: 1, 32>}, {pipeline_mode = #tpu.pipeline_mode<synchronous>, transform_indices = @transform_15, window_bounds = array<i64: 32, 16>}, {pipeline_mode = #tpu.pipeline_mode<synchronous>, transform_indices = @transform_16, window_bounds = array<i64: 1, 16>}, {transform_indices = @transform_17, window_bounds = array<i64: 1, 64, 16>}, {transform_indices = @transform_18, window_bounds = array<i64: 1, 1, 16>}]} {
    %c0 = arith.constant 0 : index
    %c0_0 = arith.constant 0 : index
    %c0_1 = arith.constant 0 : index
    %0 = vector.load %arg1[%c0, %c0_0, %c0_1] : memref<1x256x32xbf16, #tpu.memory_space<vmem>>, vector<1x256x32xbf16>
    %1 = vector.shape_cast %0 : vector<1x256x32xbf16> to vector<256x32xbf16>
    %c0_2 = arith.constant 0 : index
    %c0_3 = arith.constant 0 : index
    %2 = vector.load %arg2[%c0_2, %c0_3] : memref<32x16xbf16, #tpu.memory_space<vmem>>, vector<32x16xbf16>
    %cst = arith.constant dense<0.000000e+00> : vector<256x16xf32>
    %3 = tpu.matmul %1, %2, %cst {dimension_numbers = #tpu.dot_dimension_numbers<[1], [0], [0], [1], [0, 0, 1, 1], [], []>} : vector<256x32xbf16>, vector<32x16xbf16>, vector<256x16xf32> -> vector<256x16xf32>
    %c0_4 = arith.constant 0 : index
    %c0_5 = arith.constant 0 : index
    %4 = vector.load %arg3[%c0_4, %c0_5] : memref<1x16xf32, #tpu.memory_space<vmem>>, vector<1x16xf32>
    %5 = vector.broadcast %4 : vector<1x16xf32> to vector<256x16xf32>
    %6 = arith.addf %3, %5 : vector<256x16xf32>
    %cst_6 = arith.constant 0.000000e+00 : f32
    %7 = vector.broadcast %cst_6 : f32 to vector<256x16xf32>
    %8 = arith.maximumf %6, %7 : vector<256x16xf32>
    %9 = arith.truncf %8 : vector<256x16xf32> to vector<256x16xbf16>
    %cst_7 = arith.constant 0.000000e+00 : f32
    %10 = vector.broadcast %cst_7 : f32 to vector<64x32xf32>
    %c0_8 = arith.constant 0 : index
    %c0_9 = arith.constant 0 : index
    %c0_10 = arith.constant 0 : index
    %11 = vector.load %arg4[%c0_8, %c0_9, %c0_10] : memref<9x64x256xbf16, #tpu.memory_space<vmem>>, vector<1x64x256xbf16>
    %12 = vector.shape_cast %11 : vector<1x64x256xbf16> to vector<64x256xbf16>
    %cst_11 = arith.constant dense<0.000000e+00> : vector<64x16xf32>
    %13 = tpu.matmul %12, %9, %cst_11 {dimension_numbers = #tpu.dot_dimension_numbers<[1], [0], [0], [1], [0, 0, 1, 1], [], []>} : vector<64x256xbf16>, vector<256x16xbf16>, vector<64x16xf32> -> vector<64x16xf32>
    %14 = arith.truncf %13 : vector<64x16xf32> to vector<64x16xbf16>
    %c0_12 = arith.constant 0 : index
    %c0_13 = arith.constant 0 : index
    %c0_14 = arith.constant 0 : index
    %15 = vector.load %arg5[%c0_12, %c0_13, %c0_14] : memref<9x16x32xbf16, #tpu.memory_space<vmem>>, vector<1x16x32xbf16>
    %16 = vector.shape_cast %15 : vector<1x16x32xbf16> to vector<16x32xbf16>
    %cst_15 = arith.constant dense<0.000000e+00> : vector<64x32xf32>
    %17 = tpu.matmul %14, %16, %cst_15 {dimension_numbers = #tpu.dot_dimension_numbers<[1], [0], [0], [1], [0, 0, 1, 1], [], []>} : vector<64x16xbf16>, vector<16x32xbf16>, vector<64x32xf32> -> vector<64x32xf32>
    %18 = arith.addf %10, %17 : vector<64x32xf32>
    %c1 = arith.constant 1 : index
    %c0_16 = arith.constant 0 : index
    %c0_17 = arith.constant 0 : index
    %19 = vector.load %arg4[%c1, %c0_16, %c0_17] : memref<9x64x256xbf16, #tpu.memory_space<vmem>>, vector<1x64x256xbf16>
    %20 = vector.shape_cast %19 : vector<1x64x256xbf16> to vector<64x256xbf16>
    %cst_18 = arith.constant dense<0.000000e+00> : vector<64x16xf32>
    %21 = tpu.matmul %20, %9, %cst_18 {dimension_numbers = #tpu.dot_dimension_numbers<[1], [0], [0], [1], [0, 0, 1, 1], [], []>} : vector<64x256xbf16>, vector<256x16xbf16>, vector<64x16xf32> -> vector<64x16xf32>
    %22 = arith.truncf %21 : vector<64x16xf32> to vector<64x16xbf16>
    %c1_19 = arith.constant 1 : index
    %c0_20 = arith.constant 0 : index
    %c0_21 = arith.constant 0 : index
    %23 = vector.load %arg5[%c1_19, %c0_20, %c0_21] : memref<9x16x32xbf16, #tpu.memory_space<vmem>>, vector<1x16x32xbf16>
    %24 = vector.shape_cast %23 : vector<1x16x32xbf16> to vector<16x32xbf16>
    %cst_22 = arith.constant dense<0.000000e+00> : vector<64x32xf32>
    %25 = tpu.matmul %22, %24, %cst_22 {dimension_numbers = #tpu.dot_dimension_numbers<[1], [0], [0], [1], [0, 0, 1, 1], [], []>} : vector<64x16xbf16>, vector<16x32xbf16>, vector<64x32xf32> -> vector<64x32xf32>
    %26 = arith.addf %18, %25 : vector<64x32xf32>
    %c2 = arith.constant 2 : index
    %c0_23 = arith.constant 0 : index
    %c0_24 = arith.constant 0 : index
    %27 = vector.load %arg4[%c2, %c0_23, %c0_24] : memref<9x64x256xbf16, #tpu.memory_space<vmem>>, vector<1x64x256xbf16>
    %28 = vector.shape_cast %27 : vector<1x64x256xbf16> to vector<64x256xbf16>
    %cst_25 = arith.constant dense<0.000000e+00> : vector<64x16xf32>
    %29 = tpu.matmul %28, %9, %cst_25 {dimension_numbers = #tpu.dot_dimension_numbers<[1], [0], [0], [1], [0, 0, 1, 1], [], []>} : vector<64x256xbf16>, vector<256x16xbf16>, vector<64x16xf32> -> vector<64x16xf32>
    %30 = arith.truncf %29 : vector<64x16xf32> to vector<64x16xbf16>
    %c2_26 = arith.constant 2 : index
    %c0_27 = arith.constant 0 : index
    %c0_28 = arith.constant 0 : index
    %31 = vector.load %arg5[%c2_26, %c0_27, %c0_28] : memref<9x16x32xbf16, #tpu.memory_space<vmem>>, vector<1x16x32xbf16>
    %32 = vector.shape_cast %31 : vector<1x16x32xbf16> to vector<16x32xbf16>
    %cst_29 = arith.constant dense<0.000000e+00> : vector<64x32xf32>
    %33 = tpu.matmul %30, %32, %cst_29 {dimension_numbers = #tpu.dot_dimension_numbers<[1], [0], [0], [1], [0, 0, 1, 1], [], []>} : vector<64x16xbf16>, vector<16x32xbf16>, vector<64x32xf32> -> vector<64x32xf32>
    %34 = arith.addf %26, %33 : vector<64x32xf32>
    %c3 = arith.constant 3 : index
    %c0_30 = arith.constant 0 : index
    %c0_31 = arith.constant 0 : index
    %35 = vector.load %arg4[%c3, %c0_30, %c0_31] : memref<9x64x256xbf16, #tpu.memory_space<vmem>>, vector<1x64x256xbf16>
    %36 = vector.shape_cast %35 : vector<1x64x256xbf16> to vector<64x256xbf16>
    %cst_32 = arith.constant dense<0.000000e+00> : vector<64x16xf32>
    %37 = tpu.matmul %36, %9, %cst_32 {dimension_numbers = #tpu.dot_dimension_numbers<[1], [0], [0], [1], [0, 0, 1, 1], [], []>} : vector<64x256xbf16>, vector<256x16xbf16>, vector<64x16xf32> -> vector<64x16xf32>
    %38 = arith.truncf %37 : vector<64x16xf32> to vector<64x16xbf16>
    %c3_33 = arith.constant 3 : index
    %c0_34 = arith.constant 0 : index
    %c0_35 = arith.constant 0 : index
    %39 = vector.load %arg5[%c3_33, %c0_34, %c0_35] : memref<9x16x32xbf16, #tpu.memory_space<vmem>>, vector<1x16x32xbf16>
    %40 = vector.shape_cast %39 : vector<1x16x32xbf16> to vector<16x32xbf16>
    %cst_36 = arith.constant dense<0.000000e+00> : vector<64x32xf32>
    %41 = tpu.matmul %38, %40, %cst_36 {dimension_numbers = #tpu.dot_dimension_numbers<[1], [0], [0], [1], [0, 0, 1, 1], [], []>} : vector<64x16xbf16>, vector<16x32xbf16>, vector<64x32xf32> -> vector<64x32xf32>
    %42 = arith.addf %34, %41 : vector<64x32xf32>
    %c4 = arith.constant 4 : index
    %c0_37 = arith.constant 0 : index
    %c0_38 = arith.constant 0 : index
    %43 = vector.load %arg4[%c4, %c0_37, %c0_38] : memref<9x64x256xbf16, #tpu.memory_space<vmem>>, vector<1x64x256xbf16>
    %44 = vector.shape_cast %43 : vector<1x64x256xbf16> to vector<64x256xbf16>
    %cst_39 = arith.constant dense<0.000000e+00> : vector<64x16xf32>
    %45 = tpu.matmul %44, %9, %cst_39 {dimension_numbers = #tpu.dot_dimension_numbers<[1], [0], [0], [1], [0, 0, 1, 1], [], []>} : vector<64x256xbf16>, vector<256x16xbf16>, vector<64x16xf32> -> vector<64x16xf32>
    %46 = arith.truncf %45 : vector<64x16xf32> to vector<64x16xbf16>
    %c4_40 = arith.constant 4 : index
    %c0_41 = arith.constant 0 : index
    %c0_42 = arith.constant 0 : index
    %47 = vector.load %arg5[%c4_40, %c0_41, %c0_42] : memref<9x16x32xbf16, #tpu.memory_space<vmem>>, vector<1x16x32xbf16>
    %48 = vector.shape_cast %47 : vector<1x16x32xbf16> to vector<16x32xbf16>
    %cst_43 = arith.constant dense<0.000000e+00> : vector<64x32xf32>
    %49 = tpu.matmul %46, %48, %cst_43 {dimension_numbers = #tpu.dot_dimension_numbers<[1], [0], [0], [1], [0, 0, 1, 1], [], []>} : vector<64x16xbf16>, vector<16x32xbf16>, vector<64x32xf32> -> vector<64x32xf32>
    %50 = arith.addf %42, %49 : vector<64x32xf32>
    %c5 = arith.constant 5 : index
    %c0_44 = arith.constant 0 : index
    %c0_45 = arith.constant 0 : index
    %51 = vector.load %arg4[%c5, %c0_44, %c0_45] : memref<9x64x256xbf16, #tpu.memory_space<vmem>>, vector<1x64x256xbf16>
    %52 = vector.shape_cast %51 : vector<1x64x256xbf16> to vector<64x256xbf16>
    %cst_46 = arith.constant dense<0.000000e+00> : vector<64x16xf32>
    %53 = tpu.matmul %52, %9, %cst_46 {dimension_numbers = #tpu.dot_dimension_numbers<[1], [0], [0], [1], [0, 0, 1, 1], [], []>} : vector<64x256xbf16>, vector<256x16xbf16>, vector<64x16xf32> -> vector<64x16xf32>
    %54 = arith.truncf %53 : vector<64x16xf32> to vector<64x16xbf16>
    %c5_47 = arith.constant 5 : index
    %c0_48 = arith.constant 0 : index
    %c0_49 = arith.constant 0 : index
    %55 = vector.load %arg5[%c5_47, %c0_48, %c0_49] : memref<9x16x32xbf16, #tpu.memory_space<vmem>>, vector<1x16x32xbf16>
    %56 = vector.shape_cast %55 : vector<1x16x32xbf16> to vector<16x32xbf16>
    %cst_50 = arith.constant dense<0.000000e+00> : vector<64x32xf32>
    %57 = tpu.matmul %54, %56, %cst_50 {dimension_numbers = #tpu.dot_dimension_numbers<[1], [0], [0], [1], [0, 0, 1, 1], [], []>} : vector<64x16xbf16>, vector<16x32xbf16>, vector<64x32xf32> -> vector<64x32xf32>
    %58 = arith.addf %50, %57 : vector<64x32xf32>
    %c6 = arith.constant 6 : index
    %c0_51 = arith.constant 0 : index
    %c0_52 = arith.constant 0 : index
    %59 = vector.load %arg4[%c6, %c0_51, %c0_52] : memref<9x64x256xbf16, #tpu.memory_space<vmem>>, vector<1x64x256xbf16>
    %60 = vector.shape_cast %59 : vector<1x64x256xbf16> to vector<64x256xbf16>
    %cst_53 = arith.constant dense<0.000000e+00> : vector<64x16xf32>
    %61 = tpu.matmul %60, %9, %cst_53 {dimension_numbers = #tpu.dot_dimension_numbers<[1], [0], [0], [1], [0, 0, 1, 1], [], []>} : vector<64x256xbf16>, vector<256x16xbf16>, vector<64x16xf32> -> vector<64x16xf32>
    %62 = arith.truncf %61 : vector<64x16xf32> to vector<64x16xbf16>
    %c6_54 = arith.constant 6 : index
    %c0_55 = arith.constant 0 : index
    %c0_56 = arith.constant 0 : index
    %63 = vector.load %arg5[%c6_54, %c0_55, %c0_56] : memref<9x16x32xbf16, #tpu.memory_space<vmem>>, vector<1x16x32xbf16>
    %64 = vector.shape_cast %63 : vector<1x16x32xbf16> to vector<16x32xbf16>
    %cst_57 = arith.constant dense<0.000000e+00> : vector<64x32xf32>
    %65 = tpu.matmul %62, %64, %cst_57 {dimension_numbers = #tpu.dot_dimension_numbers<[1], [0], [0], [1], [0, 0, 1, 1], [], []>} : vector<64x16xbf16>, vector<16x32xbf16>, vector<64x32xf32> -> vector<64x32xf32>
    %66 = arith.addf %58, %65 : vector<64x32xf32>
    %c7 = arith.constant 7 : index
    %c0_58 = arith.constant 0 : index
    %c0_59 = arith.constant 0 : index
    %67 = vector.load %arg4[%c7, %c0_58, %c0_59] : memref<9x64x256xbf16, #tpu.memory_space<vmem>>, vector<1x64x256xbf16>
    %68 = vector.shape_cast %67 : vector<1x64x256xbf16> to vector<64x256xbf16>
    %cst_60 = arith.constant dense<0.000000e+00> : vector<64x16xf32>
    %69 = tpu.matmul %68, %9, %cst_60 {dimension_numbers = #tpu.dot_dimension_numbers<[1], [0], [0], [1], [0, 0, 1, 1], [], []>} : vector<64x256xbf16>, vector<256x16xbf16>, vector<64x16xf32> -> vector<64x16xf32>
    %70 = arith.truncf %69 : vector<64x16xf32> to vector<64x16xbf16>
    %c7_61 = arith.constant 7 : index
    %c0_62 = arith.constant 0 : index
    %c0_63 = arith.constant 0 : index
    %71 = vector.load %arg5[%c7_61, %c0_62, %c0_63] : memref<9x16x32xbf16, #tpu.memory_space<vmem>>, vector<1x16x32xbf16>
    %72 = vector.shape_cast %71 : vector<1x16x32xbf16> to vector<16x32xbf16>
    %cst_64 = arith.constant dense<0.000000e+00> : vector<64x32xf32>
    %73 = tpu.matmul %70, %72, %cst_64 {dimension_numbers = #tpu.dot_dimension_numbers<[1], [0], [0], [1], [0, 0, 1, 1], [], []>} : vector<64x16xbf16>, vector<16x32xbf16>, vector<64x32xf32> -> vector<64x32xf32>
    %74 = arith.addf %66, %73 : vector<64x32xf32>
    %c8 = arith.constant 8 : index
    %c0_65 = arith.constant 0 : index
    %c0_66 = arith.constant 0 : index
    %75 = vector.load %arg4[%c8, %c0_65, %c0_66] : memref<9x64x256xbf16, #tpu.memory_space<vmem>>, vector<1x64x256xbf16>
    %76 = vector.shape_cast %75 : vector<1x64x256xbf16> to vector<64x256xbf16>
    %cst_67 = arith.constant dense<0.000000e+00> : vector<64x16xf32>
    %77 = tpu.matmul %76, %9, %cst_67 {dimension_numbers = #tpu.dot_dimension_numbers<[1], [0], [0], [1], [0, 0, 1, 1], [], []>} : vector<64x256xbf16>, vector<256x16xbf16>, vector<64x16xf32> -> vector<64x16xf32>
    %78 = arith.truncf %77 : vector<64x16xf32> to vector<64x16xbf16>
    %c8_68 = arith.constant 8 : index
    %c0_69 = arith.constant 0 : index
    %c0_70 = arith.constant 0 : index
    %79 = vector.load %arg5[%c8_68, %c0_69, %c0_70] : memref<9x16x32xbf16, #tpu.memory_space<vmem>>, vector<1x16x32xbf16>
    %80 = vector.shape_cast %79 : vector<1x16x32xbf16> to vector<16x32xbf16>
    %cst_71 = arith.constant dense<0.000000e+00> : vector<64x32xf32>
    %81 = tpu.matmul %78, %80, %cst_71 {dimension_numbers = #tpu.dot_dimension_numbers<[1], [0], [0], [1], [0, 0, 1, 1], [], []>} : vector<64x16xbf16>, vector<16x32xbf16>, vector<64x32xf32> -> vector<64x32xf32>
    %82 = arith.addf %74, %81 : vector<64x32xf32>
    %c0_72 = arith.constant 0 : index
    %c0_73 = arith.constant 0 : index
    %83 = vector.load %arg6[%c0_72, %c0_73] : memref<1x32xf32, #tpu.memory_space<vmem>>, vector<1x32xf32>
    %84 = vector.broadcast %83 : vector<1x32xf32> to vector<64x32xf32>
    %85 = arith.addf %82, %84 : vector<64x32xf32>
    %cst_74 = arith.constant 0.000000e+00 : f32
    %86 = vector.broadcast %cst_74 : f32 to vector<64x32xf32>
    %87 = arith.maximumf %85, %86 : vector<64x32xf32>
    %88 = arith.truncf %87 : vector<64x32xf32> to vector<64x32xbf16>
    %cst_75 = arith.constant 0.000000e+00 : f32
    %89 = vector.broadcast %cst_75 : f32 to vector<64x32xf32>
    %c0_76 = arith.constant 0 : index
    %c0_77 = arith.constant 0 : index
    %c0_78 = arith.constant 0 : index
    %90 = vector.load %arg7[%c0_76, %c0_77, %c0_78] : memref<9x64x64xbf16, #tpu.memory_space<vmem>>, vector<1x64x64xbf16>
    %91 = vector.shape_cast %90 : vector<1x64x64xbf16> to vector<64x64xbf16>
    %cst_79 = arith.constant dense<0.000000e+00> : vector<64x32xf32>
    %92 = tpu.matmul %91, %88, %cst_79 {dimension_numbers = #tpu.dot_dimension_numbers<[1], [0], [0], [1], [0, 0, 1, 1], [], []>} : vector<64x64xbf16>, vector<64x32xbf16>, vector<64x32xf32> -> vector<64x32xf32>
    %93 = arith.truncf %92 : vector<64x32xf32> to vector<64x32xbf16>
    %c0_80 = arith.constant 0 : index
    %c0_81 = arith.constant 0 : index
    %c0_82 = arith.constant 0 : index
    %94 = vector.load %arg8[%c0_80, %c0_81, %c0_82] : memref<9x32x32xbf16, #tpu.memory_space<vmem>>, vector<1x32x32xbf16>
    %95 = vector.shape_cast %94 : vector<1x32x32xbf16> to vector<32x32xbf16>
    %cst_83 = arith.constant dense<0.000000e+00> : vector<64x32xf32>
    %96 = tpu.matmul %93, %95, %cst_83 {dimension_numbers = #tpu.dot_dimension_numbers<[1], [0], [0], [1], [0, 0, 1, 1], [], []>} : vector<64x32xbf16>, vector<32x32xbf16>, vector<64x32xf32> -> vector<64x32xf32>
    %97 = arith.addf %89, %96 : vector<64x32xf32>
    %c1_84 = arith.constant 1 : index
    %c0_85 = arith.constant 0 : index
    %c0_86 = arith.constant 0 : index
    %98 = vector.load %arg7[%c1_84, %c0_85, %c0_86] : memref<9x64x64xbf16, #tpu.memory_space<vmem>>, vector<1x64x64xbf16>
    %99 = vector.shape_cast %98 : vector<1x64x64xbf16> to vector<64x64xbf16>
    %cst_87 = arith.constant dense<0.000000e+00> : vector<64x32xf32>
    %100 = tpu.matmul %99, %88, %cst_87 {dimension_numbers = #tpu.dot_dimension_numbers<[1], [0], [0], [1], [0, 0, 1, 1], [], []>} : vector<64x64xbf16>, vector<64x32xbf16>, vector<64x32xf32> -> vector<64x32xf32>
    %101 = arith.truncf %100 : vector<64x32xf32> to vector<64x32xbf16>
    %c1_88 = arith.constant 1 : index
    %c0_89 = arith.constant 0 : index
    %c0_90 = arith.constant 0 : index
    %102 = vector.load %arg8[%c1_88, %c0_89, %c0_90] : memref<9x32x32xbf16, #tpu.memory_space<vmem>>, vector<1x32x32xbf16>
    %103 = vector.shape_cast %102 : vector<1x32x32xbf16> to vector<32x32xbf16>
    %cst_91 = arith.constant dense<0.000000e+00> : vector<64x32xf32>
    %104 = tpu.matmul %101, %103, %cst_91 {dimension_numbers = #tpu.dot_dimension_numbers<[1], [0], [0], [1], [0, 0, 1, 1], [], []>} : vector<64x32xbf16>, vector<32x32xbf16>, vector<64x32xf32> -> vector<64x32xf32>
    %105 = arith.addf %97, %104 : vector<64x32xf32>
    %c2_92 = arith.constant 2 : index
    %c0_93 = arith.constant 0 : index
    %c0_94 = arith.constant 0 : index
    %106 = vector.load %arg7[%c2_92, %c0_93, %c0_94] : memref<9x64x64xbf16, #tpu.memory_space<vmem>>, vector<1x64x64xbf16>
    %107 = vector.shape_cast %106 : vector<1x64x64xbf16> to vector<64x64xbf16>
    %cst_95 = arith.constant dense<0.000000e+00> : vector<64x32xf32>
    %108 = tpu.matmul %107, %88, %cst_95 {dimension_numbers = #tpu.dot_dimension_numbers<[1], [0], [0], [1], [0, 0, 1, 1], [], []>} : vector<64x64xbf16>, vector<64x32xbf16>, vector<64x32xf32> -> vector<64x32xf32>
    %109 = arith.truncf %108 : vector<64x32xf32> to vector<64x32xbf16>
    %c2_96 = arith.constant 2 : index
    %c0_97 = arith.constant 0 : index
    %c0_98 = arith.constant 0 : index
    %110 = vector.load %arg8[%c2_96, %c0_97, %c0_98] : memref<9x32x32xbf16, #tpu.memory_space<vmem>>, vector<1x32x32xbf16>
    %111 = vector.shape_cast %110 : vector<1x32x32xbf16> to vector<32x32xbf16>
    %cst_99 = arith.constant dense<0.000000e+00> : vector<64x32xf32>
    %112 = tpu.matmul %109, %111, %cst_99 {dimension_numbers = #tpu.dot_dimension_numbers<[1], [0], [0], [1], [0, 0, 1, 1], [], []>} : vector<64x32xbf16>, vector<32x32xbf16>, vector<64x32xf32> -> vector<64x32xf32>
    %113 = arith.addf %105, %112 : vector<64x32xf32>
    %c3_100 = arith.constant 3 : index
    %c0_101 = arith.constant 0 : index
    %c0_102 = arith.constant 0 : index
    %114 = vector.load %arg7[%c3_100, %c0_101, %c0_102] : memref<9x64x64xbf16, #tpu.memory_space<vmem>>, vector<1x64x64xbf16>
    %115 = vector.shape_cast %114 : vector<1x64x64xbf16> to vector<64x64xbf16>
    %cst_103 = arith.constant dense<0.000000e+00> : vector<64x32xf32>
    %116 = tpu.matmul %115, %88, %cst_103 {dimension_numbers = #tpu.dot_dimension_numbers<[1], [0], [0], [1], [0, 0, 1, 1], [], []>} : vector<64x64xbf16>, vector<64x32xbf16>, vector<64x32xf32> -> vector<64x32xf32>
    %117 = arith.truncf %116 : vector<64x32xf32> to vector<64x32xbf16>
    %c3_104 = arith.constant 3 : index
    %c0_105 = arith.constant 0 : index
    %c0_106 = arith.constant 0 : index
    %118 = vector.load %arg8[%c3_104, %c0_105, %c0_106] : memref<9x32x32xbf16, #tpu.memory_space<vmem>>, vector<1x32x32xbf16>
    %119 = vector.shape_cast %118 : vector<1x32x32xbf16> to vector<32x32xbf16>
    %cst_107 = arith.constant dense<0.000000e+00> : vector<64x32xf32>
    %120 = tpu.matmul %117, %119, %cst_107 {dimension_numbers = #tpu.dot_dimension_numbers<[1], [0], [0], [1], [0, 0, 1, 1], [], []>} : vector<64x32xbf16>, vector<32x32xbf16>, vector<64x32xf32> -> vector<64x32xf32>
    %121 = arith.addf %113, %120 : vector<64x32xf32>
    %c4_108 = arith.constant 4 : index
    %c0_109 = arith.constant 0 : index
    %c0_110 = arith.constant 0 : index
    %122 = vector.load %arg7[%c4_108, %c0_109, %c0_110] : memref<9x64x64xbf16, #tpu.memory_space<vmem>>, vector<1x64x64xbf16>
    %123 = vector.shape_cast %122 : vector<1x64x64xbf16> to vector<64x64xbf16>
    %cst_111 = arith.constant dense<0.000000e+00> : vector<64x32xf32>
    %124 = tpu.matmul %123, %88, %cst_111 {dimension_numbers = #tpu.dot_dimension_numbers<[1], [0], [0], [1], [0, 0, 1, 1], [], []>} : vector<64x64xbf16>, vector<64x32xbf16>, vector<64x32xf32> -> vector<64x32xf32>
    %125 = arith.truncf %124 : vector<64x32xf32> to vector<64x32xbf16>
    %c4_112 = arith.constant 4 : index
    %c0_113 = arith.constant 0 : index
    %c0_114 = arith.constant 0 : index
    %126 = vector.load %arg8[%c4_112, %c0_113, %c0_114] : memref<9x32x32xbf16, #tpu.memory_space<vmem>>, vector<1x32x32xbf16>
    %127 = vector.shape_cast %126 : vector<1x32x32xbf16> to vector<32x32xbf16>
    %cst_115 = arith.constant dense<0.000000e+00> : vector<64x32xf32>
    %128 = tpu.matmul %125, %127, %cst_115 {dimension_numbers = #tpu.dot_dimension_numbers<[1], [0], [0], [1], [0, 0, 1, 1], [], []>} : vector<64x32xbf16>, vector<32x32xbf16>, vector<64x32xf32> -> vector<64x32xf32>
    %129 = arith.addf %121, %128 : vector<64x32xf32>
    %c5_116 = arith.constant 5 : index
    %c0_117 = arith.constant 0 : index
    %c0_118 = arith.constant 0 : index
    %130 = vector.load %arg7[%c5_116, %c0_117, %c0_118] : memref<9x64x64xbf16, #tpu.memory_space<vmem>>, vector<1x64x64xbf16>
    %131 = vector.shape_cast %130 : vector<1x64x64xbf16> to vector<64x64xbf16>
    %cst_119 = arith.constant dense<0.000000e+00> : vector<64x32xf32>
    %132 = tpu.matmul %131, %88, %cst_119 {dimension_numbers = #tpu.dot_dimension_numbers<[1], [0], [0], [1], [0, 0, 1, 1], [], []>} : vector<64x64xbf16>, vector<64x32xbf16>, vector<64x32xf32> -> vector<64x32xf32>
    %133 = arith.truncf %132 : vector<64x32xf32> to vector<64x32xbf16>
    %c5_120 = arith.constant 5 : index
    %c0_121 = arith.constant 0 : index
    %c0_122 = arith.constant 0 : index
    %134 = vector.load %arg8[%c5_120, %c0_121, %c0_122] : memref<9x32x32xbf16, #tpu.memory_space<vmem>>, vector<1x32x32xbf16>
    %135 = vector.shape_cast %134 : vector<1x32x32xbf16> to vector<32x32xbf16>
    %cst_123 = arith.constant dense<0.000000e+00> : vector<64x32xf32>
    %136 = tpu.matmul %133, %135, %cst_123 {dimension_numbers = #tpu.dot_dimension_numbers<[1], [0], [0], [1], [0, 0, 1, 1], [], []>} : vector<64x32xbf16>, vector<32x32xbf16>, vector<64x32xf32> -> vector<64x32xf32>
    %137 = arith.addf %129, %136 : vector<64x32xf32>
    %c6_124 = arith.constant 6 : index
    %c0_125 = arith.constant 0 : index
    %c0_126 = arith.constant 0 : index
    %138 = vector.load %arg7[%c6_124, %c0_125, %c0_126] : memref<9x64x64xbf16, #tpu.memory_space<vmem>>, vector<1x64x64xbf16>
    %139 = vector.shape_cast %138 : vector<1x64x64xbf16> to vector<64x64xbf16>
    %cst_127 = arith.constant dense<0.000000e+00> : vector<64x32xf32>
    %140 = tpu.matmul %139, %88, %cst_127 {dimension_numbers = #tpu.dot_dimension_numbers<[1], [0], [0], [1], [0, 0, 1, 1], [], []>} : vector<64x64xbf16>, vector<64x32xbf16>, vector<64x32xf32> -> vector<64x32xf32>
    %141 = arith.truncf %140 : vector<64x32xf32> to vector<64x32xbf16>
    %c6_128 = arith.constant 6 : index
    %c0_129 = arith.constant 0 : index
    %c0_130 = arith.constant 0 : index
    %142 = vector.load %arg8[%c6_128, %c0_129, %c0_130] : memref<9x32x32xbf16, #tpu.memory_space<vmem>>, vector<1x32x32xbf16>
    %143 = vector.shape_cast %142 : vector<1x32x32xbf16> to vector<32x32xbf16>
    %cst_131 = arith.constant dense<0.000000e+00> : vector<64x32xf32>
    %144 = tpu.matmul %141, %143, %cst_131 {dimension_numbers = #tpu.dot_dimension_numbers<[1], [0], [0], [1], [0, 0, 1, 1], [], []>} : vector<64x32xbf16>, vector<32x32xbf16>, vector<64x32xf32> -> vector<64x32xf32>
    %145 = arith.addf %137, %144 : vector<64x32xf32>
    %c7_132 = arith.constant 7 : index
    %c0_133 = arith.constant 0 : index
    %c0_134 = arith.constant 0 : index
    %146 = vector.load %arg7[%c7_132, %c0_133, %c0_134] : memref<9x64x64xbf16, #tpu.memory_space<vmem>>, vector<1x64x64xbf16>
    %147 = vector.shape_cast %146 : vector<1x64x64xbf16> to vector<64x64xbf16>
    %cst_135 = arith.constant dense<0.000000e+00> : vector<64x32xf32>
    %148 = tpu.matmul %147, %88, %cst_135 {dimension_numbers = #tpu.dot_dimension_numbers<[1], [0], [0], [1], [0, 0, 1, 1], [], []>} : vector<64x64xbf16>, vector<64x32xbf16>, vector<64x32xf32> -> vector<64x32xf32>
    %149 = arith.truncf %148 : vector<64x32xf32> to vector<64x32xbf16>
    %c7_136 = arith.constant 7 : index
    %c0_137 = arith.constant 0 : index
    %c0_138 = arith.constant 0 : index
    %150 = vector.load %arg8[%c7_136, %c0_137, %c0_138] : memref<9x32x32xbf16, #tpu.memory_space<vmem>>, vector<1x32x32xbf16>
    %151 = vector.shape_cast %150 : vector<1x32x32xbf16> to vector<32x32xbf16>
    %cst_139 = arith.constant dense<0.000000e+00> : vector<64x32xf32>
    %152 = tpu.matmul %149, %151, %cst_139 {dimension_numbers = #tpu.dot_dimension_numbers<[1], [0], [0], [1], [0, 0, 1, 1], [], []>} : vector<64x32xbf16>, vector<32x32xbf16>, vector<64x32xf32> -> vector<64x32xf32>
    %153 = arith.addf %145, %152 : vector<64x32xf32>
    %c8_140 = arith.constant 8 : index
    %c0_141 = arith.constant 0 : index
    %c0_142 = arith.constant 0 : index
    %154 = vector.load %arg7[%c8_140, %c0_141, %c0_142] : memref<9x64x64xbf16, #tpu.memory_space<vmem>>, vector<1x64x64xbf16>
    %155 = vector.shape_cast %154 : vector<1x64x64xbf16> to vector<64x64xbf16>
    %cst_143 = arith.constant dense<0.000000e+00> : vector<64x32xf32>
    %156 = tpu.matmul %155, %88, %cst_143 {dimension_numbers = #tpu.dot_dimension_numbers<[1], [0], [0], [1], [0, 0, 1, 1], [], []>} : vector<64x64xbf16>, vector<64x32xbf16>, vector<64x32xf32> -> vector<64x32xf32>
    %157 = arith.truncf %156 : vector<64x32xf32> to vector<64x32xbf16>
    %c8_144 = arith.constant 8 : index
    %c0_145 = arith.constant 0 : index
    %c0_146 = arith.constant 0 : index
    %158 = vector.load %arg8[%c8_144, %c0_145, %c0_146] : memref<9x32x32xbf16, #tpu.memory_space<vmem>>, vector<1x32x32xbf16>
    %159 = vector.shape_cast %158 : vector<1x32x32xbf16> to vector<32x32xbf16>
    %cst_147 = arith.constant dense<0.000000e+00> : vector<64x32xf32>
    %160 = tpu.matmul %157, %159, %cst_147 {dimension_numbers = #tpu.dot_dimension_numbers<[1], [0], [0], [1], [0, 0, 1, 1], [], []>} : vector<64x32xbf16>, vector<32x32xbf16>, vector<64x32xf32> -> vector<64x32xf32>
    %161 = arith.addf %153, %160 : vector<64x32xf32>
    %c0_148 = arith.constant 0 : index
    %c0_149 = arith.constant 0 : index
    %162 = vector.load %arg9[%c0_148, %c0_149] : memref<1x32xf32, #tpu.memory_space<vmem>>, vector<1x32xf32>
    %163 = vector.broadcast %162 : vector<1x32xf32> to vector<64x32xf32>
    %164 = arith.addf %161, %163 : vector<64x32xf32>
    %cst_150 = arith.constant 0.000000e+00 : f32
    %165 = vector.broadcast %cst_150 : f32 to vector<64x32xf32>
    %166 = arith.maximumf %164, %165 : vector<64x32xf32>
    %167 = arith.truncf %166 : vector<64x32xf32> to vector<64x32xbf16>
    %c0_151 = arith.constant 0 : index
    %c0_152 = arith.constant 0 : index
    %168 = vector.load %arg10[%c0_151, %c0_152] : memref<32x16xbf16, #tpu.memory_space<vmem>>, vector<32x16xbf16>
    %cst_153 = arith.constant dense<0.000000e+00> : vector<64x16xf32>
    %169 = tpu.matmul %167, %168, %cst_153 {dimension_numbers = #tpu.dot_dimension_numbers<[1], [0], [0], [1], [0, 0, 1, 1], [], []>} : vector<64x32xbf16>, vector<32x16xbf16>, vector<64x16xf32> -> vector<64x16xf32>
    %c0_154 = arith.constant 0 : index
    %c0_155 = arith.constant 0 : index
    %170 = vector.load %arg11[%c0_154, %c0_155] : memref<1x16xf32, #tpu.memory_space<vmem>>, vector<1x16xf32>
    %171 = vector.broadcast %170 : vector<1x16xf32> to vector<64x16xf32>
    %172 = arith.addf %169, %171 : vector<64x16xf32>
    %c0_156 = arith.constant 0 : index
    %c0_157 = arith.constant 0 : index
    %c0_158 = arith.constant 0 : index
    %173 = vector.load %arg18[%c0_156, %c0_157, %c0_158] : memref<1x64x16xf32, #tpu.memory_space<vmem>>, vector<1x64x16xf32>
    %174 = vector.shape_cast %173 : vector<1x64x16xf32> to vector<64x16xf32>
    %175 = vector.shape_cast %172 : vector<64x16xf32> to vector<1x64x16xf32>
    tpu.vector_store %arg18[%c0_156, %c0_157, %c0_158], %175 {strides = array<i32>} : memref<1x64x16xf32, #tpu.memory_space<vmem>>, vector<1x64x16xf32>,
    %cst_159 = arith.constant 1.562500e-02 : bf16
    %176 = vector.broadcast %cst_159 : bf16 to vector<1x64xbf16>
    %cst_160 = arith.constant dense<0.000000e+00> : vector<1x32xf32>
    %177 = tpu.matmul %176, %88, %cst_160 {dimension_numbers = #tpu.dot_dimension_numbers<[1], [0], [0], [1], [0, 0, 1, 1], [], []>} : vector<1x64xbf16>, vector<64x32xbf16>, vector<1x32xf32> -> vector<1x32xf32>
    %178 = arith.truncf %177 : vector<1x32xf32> to vector<1x32xbf16>
    %c0_161 = arith.constant 0 : index
    %c0_162 = arith.constant 0 : index
    %179 = vector.load %arg12[%c0_161, %c0_162] : memref<32x32xbf16, #tpu.memory_space<vmem>>, vector<32x32xbf16>
    %cst_163 = arith.constant dense<0.000000e+00> : vector<1x32xf32>
    %180 = tpu.matmul %178, %179, %cst_163 {dimension_numbers = #tpu.dot_dimension_numbers<[1], [0], [0], [1], [0, 0, 1, 1], [], []>} : vector<1x32xbf16>, vector<32x32xbf16>, vector<1x32xf32> -> vector<1x32xf32>
    %c0_164 = arith.constant 0 : index
    %c0_165 = arith.constant 0 : index
    %181 = vector.load %arg13[%c0_164, %c0_165] : memref<1x32xf32, #tpu.memory_space<vmem>>, vector<1x32xf32>
    %182 = arith.addf %180, %181 : vector<1x32xf32>
    %cst_166 = arith.constant 0.000000e+00 : f32
    %183 = vector.broadcast %cst_166 : f32 to vector<1x32xf32>
    %184 = arith.maximumf %182, %183 : vector<1x32xf32>
    %185 = arith.truncf %184 : vector<1x32xf32> to vector<1x32xbf16>
    %c0_167 = arith.constant 0 : index
    %c0_168 = arith.constant 0 : index
    %186 = vector.load %arg14[%c0_167, %c0_168] : memref<32x32xbf16, #tpu.memory_space<vmem>>, vector<32x32xbf16>
    %cst_169 = arith.constant dense<0.000000e+00> : vector<1x32xf32>
    %187 = tpu.matmul %185, %186, %cst_169 {dimension_numbers = #tpu.dot_dimension_numbers<[1], [0], [0], [1], [0, 0, 1, 1], [], []>} : vector<1x32xbf16>, vector<32x32xbf16>, vector<1x32xf32> -> vector<1x32xf32>
    %c0_170 = arith.constant 0 : index
    %c0_171 = arith.constant 0 : index
    %188 = vector.load %arg15[%c0_170, %c0_171] : memref<1x32xf32, #tpu.memory_space<vmem>>, vector<1x32xf32>
    %189 = arith.addf %187, %188 : vector<1x32xf32>
    %cst_172 = arith.constant 0.000000e+00 : f32
    %190 = vector.broadcast %cst_172 : f32 to vector<1x32xf32>
    %191 = arith.maximumf %189, %190 : vector<1x32xf32>
    %192 = arith.truncf %191 : vector<1x32xf32> to vector<1x32xbf16>
    %c0_173 = arith.constant 0 : index
    %c0_174 = arith.constant 0 : index
    %193 = vector.load %arg16[%c0_173, %c0_174] : memref<32x16xbf16, #tpu.memory_space<vmem>>, vector<32x16xbf16>
    %cst_175 = arith.constant dense<0.000000e+00> : vector<1x16xf32>
    %194 = tpu.matmul %192, %193, %cst_175 {dimension_numbers = #tpu.dot_dimension_numbers<[1], [0], [0], [1], [0, 0, 1, 1], [], []>} : vector<1x32xbf16>, vector<32x16xbf16>, vector<1x16xf32> -> vector<1x16xf32>
    %c0_176 = arith.constant 0 : index
    %c0_177 = arith.constant 0 : index
    %195 = vector.load %arg17[%c0_176, %c0_177] : memref<1x16xf32, #tpu.memory_space<vmem>>, vector<1x16xf32>
    %196 = arith.addf %194, %195 : vector<1x16xf32>
    %c0_178 = arith.constant 0 : index
    %c0_179 = arith.constant 0 : index
    %c0_180 = arith.constant 0 : index
    %197 = vector.load %arg19[%c0_178, %c0_179, %c0_180] : memref<1x1x16xf32, #tpu.memory_space<vmem>>, vector<1x1x16xf32>
    %198 = vector.shape_cast %197 : vector<1x1x16xf32> to vector<1x16xf32>
    %199 = vector.shape_cast %196 : vector<1x16xf32> to vector<1x1x16xf32>
    tpu.vector_store %arg19[%c0_178, %c0_179, %c0_180], %199 {strides = array<i32>} : memref<1x1x16xf32, #tpu.memory_space<vmem>>, vector<1x1x16xf32>,
    return
  }
  func.func @transform_0(%arg0: i32) -> (i32, i32, i32) {
    %c0_i32 = arith.constant 0 : i32
    %c0_i32_0 = arith.constant 0 : i32
    %c0_i32_1 = arith.constant 0 : i32
    return %arg0, %c0_i32, %c0_i32_0 : i32, i32, i32
  }
  func.func @transform_1(%arg0: i32) -> (i32, i32) {
    %c0_i32 = arith.constant 0 : i32
    %c0_i32_0 = arith.constant 0 : i32
    %c0_i32_1 = arith.constant 0 : i32
    return %c0_i32, %c0_i32_0 : i32, i32
  }
  func.func @transform_2(%arg0: i32) -> (i32, i32) {
    %c0_i32 = arith.constant 0 : i32
    %c0_i32_0 = arith.constant 0 : i32
    %c0_i32_1 = arith.constant 0 : i32
    return %c0_i32, %c0_i32_0 : i32, i32
  }
  func.func @transform_3(%arg0: i32) -> (i32, i32, i32) {
    %c0_i32 = arith.constant 0 : i32
    %c0_i32_0 = arith.constant 0 : i32
    %c0_i32_1 = arith.constant 0 : i32
    %c0_i32_2 = arith.constant 0 : i32
    return %c0_i32, %c0_i32_0, %c0_i32_1 : i32, i32, i32
  }
  func.func @transform_4(%arg0: i32) -> (i32, i32, i32) {
    %c0_i32 = arith.constant 0 : i32
    %c0_i32_0 = arith.constant 0 : i32
    %c0_i32_1 = arith.constant 0 : i32
    %c0_i32_2 = arith.constant 0 : i32
    return %c0_i32, %c0_i32_0, %c0_i32_1 : i32, i32, i32
  }
  func.func @transform_5(%arg0: i32) -> (i32, i32) {
    %c0_i32 = arith.constant 0 : i32
    %c0_i32_0 = arith.constant 0 : i32
    %c0_i32_1 = arith.constant 0 : i32
    return %c0_i32, %c0_i32_0 : i32, i32
  }
  func.func @transform_6(%arg0: i32) -> (i32, i32, i32) {
    %c0_i32 = arith.constant 0 : i32
    %c0_i32_0 = arith.constant 0 : i32
    %c0_i32_1 = arith.constant 0 : i32
    %c0_i32_2 = arith.constant 0 : i32
    return %c0_i32, %c0_i32_0, %c0_i32_1 : i32, i32, i32
  }
  func.func @transform_7(%arg0: i32) -> (i32, i32, i32) {
    %c0_i32 = arith.constant 0 : i32
    %c0_i32_0 = arith.constant 0 : i32
    %c0_i32_1 = arith.constant 0 : i32
    %c0_i32_2 = arith.constant 0 : i32
    return %c0_i32, %c0_i32_0, %c0_i32_1 : i32, i32, i32
  }
  func.func @transform_8(%arg0: i32) -> (i32, i32) {
    %c0_i32 = arith.constant 0 : i32
    %c0_i32_0 = arith.constant 0 : i32
    %c0_i32_1 = arith.constant 0 : i32
    return %c0_i32, %c0_i32_0 : i32, i32
  }
  func.func @transform_9(%arg0: i32) -> (i32, i32) {
    %c0_i32 = arith.constant 0 : i32
    %c0_i32_0 = arith.constant 0 : i32
    %c0_i32_1 = arith.constant 0 : i32
    return %c0_i32, %c0_i32_0 : i32, i32
  }
  func.func @transform_10(%arg0: i32) -> (i32, i32) {
    %c0_i32 = arith.constant 0 : i32
    %c0_i32_0 = arith.constant 0 : i32
    %c0_i32_1 = arith.constant 0 : i32
    return %c0_i32, %c0_i32_0 : i32, i32
  }
  func.func @transform_11(%arg0: i32) -> (i32, i32) {
    %c0_i32 = arith.constant 0 : i32
    %c0_i32_0 = arith.constant 0 : i32
    %c0_i32_1 = arith.constant 0 : i32
    return %c0_i32, %c0_i32_0 : i32, i32
  }
  func.func @transform_12(%arg0: i32) -> (i32, i32) {
    %c0_i32 = arith.constant 0 : i32
    %c0_i32_0 = arith.constant 0 : i32
    %c0_i32_1 = arith.constant 0 : i32
    return %c0_i32, %c0_i32_0 : i32, i32
  }
  func.func @transform_13(%arg0: i32) -> (i32, i32) {
    %c0_i32 = arith.constant 0 : i32
    %c0_i32_0 = arith.constant 0 : i32
    %c0_i32_1 = arith.constant 0 : i32
    return %c0_i32, %c0_i32_0 : i32, i32
  }
  func.func @transform_14(%arg0: i32) -> (i32, i32) {
    %c0_i32 = arith.constant 0 : i32
    %c0_i32_0 = arith.constant 0 : i32
    %c0_i32_1 = arith.constant 0 : i32
    return %c0_i32, %c0_i32_0 : i32, i32
  }
  func.func @transform_15(%arg0: i32) -> (i32, i32) {
    %c0_i32 = arith.constant 0 : i32
    %c0_i32_0 = arith.constant 0 : i32
    %c0_i32_1 = arith.constant 0 : i32
    return %c0_i32, %c0_i32_0 : i32, i32
  }
  func.func @transform_16(%arg0: i32) -> (i32, i32) {
    %c0_i32 = arith.constant 0 : i32
    %c0_i32_0 = arith.constant 0 : i32
    %c0_i32_1 = arith.constant 0 : i32
    return %c0_i32, %c0_i32_0 : i32, i32
  }
  func.func @transform_17(%arg0: i32) -> (i32, i32, i32) {
    %c0_i32 = arith.constant 0 : i32
    %c0_i32_0 = arith.constant 0 : i32
    %c0_i32_1 = arith.constant 0 : i32
    return %arg0, %c0_i32, %c0_i32_0 : i32, i32, i32
  }
  func.func @transform_18(%arg0: i32) -> (i32, i32, i32) {
    %c0_i32 = arith.constant 0 : i32
    %c0_i32_0 = arith.constant 0 : i32
    %c0_i32_1 = arith.constant 0 : i32
    return %arg0, %c0_i32, %c0_i32_0 : i32, i32, i32
  }
}

</mosaic_0001>

<bundles_post_ra>
// kernel: rcnn_forward.1
= control target key start
LH: loop header
LB: loop body
LE: loop exit
PB: predicated region body
PF: predicated region fallthrough
CT: control target
= control target key end

     0   :  { %s5222_s27 = smov 0   ;;  %s6642_s0 = inlined_call_operand.vmem [shape: bf16[2,256,32], index: 0, kind: input, shape index: {}]   ;;  %s6643_s1 = inlined_call_operand.vmem [shape: bf16[32,16], index: 1, kind: input, shape index: {}]   ;;  %s6644_s2 = inlined_call_operand.vmem [shape: f32[1,16], index: 2, kind: input, shape index: {}]   ;;  %s6645_s3 = inlined_call_operand.vmem [shape: bf16[9,64,256], index: 3, kind: input, shape index: {}]   ;;  %s6646_s4 = inlined_call_operand.vmem [shape: bf16[9,16,32], index: 4, kind: input, shape index: {}]   ;;  %s6647_s5 = inlined_call_operand.vmem [shape: f32[1,32], index: 5, kind: input, shape index: {}]   ;;  %s6648_s6 = inlined_call_operand.vmem [shape: bf16[9,64,64], index: 6, kind: input, shape index: {}]   ;;  %s6649_s7 = inlined_call_operand.vmem [shape: bf16[9,32,32], index: 7, kind: input, shape index: {}]   ;;  %s6650_s8 = inlined_call_operand.vmem [shape: f32[1,32], index: 8, kind: input, shape index: {}]   ;;  %s6651_s9 = inlined_call_operand.vmem [shape: bf16[32,16], index: 9, kind: input, shape index: {}]   ;;  %s6652_s10 = inlined_call_operand.vmem [shape: f32[1,16], index: 10, kind: input, shape index: {}]   ;;  %s6653_s11 = inlined_call_operand.vmem [shape: bf16[32,32], index: 11, kind: input, shape index: {}]   ;;  %s6654_s12 = inlined_call_operand.vmem [shape: f32[1,32], index: 12, kind: input, shape index: {}]   ;;  %s6655_s13 = inlined_call_operand.vmem [shape: bf16[32,32], index: 13, kind: input, shape index: {}]   ;;  %s6656_s14 = inlined_call_operand.vmem [shape: f32[1,32], index: 14, kind: input, shape index: {}]   ;;  %s6657_s15 = inlined_call_operand.vmem [shape: bf16[32,16], index: 15, kind: input, shape index: {}]   ;;  %s6658_s16 = inlined_call_operand.vmem [shape: f32[1,16], index: 16, kind: input, shape index: {}]   ;;  %s6659_s17 = inlined_call_operand.vmem [shape: f32[2,64,16], index: 17, kind: output, shape index: {0}]   ;;  %s6660_s18 = inlined_call_operand.vmem [shape: f32[2,1,16], index: 18, kind: output, shape index: {1}]  }
   0x1   :  { %6662 = sst [smem:[#allocation2_spill]] %s6642_s0 }
   0x2   :  { %6663 = sst [smem:[#allocation3_spill]] %s6643_s1 }
   0x3   :  { %6664 = sst [smem:[#allocation4_spill]] %s6644_s2 }
   0x4 LB: > { %s3971_s28 = sadd.s32 4294967295, %s5124_s27   ;;  %p3975_p0 = scmp.ge.s32.totalorder %s5124_s27, 1  ;;  %s5124_s27 = sphi %s5222_s27, %s29_s27  }
   0x5   : > { %p515_p1 = scmp.lt.s32.totalorder %s5124_s27, 3 }
   0x7   : > { %p516_p2 = pnand %p3975_p0, %p515_p1 }
   0x8   : > { %s6665_s0 = sld [smem:[#allocation3_spill]] (!%p516_p2)  ;;  %p572_p3 = scmp.lt.s32.totalorder (!%p516_p2), %s3971_s28, 1 }
   0x9   : > { %519 = sbr.rel (%p516_p2) target bundleno = 2628 (0xa44), region = 88  ;;  %s6666_s2 = sld [smem:[#allocation2_spill]] (!%p516_p2) }
   0xa   : > { %s6667_s26 = sld [smem:[#allocation4_spill]] (!%p516_p2) }
   0xe   : > { %v4953_v0 = vld [vmem:[%s6665_s0 + $0x8] sm:$0xff]  ;;  %v4952_v1 = vld [vmem:[%s6665_s0] sm:$0xff]  ;;  %s6669_s28 = smov (!%p572_p3, %s3971_s28), 1  ;;  %vm719_vm0 = vcmask 261120   ;;  %vm1137_vm1 = vcmask 130048   ;;  %vm2461_vm2 = vcmask 523264  }
   0xf   : > { %774 = vmatpush.bf16.msra.mxu0 %v4953_v0  ;;  %s4934_s20 = sshll.u32 %s6669_s28, 7  ;;  %s4935_s22 = sshll.u32 %s6669_s28, 6  ;;  %vm3889_vm3 = vcmask 122880  }
  0x10   : > { %s5242_s23 = scalar_lea.vmem %s6666_s2, %s4934_s20  ;;  %v5264_v12 = vld [vmem:[%s6667_s26] ss:$0 sm:$0xff]  ;;  %s6594_s26 = scalar_lea.vmem %s6659_s17, %s4935_s22 }
  0x11   : > { %v4936_v2 = vld [vmem:[%s5242_s23] sm:$0xff]  ;;  %v4937_v3 = vld [vmem:[%s5242_s23 + $0x8] sm:$0xff]  ;;  %v4938_v4 = vld [vmem:[%s5242_s23 + $0x10] sm:$0xff]  ;;  %s584_s20 = scalar_lea.vmem %s6660_s18, %s6669_s28 }
  0x12   : > { %v4939_v5 = vld [vmem:[%s5242_s23 + $0x18] sm:$0xff]  ;;  %v4940_v6 = vld [vmem:[%s5242_s23 + $0x20] sm:$0xff]  ;;  %v4941_v7 = vld [vmem:[%s5242_s23 + $0x28] sm:$0xff] }
  0x13   : > { %775 = vmatpush.bf16.msra.mxu0 %v4952_v1  ;;  %v4942_v8 = vld [vmem:[%s5242_s23 + $0x30] sm:$0xff]  ;;  %v4943_v9 = vld [vmem:[%s5242_s23 + $0x38] sm:$0xff]  ;;  %v4944_v10 = vld [vmem:[%s5242_s23 + $0x40] sm:$0xff] }
  0x14   : > { %v4945_v19 = vld [vmem:[%s5242_s23 + $0x48] sm:$0xff]  ;;  %v4946_v27 = vld [vmem:[%s5242_s23 + $0x50] sm:$0xff]  ;;  %v4947_v35 = vld [vmem:[%s5242_s23 + $0x58] sm:$0xff] }
  0x15   : > { %v4948_v43 = vld [vmem:[%s5242_s23 + $0x60] sm:$0xff]  ;;  %v4949_v46 = vld [vmem:[%s5242_s23 + $0x68] sm:$0xff]  ;;  %v4950_v49 = vld [vmem:[%s5242_s23 + $0x70] sm:$0xff] }
  0x16   : > { %4052 = vmatmul.msk.bf16.vlgmr.msra.gmra.mxu0 %vm719_vm0, %v4936_v2  ;;  %v4951_v52 = vld [vmem:[%s5242_s23 + $0x78] sm:$0xff] }
  0x26   : > { %4053 = vmatmul.msk.bf16.gmra.mxu0 %vm719_vm0, %v4937_v3 }
  0x36   : > { %4054 = vmatmul.msk.bf16.gmra.mxu0 %vm719_vm0, %v4938_v4 }
  0x46   : > { %4055 = vmatmul.msk.bf16.gmra.mxu0 %vm719_vm0, %v4939_v5 }
  0x56   : > { %4056 = vmatmul.msk.bf16.gmra.mxu0 %vm719_vm0, %v4940_v6 }
  0x66   : > { %4057 = vmatmul.msk.bf16.gmra.mxu0 %vm719_vm0, %v4941_v7 }
  0x76   : > { %4058 = vmatmul.msk.bf16.gmra.mxu0 %vm719_vm0, %v4942_v8 }
  0x86   : > { %4059 = vmatmul.msk.bf16.gmra.mxu0 %vm719_vm0, %v4943_v9 }
  0x93   : > { %v777_v11 = vpop.f32.mrf.mxu0 }
  0x94   : > { %v778_v13 = vadd.f32 %v5264_v12, %v777_v11 }
  0x96   : > { %4060 = vmatmul.msk.bf16.gmra.mxu0 %vm719_vm0, %v4944_v10  ;;  %v857_v16 = vmax.f32 %v778_v13, 0.0 }
  0x9b   : > { %v779_v14 = vpop.f32.mrf.mxu0 }
  0x9c   : > { %v780_v15 = vadd.f32 %v5264_v12, %v779_v14 }
  0x9e   : > { %v858_v17 = vmax.f32 %v780_v15, 0.0 }
  0xa0   : > { %v5269_v18 = vpack.c.bf16 %v858_v17, %v857_v16 }
  0xa3   : > { %v782_v20 = vpop.f32.mrf.mxu0 }
  0xa4   : > { %v783_v21 = vadd.f32 %v5264_v12, %v782_v20 }
  0xa6   : > { %4061 = vmatmul.msk.bf16.gmra.mxu0 %vm719_vm0, %v4945_v19  ;;  %v859_v24 = vmax.f32 %v783_v21, 0.0  ;;  %v4070_v21 = vld [vmem:[%s6645_s3] sm:$0xf] }
  0xab   : > { %v784_v22 = vpop.f32.mrf.mxu0 }
  0xac   : > { %v785_v23 = vadd.f32 %v5264_v12, %v784_v22  ;;  %v4955_v22 = vld [vmem:[%s6645_s3 + $0x4] sm:$0xf0] }
  0xae   : > { %v860_v25 = vmax.f32 %v785_v23, 0.0  ;;  %v4071_v23 = vor.u32 %v4955_v22, %v4070_v21 }
  0xb0   : > { %v5275_v26 = vpack.c.bf16 %v860_v25, %v859_v24  ;;  %v4268_v24 = vld [vmem:[%s6645_s3 + $0x100] sm:$0xf]  ;;  %v4991_v25 = vld [vmem:[%s6645_s3 + $0x104] sm:$0xf0] }
  0xb3   : > { %v787_v28 = vpop.f32.mrf.mxu0 }
  0xb4   : > { %v788_v29 = vadd.f32 %v5264_v12, %v787_v28 }
  0xb6   : > { %4062 = vmatmul.msk.bf16.gmra.mxu0 %vm719_vm0, %v4946_v27  ;;  %v861_v32 = vmax.f32 %v788_v29, 0.0  ;;  %v4269_v27 = vor.u32 %v4991_v25, %v4268_v24 }
  0xbb   : > { %v789_v30 = vpop.f32.mrf.mxu0 }
  0xbc   : > { %v790_v31 = vadd.f32 %v5264_v12, %v789_v30  ;;  %v4078_v30 = vld [vmem:[%s6645_s3 + $0x10] sm:$0xf] }
  0xbe   : > { %v862_v33 = vmax.f32 %v790_v31, 0.0  ;;  %v4957_v31 = vld [vmem:[%s6645_s3 + $0x14] sm:$0xf0] }
  0xc0   : > { %v5281_v34 = vpack.c.bf16 %v862_v33, %v861_v32  ;;  %v4079_v32 = vor.u32 %v4957_v31, %v4078_v30  ;;  %v4276_v33 = vld [vmem:[%s6645_s3 + $0x110] sm:$0xf] }
  0xc3   : > { %v792_v36 = vpop.f32.mrf.mxu0 }
  0xc4   : > { %v793_v37 = vadd.f32 %v5264_v12, %v792_v36 }
  0xc6   : > { %4063 = vmatmul.msk.bf16.gmra.mxu0 %vm719_vm0, %v4947_v35  ;;  %v863_v40 = vmax.f32 %v793_v37, 0.0  ;;  %v4993_v35 = vld [vmem:[%s6645_s3 + $0x114] sm:$0xf0] }
  0xc7   : > { %v4277_v36 = vor.u32 %v4993_v35, %v4276_v33 }
  0xcb   : > { %v794_v38 = vpop.f32.mrf.mxu0 }
  0xcc   : > { %v795_v39 = vadd.f32 %v5264_v12, %v794_v38 }
  0xce   : > { %v864_v41 = vmax.f32 %v795_v39, 0.0  ;;  %v4086_v39 = vld [vmem:[%s6645_s3 + $0x20] sm:$0xf] }
  0xd0   : > { %v5287_v42 = vpack.c.bf16 %v864_v41, %v863_v40  ;;  %v4959_v40 = vld [vmem:[%s6645_s3 + $0x24] sm:$0xf0] }
  0xd1   : > { %v4087_v41 = vor.u32 %v4959_v40, %v4086_v39 }
  0xd3   : > { %v797_v44 = vpop.f32.mrf.mxu0 }
  0xd4   : > { %v798_v6 = vadd.f32 %v5264_v12, %v797_v44  ;;  %v4995_v44 = vld [vmem:[%s6645_s3 + $0x124] sm:$0xf0] }
  0xd6   : > { %4064 = vmatmul.msk.bf16.gmra.mxu0 %vm719_vm0, %v4948_v43  ;;  %v865_v10 = vmax.f32 %v798_v6, 0.0  ;;  %v4284_v43 = vld [vmem:[%s6645_s3 + $0x120] sm:$0xf] }
  0xdb   : > { %v799_v45 = vpop.f32.mrf.mxu0 }
  0xdc   : > { %v800_v3 = vadd.f32 %v5264_v12, %v799_v45  ;;  %v4285_v45 = vor.u32 %v4995_v44, %v4284_v43 }
  0xde   : > { %v866_v8 = vmax.f32 %v800_v3, 0.0 }
  0xe0   : > { %v5324_v13 = vpack.c.bf16 %v866_v8, %v865_v10 }
  0xe3   : > { %v802_v47 = vpop.f32.mrf.mxu0 }
  0xe4   : > { %v803_v0 = vadd.f32 %v5264_v12, %v802_v47 }
  0xe6   : > { %4065 = vmatmul.msk.bf16.gmra.mxu0 %vm719_vm0, %v4949_v46  ;;  %v867_v7 = vmax.f32 %v803_v0, 0.0 }
  0xeb   : > { %v804_v48 = vpop.f32.mrf.mxu0 }
  0xec   : > { %v805_v61 = vadd.f32 %v5264_v12, %v804_v48  ;;  %v4094_v48 = vld [vmem:[%s6645_s3 + $0x30] sm:$0xf] }
  0xee   : > { %v868_v4 = vmax.f32 %v805_v61, 0.0 }
  0xf0   : > { %v5317_v9 = vpack.c.bf16 %v868_v4, %v867_v7 }
  0xf3   : > { %v807_v50 = vpop.f32.mrf.mxu0 }
  0xf4   : > { %v808_v58 = vadd.f32 %v5264_v12, %v807_v50 }
  0xf6   : > { %4066 = vmatmul.msk.bf16.gmra.mxu0 %vm719_vm0, %v4950_v49  ;;  %v869_v1 = vmax.f32 %v808_v58, 0.0  ;;  %v4961_v49 = vld [vmem:[%s6645_s3 + $0x34] sm:$0xf0] }
  0xf7   : > { %v4095_v50 = vor.u32 %v4961_v49, %v4094_v48  ;;  %v4112_v48 = vld [vmem:[%s6645_s3 + $0x48] sm:$0xf0]  ;;  %v4999_v49 = vld [vmem:[%s6645_s3 + $0x144] sm:$0xf] }
  0xfb   : > { %v809_v51 = vpop.f32.mrf.mxu0 }
  0xfc   : > { %v810_v56 = vadd.f32 %v5264_v12, %v809_v51  ;;  %v4292_v51 = vld [vmem:[%s6645_s3 + $0x130] sm:$0xf] }
  0xfe   : > { %v870_v62 = vmax.f32 %v810_v56, 0.0  ;;  %v4964_v56 = vld [vmem:[%s6645_s3 + $0x44] sm:$0xf0] }
 0x100   : > { %v5311_v5 = vpack.c.bf16 %v870_v62, %v869_v1 }
 0x103   : > { %v812_v53 = vpop.f32.mrf.mxu0 }
 0x104   : > { %v813_v54 = vadd.f32 %v5264_v12, %v812_v53 }
 0x106   : > { %4067 = vmatmul.msk.bf16.gmra.mxu0 %vm719_vm0, %v4951_v52  ;;  %v871_v59 = vmax.f32 %v813_v54, 0.0  ;;  %v4997_v52 = vld [vmem:[%s6645_s3 + $0x134] sm:$0xf0] }
 0x107   : > { %v4293_v53 = vor.u32 %v4997_v52, %v4292_v51  ;;  %v5016_v52 = vld [vmem:[%s6646_s4 + $0x30] sm:$0xff] }
 0x10b   : > { %v814_v55 = vpop.f32.mrf.mxu0 }
 0x10c   : > { %v815_v57 = vadd.f32 %v5264_v12, %v814_v55  ;;  %v4110_v55 = vld [vmem:[%s6645_s3 + $0x40] sm:$0xf] }
 0x10d   : > { %v4111_v58 = vor.u32 %v4964_v56, %v4110_v55  ;;  %v4126_v56 = vld [vmem:[%s6645_s3 + $0x60] sm:$0xf] }
 0x10e   : > { %v872_v60 = vmax.f32 %v815_v57, 0.0 }
 0x110   : > { %v5302_v63 = vpack.c.bf16 %v872_v60, %v871_v59 }
 0x112   : > { %953 = vmatpush.bf16.msra.mxu1 %v5302_v63  ;;  %1066 = vmatpush.bf16.msra.mxu3 %v5302_v63 }
 0x113   : > { %1613 = vmatpush.bf16.msrb.mxu0 %v5302_v63  ;;  %v5308_v2 = vpop.f32.mrf.mxu0 }
 0x114   : > { %v818_v44 = vadd.f32 %v5264_v12, %v5308_v2  ;;  %v4963_v2 = vld [vmem:[%s6645_s3 + $0x44] sm:$0xf] }
 0x116   : > { %954 = vmatpush.bf16.msra.mxu1 %v5311_v5  ;;  %1067 = vmatpush.bf16.msra.mxu3 %v5311_v5 }
 0x117   : > { %1614 = vmatpush.bf16.msrb.mxu0 %v5311_v5 }
 0x11a   : > { %955 = vmatpush.bf16.msra.mxu1 %v5317_v9  ;;  %1068 = vmatpush.bf16.msra.mxu3 %v5317_v9 }
 0x11b   : > { %1615 = vmatpush.bf16.msrb.mxu0 %v5317_v9  ;;  %v5322_v11 = vpop.f32.mrf.mxu0 }
 0x11e   : > { %956 = vmatpush.bf16.msra.mxu1 %v5324_v13  ;;  %1069 = vmatpush.bf16.msra.mxu3 %v5324_v13 }
 0x11f   : > { %1616 = vmatpush.bf16.msrb.mxu0 %v5324_v13 }
 0x122   : > { %957 = vmatpush.bf16.msra.mxu1 %v5287_v42  ;;  %1070 = vmatpush.bf16.msra.mxu3 %v5287_v42 }
 0x123   : > { %1617 = vmatpush.bf16.msrb.mxu0 %v5287_v42  ;;  %v5332_v14 = vpop.f32.mrf.mxu0 }
 0x124   : > { %v823_v39 = vadd.f32 %v5264_v12, %v5332_v14 }
 0x126   : > { %958 = vmatpush.bf16.msra.mxu1 %v5281_v34  ;;  %1071 = vmatpush.bf16.msra.mxu3 %v5281_v34 }
 0x127   : > { %1618 = vmatpush.bf16.msrb.mxu0 %v5281_v34 }
 0x12a   : > { %959 = vmatpush.bf16.msra.mxu1 %v5275_v26  ;;  %1072 = vmatpush.bf16.msra.mxu3 %v5275_v26 }
 0x12b   : > { %1619 = vmatpush.bf16.msrb.mxu0 %v5275_v26  ;;  %v5340_v15 = vpop.f32.mrf.mxu0 }
 0x12e   : > { %960 = vmatpush.bf16.msra.mxu1 %v5269_v18  ;;  %1073 = vmatpush.bf16.msra.mxu3 %v5269_v18 }
 0x12f   : > { %1620 = vmatpush.bf16.msrb.mxu0 %v5269_v18 }
 0x131   : > { %961 = vmatmul.bf16.vlgmr.msra.gmra.mxu1 %v4071_v23  ;;  %1074 = vmatmul.bf16.vlgmr.msra.gmra.mxu3 %v4111_v58 }
 0x132   : > { %1621 = vmatmul.bf16.vlgmr.msrb.gmra.mxu0 %v4269_v27 }
 0x133   : > { %v5345_v16 = vpop.f32.mrf.mxu0 }
 0x13b   : > { %v5347_v17 = vpop.f32.mrf.mxu0 }
 0x141   : > { %966 = vmatmul.bf16.gmra.mxu1 %v4079_v32 }
 0x142   : > { %1626 = vmatmul.bf16.gmra.mxu0 %v4277_v36 }
 0x143   : > { %v5349_v19 = vpop.f32.mrf.mxu0 }
 0x14b   : > { %v5351_v20 = vpop.f32.mrf.mxu0 }
 0x14c   : > { %v835_v25 = vadd.f32 %v5264_v12, %v5351_v20  ;;  %v828_v20 = vadd.f32 %v5264_v12, %v5345_v16  ;;  %v4966_v16 = vld [vmem:[%s6645_s3 + $0x54] sm:$0xf0] }
 0x14e   : > { %v880_v32 = vmax.f32 %v835_v25, 0.0  ;;  %v877_v40 = vmax.f32 %v828_v20, 0.0 }
 0x151   : > { %971 = vmatmul.bf16.gmra.mxu1 %v4087_v41 }
 0x152   : > { %1631 = vmatmul.bf16.gmra.mxu0 %v4285_v45  ;;  %v875_v45 = vmax.f32 %v823_v39, 0.0  ;;  %v4975_v39 = vld [vmem:[%s6645_s3 + $0x94] sm:$0xf0] }
 0x153   : > { %v837_v28 = vpop.f32.mrf.mxu0 }
 0x154   : > { %v838_v23 = vadd.f32 %v5264_v12, %v837_v28  ;;  %v830_v28 = vadd.f32 %v5264_v12, %v5347_v17  ;;  %v825_v17 = vadd.f32 %v5264_v12, %v5340_v15  ;;  %v820_v15 = vadd.f32 %v5264_v12, %v5322_v11  ;;  %v4954_v11 = vld [vmem:[%s6645_s3 + $0x4] sm:$0xf] }
 0x156   : > { %v881_v31 = vmax.f32 %v838_v23, 0.0  ;;  %v878_v36 = vmax.f32 %v830_v28, 0.0  ;;  %v876_v41 = vmax.f32 %v825_v17, 0.0  ;;  %v874_v14 = vmax.f32 %v820_v15, 0.0  ;;  %v4128_v23 = vld [vmem:[%s6645_s3 + $0x68] sm:$0xf0] }
 0x157   : > { %v4168_v28 = vld [vmem:[%s6645_s3 + $0x80] sm:$0xf] }
 0x158   : > { %v5460_v43 = vpack.c.bf16 %v878_v36, %v877_v40  ;;  %v4969_v36 = vld [vmem:[%s6645_s3 + $0x74] sm:$0xf] }
 0x15b   : > { %v839_v29 = vpop.f32.mrf.mxu0 }
 0x15c   : > { %v840_v10 = vadd.f32 %v5264_v12, %v839_v29  ;;  %v833_v29 = vadd.f32 %v5264_v12, %v5349_v19  ;;  %v4118_v19 = vld [vmem:[%s6645_s3 + $0x50] sm:$0xf] }
 0x15e   : > { %v882_v27 = vmax.f32 %v840_v10, 0.0  ;;  %v879_v35 = vmax.f32 %v833_v29, 0.0  ;;  %v4088_v10 = vld [vmem:[%s6645_s3 + $0x28] sm:$0xf0]  ;;  %v4960_v29 = vld [vmem:[%s6645_s3 + $0x34] sm:$0xf] }
 0x160   : > { %v5436_v33 = vpack.c.bf16 %v882_v27, %v881_v31  ;;  %v4971_v27 = vld [vmem:[%s6646_s4 + $0x8] sm:$0xff]  ;;  %v4096_v31 = vld [vmem:[%s6645_s3 + $0x38] sm:$0xf0] }
 0x161   : > { %976 = vmatmul.bf16.gmra.mxu1 %v4095_v50  ;;  %v4320_v50 = vld [vmem:[%s6645_s3 + $0x148] sm:$0xf0]  ;;  %v4099_v20 = vor.u32 %v4960_v29, %v4096_v31 }
 0x162   : > { %1636 = vmatmul.bf16.gmra.mxu0 %v4293_v53  ;;  %v4323_v55 = vor.u32 %v4999_v49, %v4320_v50 }
 0x163   : > { %v842_v37 = vpop.f32.mrf.mxu0 }
 0x164   : > { %v843_v7 = vadd.f32 %v5264_v12, %v842_v37  ;;  %v5448_v37 = vpack.c.bf16 %v880_v32, %v879_v35  ;;  %v4973_v32 = vld [vmem:[%s6645_s3 + $0x84] sm:$0xf0] }
 0x165   : > { %v4169_v35 = vor.u32 %v4973_v32, %v4168_v28  ;;  %v5007_v28 = vld [vmem:[%s6646_s4 + $0x28] sm:$0xff] }
 0x166   : > { %v883_v24 = vmax.f32 %v843_v7, 0.0 }
 0x16b   : > { %v844_v38 = vpop.f32.mrf.mxu0 }
 0x16c   : > { %v845_v3 = vadd.f32 %v5264_v12, %v844_v38  ;;  %v4119_v38 = vor.u32 %v4966_v16, %v4118_v19  ;;  %v4136_v16 = vld [vmem:[%s6645_s3 + $0x78] sm:$0xf0] }
 0x16d   : > { %v4139_v40 = vor.u32 %v4969_v36, %v4136_v16  ;;  %v4242_v16 = vld [vmem:[%s6645_s3 + $0xf0] sm:$0xf] }
 0x16e   : > { %v884_v21 = vmax.f32 %v845_v3, 0.0  ;;  %1079 = vmatmul.bf16.gmra.mxu3 %v4119_v38  ;;  %v4134_v3 = vld [vmem:[%s6645_s3 + $0x70] sm:$0xf] }
 0x16f   : > { %v4176_v38 = vld [vmem:[%s6645_s3 + $0x90] sm:$0xf] }
 0x170   : > { %v5427_v30 = vpack.c.bf16 %v884_v21, %v883_v24  ;;  %v4967_v21 = vld [vmem:[%s6645_s3 + $0x64] sm:$0xf]  ;;  %v4177_v15 = vor.u32 %v4975_v39, %v4176_v38  ;;  %v4988_v38 = vld [vmem:[%s6645_s3 + $0xf4] sm:$0xf0] }
 0x171   : > { %v4131_v25 = vor.u32 %v4967_v21, %v4128_v23  ;;  %v4986_v21 = vld [vmem:[%s6645_s3 + $0xe4] sm:$0xf0] }
 0x173   : > { %v847_v46 = vpop.f32.mrf.mxu0 }
 0x174   : > { %v848_v62 = vadd.f32 %v5264_v12, %v847_v46  ;;  %v5467_v46 = vpack.c.bf16 %v876_v41, %v875_v45  ;;  %v4977_v45 = vld [vmem:[%s6645_s3 + $0xa4] sm:$0xf0] }
 0x176   : > { %v885_v8 = vmax.f32 %v848_v62, 0.0  ;;  %v4120_v62 = vld [vmem:[%s6645_s3 + $0x58] sm:$0xf0] }
 0x17b   : > { %v849_v47 = vpop.f32.mrf.mxu0 }
 0x17c   : > { %v850_v60 = vadd.f32 %v5264_v12, %v849_v47  ;;  %v873_v47 = vmax.f32 %v818_v44, 0.0  ;;  %v4184_v44 = vld [vmem:[%s6645_s3 + $0xa0] sm:$0xf] }
 0x17e   : > { %v886_v4 = vmax.f32 %v850_v60, 0.0  ;;  %v5490_v51 = vpack.c.bf16 %v874_v14, %v873_v47  ;;  %v4080_v60 = vld [vmem:[%s6645_s3 + $0x18] sm:$0xf0]  ;;  %v4185_v47 = vor.u32 %v4977_v45, %v4184_v44  ;;  %v4243_v45 = vor.u32 %v4988_v38, %v4242_v16  ;;  %v4976_v16 = vld [vmem:[%s6645_s3 + $0xa4] sm:$0xf] }
 0x17f   : > { %v4186_v38 = vld [vmem:[%s6645_s3 + $0xa8] sm:$0xf0] }
 0x180   : > { %v5419_v22 = vpack.c.bf16 %v886_v4, %v885_v8  ;;  %v4970_v4 = vld [vmem:[%s6645_s3 + $0x74] sm:$0xf0]  ;;  %v4958_v8 = vld [vmem:[%s6645_s3 + $0x24] sm:$0xf] }
 0x181   : > { %v4135_v7 = vor.u32 %v4970_v4, %v4134_v3  ;;  %v4091_v24 = vor.u32 %v4958_v8, %v4088_v10  ;;  %v4234_v10 = vld [vmem:[%s6645_s3 + $0xe0] sm:$0xf] }
 0x183   : > { %v852_v54 = vpop.f32.mrf.mxu0 }
 0x184   : > { %v853_v57 = vadd.f32 %v5264_v12, %v852_v54  ;;  %v4115_v54 = vor.u32 %v4963_v2, %v4112_v48  ;;  %v4979_v2 = vld [vmem:[%s6645_s3 + $0xb4] sm:$0xf0] }
 0x186   : > { %v887_v0 = vmax.f32 %v853_v57, 0.0  ;;  %v4968_v57 = vld [vmem:[%s6645_s3 + $0x64] sm:$0xf0] }
 0x187   : > { %v4127_v58 = vor.u32 %v4968_v57, %v4126_v56 }
 0x189   : > { %1084 = vmatmul.bf16.gmra.mxu3 %v4127_v58  ;;  %v4226_v58 = vld [vmem:[%s6645_s3 + $0xd0] sm:$0xf] }
 0x18b   : > { %v854_v59 = vpop.f32.mrf.mxu0 }
 0x18c   : > { %v855_v61 = vadd.f32 %v5264_v12, %v854_v59  ;;  %v4072_v12 = vld [vmem:[%s6645_s3 + $0x8] sm:$0xf0]  ;;  %v4956_v59 = vld [vmem:[%s6645_s3 + $0x14] sm:$0xf] }
 0x18d   : > { %v4075_v53 = vor.u32 %v4954_v11, %v4072_v12  ;;  %v4192_v12 = vld [vmem:[%s6645_s3 + $0xb0] sm:$0xf] }
 0x18e   : > { %v888_v1 = vmax.f32 %v855_v61, 0.0  ;;  %v4965_v61 = vld [vmem:[%s6645_s3 + $0x54] sm:$0xf]  ;;  %v4193_v48 = vor.u32 %v4979_v2, %v4192_v12 }
 0x190   : > { %v5412_v6 = vpack.c.bf16 %v888_v1, %v887_v0  ;;  %v4083_v0 = vor.u32 %v4956_v59, %v4080_v60  ;;  %v4123_v1 = vor.u32 %v4965_v61, %v4120_v62  ;;  %v4984_v59 = vld [vmem:[%s6645_s3 + $0xd4] sm:$0xf0] }
 0x191   : > { %v4227_v61 = vor.u32 %v4984_v59, %v4226_v58 }
 0x192   : > { %982 = vmatpush.bf16.msra.mxu2 %v5412_v6  ;;  %1095 = vmatpush.bf16.msrb.mxu1 %v5412_v6 }
 0x193   : > { %1811 = vmatpush.bf16.msra.mxu0 %v5412_v6 }
 0x196   : > { %983 = vmatpush.bf16.msra.mxu2 %v5419_v22  ;;  %1096 = vmatpush.bf16.msrb.mxu1 %v5419_v22 }
 0x197   : > { %1812 = vmatpush.bf16.msra.mxu0 %v5419_v22 }
 0x199   : > { %1089 = vmatmul.bf16.gmra.mxu3 %v4135_v7 }
 0x19a   : > { %984 = vmatpush.bf16.msra.mxu2 %v5427_v30  ;;  %1097 = vmatpush.bf16.msrb.mxu1 %v5427_v30 }
 0x19b   : > { %1813 = vmatpush.bf16.msra.mxu0 %v5427_v30 }
 0x19e   : > { %985 = vmatpush.bf16.msra.mxu2 %v5436_v33  ;;  %1098 = vmatpush.bf16.msrb.mxu1 %v5436_v33 }
 0x19f   : > { %1814 = vmatpush.bf16.msra.mxu0 %v5436_v33 }
 0x1a2   : > { %986 = vmatpush.bf16.msra.mxu2 %v5448_v37  ;;  %1099 = vmatpush.bf16.msrb.mxu1 %v5448_v37 }
 0x1a3   : > { %1815 = vmatpush.bf16.msra.mxu0 %v5448_v37 }
 0x1a6   : > { %987 = vmatpush.bf16.msra.mxu2 %v5460_v43  ;;  %1100 = vmatpush.bf16.msrb.mxu1 %v5460_v43 }
 0x1a7   : > { %1816 = vmatpush.bf16.msra.mxu0 %v5460_v43 }
 0x1aa   : > { %988 = vmatpush.bf16.msra.mxu2 %v5467_v46  ;;  %1101 = vmatpush.bf16.msrb.mxu1 %v5467_v46 }
 0x1ab   : > { %1817 = vmatpush.bf16.msra.mxu0 %v5467_v46 }
 0x1ae   : > { %989 = vmatpush.bf16.msra.mxu2 %v5490_v51  ;;  %1102 = vmatpush.bf16.msrb.mxu1 %v5490_v51  ;;  %v5578_v19 = vpop.f32.mrf.mxu1 }
 0x1af   : > { %1818 = vmatpush.bf16.msra.mxu0 %v5490_v51 }
 0x1b1   : > { %990 = vmatmul.bf16.vlgmr.msra.gmra.mxu2 %v4075_v53  ;;  %1103 = vmatmul.bf16.vlgmr.msrb.gmra.mxu1 %v4115_v54  ;;  %v4982_v53 = vld [vmem:[%s6645_s3 + $0xc4] sm:$0xf0] }
 0x1b2   : > { %5097 = vmatpush.bf16.msrb.mxu2 %v5412_v6  ;;  %1275 = vmatpush.bf16.msra.mxu1 %v5302_v63 }
 0x1b3   : > { %2041 = vmatpush.bf16.msrb.mxu0 %v5016_v52  ;;  %v4218_v52 = vld [vmem:[%s6645_s3 + $0xc0] sm:$0xf] }
 0x1b4   : > { %1819 = vmatmul.bf16.vlgmr.msra.gmra.mxu0 %v4323_v55  ;;  %v4219_v54 = vor.u32 %v4982_v53, %v4218_v52  ;;  %v4962_v55 = vld [vmem:[%s6646_s4] sm:$0xff]  ;;  %v1075_v57 = vpop.f32.mrf.mxu3 }
 0x1b5   : > { %1204 = vmatpush.bf16.msrb.mxu3 %v4962_v55  ;;  %v4270_v55 = vld [vmem:[%s6645_s3 + $0x108] sm:$0xf0] }
 0x1b6   : > { %5098 = vmatpush.bf16.msrb.mxu2 %v5419_v22  ;;  %1276 = vmatpush.bf16.msra.mxu1 %v5311_v5  ;;  %v5582_v17 = vpop.f32.mrf.mxu1 }
 0x1b7   : > { %2289 = vmatpush.bf16.msra.mxu0 %v5302_v63 }
 0x1ba   : > { %5099 = vmatpush.bf16.msrb.mxu2 %v5427_v30  ;;  %1277 = vmatpush.bf16.msra.mxu1 %v5317_v9 }
 0x1bb   : > { %2290 = vmatpush.bf16.msra.mxu0 %v5311_v5 }
 0x1bc   : > { %v1077_v62 = vpop.f32.mrf.mxu3 }
 0x1be   : > { %5100 = vmatpush.bf16.msrb.mxu2 %v5436_v33  ;;  %1278 = vmatpush.bf16.msra.mxu1 %v5324_v13  ;;  %v5600_v41 = vpop.f32.mrf.mxu1 }
 0x1bf   : > { %2291 = vmatpush.bf16.msra.mxu0 %v5317_v9 }
 0x1c1   : > { %995 = vmatmul.bf16.gmra.mxu2 %v4083_v0  ;;  %1108 = vmatmul.bf16.gmra.mxu1 %v4123_v1 }
 0x1c2   : > { %5101 = vmatpush.bf16.msrb.mxu2 %v5448_v37  ;;  %1279 = vmatpush.bf16.msra.mxu1 %v5287_v42 }
 0x1c3   : > { %2292 = vmatpush.bf16.msra.mxu0 %v5324_v13 }
 0x1c6   : > { %5102 = vmatpush.bf16.msrb.mxu2 %v5460_v43  ;;  %1280 = vmatpush.bf16.msra.mxu1 %v5281_v34  ;;  %v5613_v14 = vpop.f32.mrf.mxu1 }
 0x1c7   : > { %2293 = vmatpush.bf16.msra.mxu0 %v5287_v42 }
 0x1ca   : > { %5103 = vmatpush.bf16.msrb.mxu2 %v5467_v46  ;;  %1281 = vmatpush.bf16.msra.mxu1 %v5275_v26 }
 0x1cb   : > { %2294 = vmatpush.bf16.msra.mxu0 %v5281_v34 }
 0x1ce   : > { %5104 = vmatpush.bf16.msrb.mxu2 %v5490_v51  ;;  %1282 = vmatpush.bf16.msra.mxu1 %v5269_v18  ;;  %v5620_v11 = vpop.f32.mrf.mxu1 }
 0x1cf   : > { %2295 = vmatpush.bf16.msra.mxu0 %v5275_v26 }
 0x1d1   : > { %1000 = vmatmul.bf16.gmra.mxu2 %v4091_v24  ;;  %1113 = vmatmul.bf16.gmra.mxu1 %v4131_v25 }
 0x1d2   : > { %1444 = vmatpush.bf16.msrb.mxu1 %v5302_v63  ;;  %1157 = vmatpush.bf16.msra.mxu2 %v4971_v27  ;;  %v4235_v27 = vor.u32 %v4986_v21, %v4234_v10 }
 0x1d3   : > { %2296 = vmatpush.bf16.msra.mxu0 %v5269_v18 }
 0x1d6   : > { %1445 = vmatpush.bf16.msrb.mxu1 %v5311_v5  ;;  %v5631_v49 = vpop.f32.mrf.mxu1 }
 0x1da   : > { %1446 = vmatpush.bf16.msrb.mxu1 %v5317_v9 }
 0x1de   : > { %1447 = vmatpush.bf16.msrb.mxu1 %v5324_v13  ;;  %v5633_v50 = vpop.f32.mrf.mxu1 }
 0x1e1   : > { %1005 = vmatmul.bf16.gmra.mxu2 %v4099_v20  ;;  %1283 = vmatmul.bf16.vlgmr.msra.gmra.mxu1 %v4169_v35 }
 0x1e2   : > { %1448 = vmatpush.bf16.msrb.mxu1 %v5287_v42 }
 0x1e6   : > { %1449 = vmatpush.bf16.msrb.mxu1 %v5281_v34  ;;  %v5644_v56 = vpop.f32.mrf.mxu1 }
 0x1ea   : > { %1450 = vmatpush.bf16.msrb.mxu1 %v5275_v26 }
 0x1ee   : > { %1451 = vmatpush.bf16.msrb.mxu1 %v5269_v18 }
 0x1f1   : > { %1118 = vmatmul.bf16.vlgmr.msrb.gmra.mxu2 %v4139_v40  ;;  %1288 = vmatmul.bf16.gmra.mxu1 %v4177_v15  ;;  %v1080_v7 = vpop.f32.mrf.mxu3 }
 0x1f2   : > { %1642 = vmatpush.bf16.msra.mxu1 %v5412_v6  ;;  %1304 = vmatpush.bf16.msrb.mxu2 %v5412_v6 }
 0x1f6   : > { %1643 = vmatpush.bf16.msra.mxu1 %v5419_v22  ;;  %1305 = vmatpush.bf16.msrb.mxu2 %v5419_v22 }
 0x1f9   : > { %v1082_v32 = vpop.f32.mrf.mxu3 }
 0x1fa   : > { %1644 = vmatpush.bf16.msra.mxu1 %v5427_v30  ;;  %1306 = vmatpush.bf16.msrb.mxu2 %v5427_v30 }
 0x1fe   : > { %1645 = vmatpush.bf16.msra.mxu1 %v5436_v33  ;;  %1307 = vmatpush.bf16.msrb.mxu2 %v5436_v33 }
 0x201   : > { %1293 = vmatmul.bf16.gmra.mxu1 %v4185_v47 }
 0x202   : > { %1646 = vmatpush.bf16.msra.mxu1 %v5448_v37  ;;  %1308 = vmatpush.bf16.msrb.mxu2 %v5448_v37 }
 0x206   : > { %1647 = vmatpush.bf16.msra.mxu1 %v5460_v43  ;;  %1309 = vmatpush.bf16.msrb.mxu2 %v5460_v43 }
 0x20a   : > { %1648 = vmatpush.bf16.msra.mxu1 %v5467_v46  ;;  %1310 = vmatpush.bf16.msrb.mxu2 %v5467_v46 }
 0x20c   : > { %v1085_v39 = vpop.f32.mrf.mxu3 }
 0x20e   : > { %1649 = vmatpush.bf16.msra.mxu1 %v5490_v51  ;;  %1311 = vmatpush.bf16.msrb.mxu2 %v5490_v51 }
 0x211   : > { %1298 = vmatmul.bf16.gmra.mxu1 %v4193_v48 }
 0x214   : > { %v1087_v48 = vpop.f32.mrf.mxu3 }
 0x221   : > { %1452 = vmatmul.bf16.vlgmr.msrb.gmra.mxu1 %v4219_v54 }
 0x222   : > { %1872 = vmatpush.bf16.msrb.mxu1 %v5007_v28 }
 0x22e   : > { %v1104_v60 = vpop.f32.mrf.mxu1 }
 0x22f   : > { %v1105_v1 = vadd.f32 %v1104_v60, %v1075_v57 }
 0x231   : > { %1457 = vmatmul.bf16.gmra.mxu1 %v4227_v61 }
 0x234   : > { %v991_v0 = vpop.f32.mrf.mxu2 }
 0x235   : > { %v992_v24 = vadd.f32 %v991_v0, %v5578_v19 }
 0x236   : > { %v1106_v3 = vpop.f32.mrf.mxu1 }
 0x237   : > { %v1107_v4 = vadd.f32 %v1106_v3, %v1077_v62 }
 0x239   : > { %v1124_v8 = vpack.c.bf16 %v1107_v4, %v1105_v1 }
 0x23b   : > { %4146 = vmatmul.msk.bf16.vlgmr.msra.gmra.mxu2 %vm1137_vm1, %v1124_v8  ;;  %v1090_v8 = vpop.f32.mrf.mxu3 }
 0x23c   : > { %1473 = vmatpush.bf16.msra.mxu2 %v5412_v6  ;;  %v993_v23 = vpop.f32.mrf.mxu2 }
 0x23d   : > { %v994_v25 = vadd.f32 %v993_v23, %v5582_v17 }
 0x23e   : > { %v1109_v29 = vpop.f32.mrf.mxu1 }
 0x23f   : > { %v1011_v31 = vpack.c.bf16 %v994_v25, %v992_v24  ;;  %v1110_v35 = vadd.f32 %v1109_v29, %v1080_v7  ;;  %v4972_v29 = vld [vmem:[%s6645_s3 + $0x84] sm:$0xf] }
 0x240   : > { %1474 = vmatpush.bf16.msra.mxu2 %v5419_v22 }
 0x241   : > { %4154 = vmatmul.msk.bf16.vlgmr.msrb.gmra.mxu3 %vm1137_vm1, %v1011_v31  ;;  %1462 = vmatmul.bf16.gmra.mxu1 %v4235_v27  ;;  %v4170_v31 = vld [vmem:[%s6645_s3 + $0x88] sm:$0xf0] }
 0x242   : > { %v4173_v28 = vor.u32 %v4972_v29, %v4170_v31 }
 0x244   : > { %1475 = vmatpush.bf16.msra.mxu2 %v5427_v30  ;;  %v996_v20 = vpop.f32.mrf.mxu2 }
 0x245   : > { %v997_v15 = vadd.f32 %v996_v20, %v5600_v41 }
 0x246   : > { %v1111_v19 = vpop.f32.mrf.mxu1 }
 0x247   : > { %v1112_v17 = vadd.f32 %v1111_v19, %v1082_v32  ;;  %v4178_v19 = vld [vmem:[%s6645_s3 + $0x98] sm:$0xf0] }
 0x248   : > { %1476 = vmatpush.bf16.msra.mxu2 %v5436_v33 }
 0x249   : > { %v1125_v36 = vpack.c.bf16 %v1112_v17, %v1110_v35  ;;  %v4974_v35 = vld [vmem:[%s6645_s3 + $0x94] sm:$0xf] }
 0x24a   : > { %v4181_v17 = vor.u32 %v4974_v35, %v4178_v19  ;;  %v4996_v19 = vld [vmem:[%s6645_s3 + $0x134] sm:$0xf] }
 0x24b   : > { %4147 = vmatmul.msk.bf16.gmra.mxu2 %vm1137_vm1, %v1125_v36 }
 0x24c   : > { %1477 = vmatpush.bf16.msra.mxu2 %v5448_v37  ;;  %v998_v40 = vpop.f32.mrf.mxu2 }
 0x24d   : > { %v999_v44 = vadd.f32 %v998_v40, %v5613_v14  ;;  %v4990_v14 = vld [vmem:[%s6645_s3 + $0x104] sm:$0xf]  ;;  %v4189_v40 = vor.u32 %v4976_v16, %v4186_v38 }
 0x24e   : > { %v1114_v12 = vpop.f32.mrf.mxu1  ;;  %v4273_v60 = vor.u32 %v4990_v14, %v4270_v55  ;;  %v4278_v14 = vld [vmem:[%s6645_s3 + $0x118] sm:$0xf0] }
 0x24f   : > { %v1012_v47 = vpack.c.bf16 %v999_v44, %v997_v15  ;;  %v1115_v52 = vadd.f32 %v1114_v12, %v1085_v39  ;;  %v4998_v15 = vld [vmem:[%s6646_s4 + $0x20] sm:$0xff] }
 0x250   : > { %1478 = vmatpush.bf16.msra.mxu2 %v5460_v43 }
 0x251   : > { %4155 = vmatmul.msk.bf16.gmra.mxu3 %vm1137_vm1, %v1012_v47  ;;  %1467 = vmatmul.bf16.gmra.mxu1 %v4243_v45  ;;  %v4978_v45 = vld [vmem:[%s6645_s3 + $0xb4] sm:$0xf]  ;;  %v4194_v47 = vld [vmem:[%s6645_s3 + $0xb8] sm:$0xf0] }
 0x252   : > { %v4197_v12 = vor.u32 %v4978_v45, %v4194_v47 }
 0x254   : > { %1479 = vmatpush.bf16.msra.mxu2 %v5467_v46  ;;  %v1001_v2 = vpop.f32.mrf.mxu2 }
 0x255   : > { %v1002_v58 = vadd.f32 %v1001_v2, %v5620_v11 }
 0x256   : > { %v1116_v53 = vpop.f32.mrf.mxu1 }
 0x257   : > { %v1117_v54 = vadd.f32 %v1116_v53, %v1087_v48 }
 0x258   : > { %1480 = vmatpush.bf16.msra.mxu2 %v5490_v51 }
 0x259   : > { %v1126_v41 = vpack.c.bf16 %v1117_v54, %v1115_v52 }
 0x25b   : > { %4148 = vmatmul.msk.bf16.gmra.mxu2 %vm1137_vm1, %v1126_v41  ;;  %v4992_v41 = vld [vmem:[%s6645_s3 + $0x114] sm:$0xf] }
 0x25c   : > { %v1003_v57 = vpop.f32.mrf.mxu2  ;;  %v4281_v55 = vor.u32 %v4992_v41, %v4278_v14  ;;  %v4244_v41 = vld [vmem:[%s6645_s3 + $0xf8] sm:$0xf0]  ;;  %v1622_v14 = vpop.f32.mrf.mxu0 }
 0x25d   : > { %v1004_v59 = vadd.f32 %v1003_v57, %v5631_v49  ;;  %v4981_v57 = vld [vmem:[%s6645_s3 + $0xc4] sm:$0xf] }
 0x25e   : > { %v5693_v62 = vpop.f32.mrf.mxu1 }
 0x25f   : > { %v1013_v61 = vpack.c.bf16 %v1004_v59, %v1002_v58  ;;  %v4220_v58 = vld [vmem:[%s6645_s3 + $0xc8] sm:$0xf0] }
 0x261   : > { %4156 = vmatmul.msk.bf16.gmra.mxu3 %vm1137_vm1, %v1013_v61  ;;  %1650 = vmatmul.bf16.vlgmr.msra.gmra.mxu1 %v4273_v60  ;;  %v4223_v61 = vor.u32 %v4981_v57, %v4220_v58 }
 0x262   : > { %2120 = vmatpush.bf16.msra.mxu1 %v5302_v63 }
 0x264   : > { %v1006_v0 = vpop.f32.mrf.mxu2 }
 0x265   : > { %v1007_v11 = vadd.f32 %v1006_v0, %v5633_v50  ;;  %v1092_v50 = vpop.f32.mrf.mxu3 }
 0x266   : > { %2121 = vmatpush.bf16.msra.mxu1 %v5311_v5  ;;  %v5697_v1 = vpop.f32.mrf.mxu1 }
 0x26a   : > { %2122 = vmatpush.bf16.msra.mxu1 %v5317_v9 }
 0x26c   : > { %v1008_v3 = vpop.f32.mrf.mxu2 }
 0x26d   : > { %v1009_v49 = vadd.f32 %v1008_v3, %v5644_v56 }
 0x26e   : > { %2123 = vmatpush.bf16.msra.mxu1 %v5324_v13  ;;  %v5704_v7 = vpop.f32.mrf.mxu1 }
 0x26f   : > { %v1014_v4 = vpack.c.bf16 %v1009_v49, %v1007_v11  ;;  %v4994_v49 = vld [vmem:[%s6645_s3 + $0x124] sm:$0xf] }
 0x271   : > { %4157 = vmatmul.msk.bf16.gmra.mxu3 %vm1137_vm1, %v1014_v4  ;;  %1655 = vmatmul.bf16.gmra.mxu1 %v4281_v55  ;;  %v4286_v4 = vld [vmem:[%s6645_s3 + $0x128] sm:$0xf0] }
 0x272   : > { %2124 = vmatpush.bf16.msra.mxu1 %v5287_v42 }
 0x274   : > { %v1119_v10 = vpop.f32.mrf.mxu2 }
 0x275   : > { %v1120_v56 = vadd.f32 %v1119_v10, %v1090_v8  ;;  %v4289_v10 = vor.u32 %v4994_v49, %v4286_v4  ;;  %v1624_v4 = vpop.f32.mrf.mxu0 }
 0x276   : > { %2125 = vmatpush.bf16.msra.mxu1 %v5281_v34  ;;  %v5708_v21 = vpop.f32.mrf.mxu1 }
 0x27a   : > { %2126 = vmatpush.bf16.msra.mxu1 %v5275_v26 }
 0x27c   : > { %v1121_v23 = vpop.f32.mrf.mxu2 }
 0x27d   : > { %v1122_v24 = vadd.f32 %v1121_v23, %v1092_v50  ;;  %v4983_v23 = vld [vmem:[%s6645_s3 + $0xd4] sm:$0xf] }
 0x27e   : > { %2127 = vmatpush.bf16.msra.mxu1 %v5269_v18  ;;  %v5713_v27 = vpop.f32.mrf.mxu1 }
 0x27f   : > { %v1127_v25 = vpack.c.bf16 %v1122_v24, %v1120_v56  ;;  %v4228_v56 = vld [vmem:[%s6645_s3 + $0xd8] sm:$0xf0] }
 0x281   : > { %4149 = vmatmul.msk.bf16.gmra.mxu2 %vm1137_vm1, %v1127_v25  ;;  %1660 = vmatmul.bf16.gmra.mxu1 %v4289_v10  ;;  %v4231_v25 = vor.u32 %v4983_v23, %v4228_v56 }
 0x286   : > { %v5721_v32 = vpop.f32.mrf.mxu1 }
 0x28e   : > { %v5723_v20 = vpop.f32.mrf.mxu1 }
 0x291   : > { %1312 = vmatmul.bf16.vlgmr.msrb.gmra.mxu2 %v4173_v28 }
 0x292   : > { %1703 = vmatpush.bf16.msrb.mxu2 %v4998_v15  ;;  %v4236_v15 = vld [vmem:[%s6645_s3 + $0xe8] sm:$0xf0] }
 0x296   : > { %v5731_v36 = vpop.f32.mrf.mxu1 }
 0x29e   : > { %v5739_v39 = vpop.f32.mrf.mxu1 }
 0x2a1   : > { %1317 = vmatmul.bf16.gmra.mxu2 %v4181_v17  ;;  %v4294_v17 = vld [vmem:[%s6645_s3 + $0x138] sm:$0xf0] }
 0x2a2   : > { %v4297_v16 = vor.u32 %v4996_v19, %v4294_v17 }
 0x2a4   : > { %1665 = vmatmul.bf16.gmra.mxu1 %v4297_v16 }
 0x2a6   : > { %v5744_v44 = vpop.f32.mrf.mxu1 }
 0x2ae   : > { %v5752_v48 = vpop.f32.mrf.mxu1 }
 0x2b1   : > { %1322 = vmatmul.bf16.gmra.mxu2 %v4189_v40  ;;  %v4985_v40 = vld [vmem:[%s6645_s3 + $0xe4] sm:$0xf] }
 0x2b2   : > { %v4239_v45 = vor.u32 %v4985_v40, %v4236_v15 }
 0x2b6   : > { %v5770_v59 = vpop.f32.mrf.mxu1 }
 0x2be   : > { %v1159_v2 = vpop.f32.mrf.mxu2  ;;  %v5775_v11 = vpop.f32.mrf.mxu1 }
 0x2c1   : > { %1327 = vmatmul.bf16.gmra.mxu2 %v4197_v12  ;;  %v4980_v12 = vld [vmem:[%s6646_s4 + $0x10] sm:$0xff] }
 0x2c2   : > { %1365 = vmatpush.bf16.msra.mxu3 %v4980_v12 }
 0x2c4   : > { %v1206_v52 = vpop.f32.mrf.mxu3 }
 0x2c5   : > { %v5754_v53 = vadd.f32 %v1206_v52, %v1159_v2  ;;  %v4987_v52 = vld [vmem:[%s6645_s3 + $0xf4] sm:$0xf] }
 0x2c6   : > { %v5756_v54 = vpop.f32.mrf.mxu2  ;;  %v5798_v29 = vpop.f32.mrf.mxu1  ;;  %v4247_v58 = vor.u32 %v4987_v52, %v4244_v41 }
 0x2c7   : > { %v1627_v52 = vpop.f32.mrf.mxu0 }
 0x2cc   : > { %v5772_v60 = vpop.f32.mrf.mxu3 }
 0x2ce   : > { %v1164_v0 = vpop.f32.mrf.mxu2  ;;  %v5810_v38 = vpop.f32.mrf.mxu1 }
 0x2d1   : > { %1481 = vmatmul.bf16.vlgmr.msra.gmra.mxu2 %v4223_v61  ;;  %v4989_v61 = vld [vmem:[%s6646_s4 + $0x18] sm:$0xff] }
 0x2d2   : > { %1951 = vmatpush.bf16.msra.mxu2 %v5302_v63  ;;  %1534 = vmatpush.bf16.msrb.mxu3 %v4989_v61 }
 0x2d4   : > { %v1211_v3 = vpop.f32.mrf.mxu3 }
 0x2d5   : > { %v5783_v8 = vadd.f32 %v1211_v3, %v1164_v0 }
 0x2d6   : > { %1952 = vmatpush.bf16.msra.mxu2 %v5311_v5  ;;  %v5786_v50 = vpop.f32.mrf.mxu2  ;;  %v5820_v47 = vpop.f32.mrf.mxu1 }
 0x2da   : > { %1953 = vmatpush.bf16.msra.mxu2 %v5317_v9 }
 0x2dc   : > { %v5795_v24 = vpop.f32.mrf.mxu3 }
 0x2de   : > { %1954 = vmatpush.bf16.msra.mxu2 %v5324_v13  ;;  %v1169_v31 = vpop.f32.mrf.mxu2  ;;  %v1651_v57 = vpop.f32.mrf.mxu1 }
 0x2df   : > { %v1652_v23 = vadd.f32 %v1651_v57, %v1622_v14 }
 0x2e1   : > { %1486 = vmatmul.bf16.gmra.mxu2 %v4231_v25 }
 0x2e2   : > { %1955 = vmatpush.bf16.msra.mxu2 %v5287_v42 }
 0x2e4   : > { %v1216_v28 = vpop.f32.mrf.mxu3 }
 0x2e5   : > { %v5801_v35 = vadd.f32 %v1216_v28, %v1169_v31 }
 0x2e6   : > { %1956 = vmatpush.bf16.msra.mxu2 %v5281_v34  ;;  %v5833_v55 = vpop.f32.mrf.mxu2  ;;  %v1653_v10 = vpop.f32.mrf.mxu1 }
 0x2e7   : > { %v1654_v56 = vadd.f32 %v1653_v10, %v1624_v4 }
 0x2e9   : > { %v1671_v31 = vpack.c.bf16 %v1654_v56, %v1652_v23 }
 0x2ea   : > { %1957 = vmatpush.bf16.msra.mxu2 %v5275_v26 }
 0x2ec   : > { %v5825_v2 = vpop.f32.mrf.mxu3 }
 0x2ee   : > { %1958 = vmatpush.bf16.msra.mxu2 %v5269_v18  ;;  %v1656_v41 = vpop.f32.mrf.mxu1 }
 0x2ef   : > { %v1657_v57 = vadd.f32 %v1656_v41, %v1627_v52 }
 0x2f1   : > { %1491 = vmatmul.bf16.gmra.mxu2 %v4239_v45 }
 0x2f4   : > { %v1221_v0 = vpop.f32.mrf.mxu3 }
 0x2f6   : > { %v1658_v61 = vpop.f32.mrf.mxu1 }
 0x301   : > { %1496 = vmatmul.bf16.gmra.mxu2 %v4247_v58  ;;  %v1629_v58 = vpop.f32.mrf.mxu0 }
 0x304   : > { %v1174_v3 = vpop.f32.mrf.mxu2 }
 0x305   : > { %v5838_v49 = vadd.f32 %v1221_v0, %v1174_v3  ;;  %v1661_v3 = vpop.f32.mrf.mxu1 }
 0x309   : > { %v1632_v0 = vpop.f32.mrf.mxu0 }
 0x30a   : > { %v1662_v23 = vadd.f32 %v1661_v3, %v1632_v0  ;;  %v4326_v0 = vld [vmem:[%s6645_s3 + $0x150] sm:$0xf]  ;;  %v5002_v3 = vld [vmem:[%s6645_s3 + $0x154] sm:$0xf0] }
 0x30c   : > { %v5840_v25 = vpop.f32.mrf.mxu2 }
 0x311   : > { %4304 = vmatmul.msk.bf16.vlgmr.msrb.gmra.mxu2 %vm1137_vm1, %v1671_v31  ;;  %v1634_v56 = vpop.f32.mrf.mxu0  ;;  %v1663_v31 = vpop.f32.mrf.mxu1 }
 0x312   : > { %2149 = vmatpush.bf16.msrb.mxu2 %v5412_v6 }
 0x314   : > { %v1313_v28 = vpop.f32.mrf.mxu2 }
 0x315   : > { %v1314_v17 = vadd.f32 %v1313_v28, %v5693_v62  ;;  %v1664_v28 = vadd.f32 %v1663_v31, %v1634_v56  ;;  %v4368_v31 = vld [vmem:[%s6645_s3 + $0x180] sm:$0xf] }
 0x316   : > { %2150 = vmatpush.bf16.msrb.mxu2 %v5419_v22 }
 0x31a   : > { %2151 = vmatpush.bf16.msrb.mxu2 %v5427_v30 }
 0x31c   : > { %v1315_v19 = vpop.f32.mrf.mxu2 }
 0x31d   : > { %v1316_v16 = vadd.f32 %v1315_v19, %v5697_v1  ;;  %v1673_v19 = vpack.c.bf16 %v1664_v28, %v1662_v23  ;;  %v4344_v23 = vld [vmem:[%s6645_s3 + $0x178] sm:$0xf0]  ;;  %v5009_v28 = vld [vmem:[%s6645_s3 + $0x184] sm:$0xf0] }
 0x31e   : > { %2152 = vmatpush.bf16.msrb.mxu2 %v5436_v33 }
 0x31f   : > { %v1333_v40 = vpack.c.bf16 %v1316_v16, %v1314_v17  ;;  %v1637_v16 = vpop.f32.mrf.mxu0 }
 0x321   : > { %4204 = vmatmul.msk.bf16.vlgmr.msra.gmra.mxu3 %vm1137_vm1, %v1333_v40  ;;  %v1666_v40 = vpop.f32.mrf.mxu1 }
 0x322   : > { %1782 = vmatpush.bf16.msra.mxu3 %v5302_v63  ;;  %2153 = vmatpush.bf16.msrb.mxu2 %v5448_v37 }
 0x324   : > { %v1318_v15 = vpop.f32.mrf.mxu2 }
 0x325   : > { %v1319_v1 = vadd.f32 %v1318_v15, %v5704_v7 }
 0x326   : > { %1783 = vmatpush.bf16.msra.mxu3 %v5311_v5  ;;  %2154 = vmatpush.bf16.msrb.mxu2 %v5460_v43 }
 0x32a   : > { %1784 = vmatpush.bf16.msra.mxu3 %v5317_v9  ;;  %2155 = vmatpush.bf16.msrb.mxu2 %v5467_v46 }
 0x32c   : > { %v1320_v62 = vpop.f32.mrf.mxu2 }
 0x32d   : > { %v1321_v45 = vadd.f32 %v1320_v62, %v5708_v21  ;;  %v1667_v62 = vadd.f32 %v1666_v40, %v1637_v16  ;;  %v5004_v16 = vld [vmem:[%s6645_s3 + $0x164] sm:$0xf0] }
 0x32e   : > { %1785 = vmatpush.bf16.msra.mxu3 %v5324_v13  ;;  %2156 = vmatpush.bf16.msrb.mxu2 %v5490_v51 }
 0x32f   : > { %v1334_v63 = vpack.c.bf16 %v1321_v45, %v1319_v1  ;;  %v1639_v45 = vpop.f32.mrf.mxu0 }
 0x331   : > { %4205 = vmatmul.msk.bf16.gmra.mxu3 %vm1137_vm1, %v1334_v63  ;;  %v1668_v63 = vpop.f32.mrf.mxu1 }
 0x332   : > { %1786 = vmatpush.bf16.msra.mxu3 %v5287_v42 }
 0x334   : > { %v1323_v5 = vpop.f32.mrf.mxu2 }
 0x335   : > { %v1324_v12 = vadd.f32 %v1323_v5, %v5713_v27  ;;  %v1659_v27 = vadd.f32 %v1658_v61, %v1629_v58  ;;  %v1669_v5 = vadd.f32 %v1668_v63, %v1639_v45  ;;  %v5003_v58 = vld [vmem:[%s6645_s3 + $0x164] sm:$0xf]  ;;  %v4336_v61 = vld [vmem:[%s6645_s3 + $0x168] sm:$0xf0]  ;;  %v4342_v45 = vld [vmem:[%s6645_s3 + $0x170] sm:$0xf] }
 0x336   : > { %1787 = vmatpush.bf16.msra.mxu3 %v5281_v34  ;;  %v5006_v63 = vld [vmem:[%s6645_s3 + $0x174] sm:$0xf0] }
 0x33a   : > { %1788 = vmatpush.bf16.msra.mxu3 %v5275_v26 }
 0x33c   : > { %v1325_v9 = vpop.f32.mrf.mxu2 }
 0x33d   : > { %v1326_v7 = vadd.f32 %v1325_v9, %v5721_v32  ;;  %v1672_v32 = vpack.c.bf16 %v1659_v27, %v1657_v57  ;;  %v1674_v9 = vpack.c.bf16 %v1669_v5, %v1667_v62  ;;  %v4318_v57 = vld [vmem:[%s6645_s3 + $0x140] sm:$0xf]  ;;  %v4339_v27 = vor.u32 %v5003_v58, %v4336_v61  ;;  %v5011_v62 = vld [vmem:[%s6645_s3 + $0x194] sm:$0xf0]  ;;  %v4378_v58 = vld [vmem:[%s6645_s3 + $0x198] sm:$0xf0] }
 0x33e   : > { %1789 = vmatpush.bf16.msra.mxu3 %v5269_v18 }
 0x33f   : > { %v1335_v13 = vpack.c.bf16 %v1326_v7, %v1324_v12  ;;  %4305 = vmatmul.msk.bf16.gmra.mxu2 %vm1137_vm1, %v1672_v32 }
 0x341   : > { %4206 = vmatmul.msk.bf16.gmra.mxu3 %vm1137_vm1, %v1335_v13 }
 0x344   : > { %v1328_v21 = vpop.f32.mrf.mxu2 }
 0x345   : > { %v1329_v42 = vadd.f32 %v1328_v21, %v5723_v20 }
 0x34c   : > { %v1330_v14 = vpop.f32.mrf.mxu2 }
 0x34d   : > { %v1331_v34 = vadd.f32 %v1330_v14, %v5731_v36 }
 0x34f   : > { %v1336_v26 = vpack.c.bf16 %v1331_v34, %v1329_v42  ;;  %4306 = vmatmul.msk.bf16.gmra.mxu2 %vm1137_vm1, %v1673_v19  ;;  %v5001_v42 = vld [vmem:[%s6645_s3 + $0x154] sm:$0xf]  ;;  %v4369_v19 = vor.u32 %v5009_v28, %v4368_v31 }
 0x351   : > { %4207 = vmatmul.msk.bf16.gmra.mxu3 %vm1137_vm1, %v1336_v26 }
 0x354   : > { %v1482_v18 = vpop.f32.mrf.mxu2 }
 0x355   : > { %v1483_v10 = vadd.f32 %v1482_v18, %v5739_v39 }
 0x35c   : > { %v1484_v4 = vpop.f32.mrf.mxu2 }
 0x35d   : > { %v1485_v20 = vadd.f32 %v1484_v4, %v5744_v44 }
 0x35f   : > { %v1502_v36 = vpack.c.bf16 %v1485_v20, %v1483_v10  ;;  %4307 = vmatmul.msk.bf16.gmra.mxu2 %vm1137_vm1, %v1674_v9  ;;  %v4327_v10 = vor.u32 %v5002_v3, %v4326_v0  ;;  %v5005_v20 = vld [vmem:[%s6645_s3 + $0x174] sm:$0xf] }
 0x361   : > { %4254 = vmatmul.msk.bf16.vlgmr.msrb.gmra.mxu3 %vm1137_vm1, %v1502_v36 }
 0x362   : > { %1980 = vmatpush.bf16.msrb.mxu3 %v5412_v6 }
 0x364   : > { %v1487_v17 = vpop.f32.mrf.mxu2 }
 0x365   : > { %v1488_v44 = vadd.f32 %v1487_v17, %v5752_v48  ;;  %v4334_v17 = vld [vmem:[%s6645_s3 + $0x160] sm:$0xf] }
 0x366   : > { %1981 = vmatpush.bf16.msrb.mxu3 %v5419_v22 }
 0x36a   : > { %1982 = vmatpush.bf16.msrb.mxu3 %v5427_v30 }
 0x36c   : > { %v1489_v39 = vpop.f32.mrf.mxu2 }
 0x36d   : > { %v1490_v15 = vadd.f32 %v1489_v39, %v5770_v59 }
 0x36e   : > { %1983 = vmatpush.bf16.msrb.mxu3 %v5436_v33 }
 0x36f   : > { %v1503_v1 = vpack.c.bf16 %v1490_v15, %v1488_v44  ;;  %1959 = vmatmul.bf16.vlgmr.msra.gmra.mxu2 %v4369_v19  ;;  %v4376_v15 = vld [vmem:[%s6645_s3 + $0x190] sm:$0xf] }
 0x371   : > { %4255 = vmatmul.msk.bf16.gmra.mxu3 %vm1137_vm1, %v1503_v1  ;;  %v4377_v1 = vor.u32 %v5011_v62, %v4376_v15 }
 0x372   : > { %1984 = vmatpush.bf16.msrb.mxu3 %v5448_v37 }
 0x374   : > { %v1492_v12 = vpop.f32.mrf.mxu2 }
 0x375   : > { %v1493_v59 = vadd.f32 %v1492_v12, %v5775_v11  ;;  %v4328_v11 = vld [vmem:[%s6645_s3 + $0x158] sm:$0xf0] }
 0x376   : > { %1985 = vmatpush.bf16.msrb.mxu3 %v5460_v43 }
 0x37a   : > { %1986 = vmatpush.bf16.msrb.mxu3 %v5467_v46 }
 0x37c   : > { %v1494_v48 = vpop.f32.mrf.mxu2 }
 0x37d   : > { %v1495_v7 = vadd.f32 %v1494_v48, %v5798_v29  ;;  %v4331_v29 = vor.u32 %v5001_v42, %v4328_v11  ;;  %v4384_v48 = vld [vmem:[%s6645_s3 + $0x1a0] sm:$0xf] }
 0x37e   : > { %1987 = vmatpush.bf16.msrb.mxu3 %v5490_v51 }
 0x37f   : > { %v1504_v13 = vpack.c.bf16 %v1495_v7, %v1493_v59  ;;  %1824 = vmatmul.bf16.gmra.mxu0 %v4331_v29  ;;  %1964 = vmatmul.bf16.gmra.mxu2 %v4377_v1  ;;  %v5013_v59 = vld [vmem:[%s6645_s3 + $0x1a4] sm:$0xf0] }
 0x381   : > { %4256 = vmatmul.msk.bf16.gmra.mxu3 %vm1137_vm1, %v1504_v13  ;;  %v4385_v13 = vor.u32 %v5013_v59, %v4384_v48 }
 0x384   : > { %v1497_v21 = vpop.f32.mrf.mxu2 }
 0x385   : > { %v1498_v41 = vadd.f32 %v1497_v21, %v5810_v38  ;;  %v5000_v38 = vld [vmem:[%s6645_s3 + $0x144] sm:$0xf0]  ;;  %v5008_v21 = vld [vmem:[%s6645_s3 + $0x184] sm:$0xf] }
 0x386   : > { %v4319_v26 = vor.u32 %v5000_v38, %v4318_v57  ;;  %v5015_v57 = vld [vmem:[%s6645_s3 + $0x1b4] sm:$0xf0] }
 0x38c   : > { %v1499_v52 = vpop.f32.mrf.mxu2 }
 0x38d   : > { %v1500_v14 = vadd.f32 %v1499_v52, %v5820_v47  ;;  %v5906_v47 = vpop.f32.mrf.mxu3  ;;  %v4370_v52 = vld [vmem:[%s6645_s3 + $0x188] sm:$0xf0] }
 0x38f   : > { %v1505_v34 = vpack.c.bf16 %v1500_v14, %v1498_v41  ;;  %1829 = vmatmul.bf16.gmra.mxu0 %v4339_v27  ;;  %1969 = vmatmul.bf16.gmra.mxu2 %v4385_v13  ;;  %v4373_v41 = vor.u32 %v5008_v21, %v4370_v52 }
 0x391   : > { %4257 = vmatmul.msk.bf16.gmra.mxu3 %vm1137_vm1, %v1505_v34  ;;  %v4392_v34 = vld [vmem:[%s6645_s3 + $0x1b0] sm:$0xf] }
 0x392   : > { %v4393_v38 = vor.u32 %v5015_v57, %v4392_v34 }
 0x394   : > { %v1705_v7 = vpop.f32.mrf.mxu2 }
 0x39c   : > { %v5974_v14 = vpop.f32.mrf.mxu2 }
 0x39f   : > { %1974 = vmatmul.bf16.gmra.mxu2 %v4393_v38 }
 0x3a1   : > { %1790 = vmatmul.bf16.vlgmr.msra.gmra.mxu3 %v4319_v26  ;;  %v5010_v26 = vld [vmem:[%s6645_s3 + $0x194] sm:$0xf] }
 0x3a4   : > { %v1367_v32 = vpop.f32.mrf.mxu3 }
 0x3a5   : > { %v1387_v18 = vadd.f32 %v1367_v32, %v5754_v53  ;;  %v4347_v53 = vor.u32 %v5005_v20, %v4344_v23  ;;  %v4381_v32 = vor.u32 %v5010_v26, %v4378_v58  ;;  %v5012_v20 = vld [vmem:[%s6645_s3 + $0x1a4] sm:$0xf]  ;;  %v4386_v23 = vld [vmem:[%s6645_s3 + $0x1a8] sm:$0xf0] }
 0x3a7   : > { %1834 = vmatmul.bf16.gmra.mxu0 %v4347_v53 }
 0x3ac   : > { %v5921_v4 = vpop.f32.mrf.mxu3 }
 0x3b1   : > { %1795 = vmatmul.bf16.gmra.mxu3 %v4327_v10 }
 0x3b4   : > { %v1372_v36 = vpop.f32.mrf.mxu3 }
 0x3b5   : > { %v1389_v56 = vadd.f32 %v1372_v36, %v5783_v8  ;;  %v4335_v8 = vor.u32 %v5004_v16, %v4334_v17  ;;  %v4389_v36 = vor.u32 %v5012_v20, %v4386_v23  ;;  %v5014_v16 = vld [vmem:[%s6645_s3 + $0x1b4] sm:$0xf] }
 0x3bc   : > { %v5942_v40 = vpop.f32.mrf.mxu3 }
 0x3c1   : > { %1800 = vmatmul.bf16.gmra.mxu3 %v4335_v8  ;;  %v4394_v8 = vld [vmem:[%s6645_s3 + $0x1b8] sm:$0xf0] }
 0x3c2   : > { %v1710_v27 = vpop.f32.mrf.mxu2  ;;  %v4397_v15 = vor.u32 %v5014_v16, %v4394_v8 }
 0x3c4   : > { %v1377_v39 = vpop.f32.mrf.mxu3 }
 0x3c5   : > { %v1391_v44 = vadd.f32 %v1377_v39, %v5801_v35  ;;  %v4343_v35 = vor.u32 %v5006_v63, %v4342_v45 }
 0x3ca   : > { %v5992_v3 = vpop.f32.mrf.mxu2 }
 0x3cc   : > { %v5957_v5 = vpop.f32.mrf.mxu3 }
 0x3d1   : > { %1805 = vmatmul.bf16.gmra.mxu3 %v4343_v35 }
 0x3d2   : > { %v1715_v31 = vpop.f32.mrf.mxu2 }
 0x3d4   : > { %v1382_v9 = vpop.f32.mrf.mxu3 }
 0x3d5   : > { %v1393_v12 = vadd.f32 %v1382_v9, %v5838_v49 }
 0x3da   : > { %v6006_v17 = vpop.f32.mrf.mxu2 }
 0x3dc   : > { %v5972_v49 = vpop.f32.mrf.mxu3 }
 0x3e1   : > { %1988 = vmatmul.bf16.vlgmr.msrb.gmra.mxu3 %v4373_v41 }
 0x3e2   : > { %v1720_v1 = vpop.f32.mrf.mxu2 }
 0x3e4   : > { %v1536_v42 = vpop.f32.mrf.mxu3 }
 0x3e5   : > { %v1556_v11 = vadd.f32 %v1536_v42, %v1387_v18 }
 0x3e7   : > { %v5976_v29 = vadd.f32 %v1705_v7, %v1556_v11 }
 0x3ec   : > { %v5990_v61 = vpop.f32.mrf.mxu3 }
 0x3f1   : > { %1993 = vmatmul.bf16.gmra.mxu3 %v4381_v32 }
 0x3f4   : > { %v1541_v18 = vpop.f32.mrf.mxu3 }
 0x3f5   : > { %v1558_v0 = vadd.f32 %v1541_v18, %v1389_v56 }
 0x3f7   : > { %v5994_v10 = vadd.f32 %v1710_v27, %v1558_v0 }
 0x3fc   : > { %v6002_v53 = vpop.f32.mrf.mxu3 }
 0x401   : > { %1998 = vmatmul.bf16.gmra.mxu3 %v4389_v36 }
 0x404   : > { %v1546_v28 = vpop.f32.mrf.mxu3 }
 0x405   : > { %v1560_v19 = vadd.f32 %v1546_v28, %v1391_v44  ;;  %v1820_v44 = vpop.f32.mrf.mxu0 }
 0x407   : > { %v6004_v56 = vadd.f32 %v1715_v31, %v1560_v19 }
 0x40c   : > { %v6014_v39 = vpop.f32.mrf.mxu3 }
 0x40d   : > { %v1822_v9 = vpop.f32.mrf.mxu0 }
 0x411   : > { %2003 = vmatmul.bf16.gmra.mxu3 %v4397_v15 }
 0x414   : > { %v1551_v62 = vpop.f32.mrf.mxu3 }
 0x415   : > { %v1562_v45 = vadd.f32 %v1551_v62, %v1393_v12  ;;  %v1825_v59 = vpop.f32.mrf.mxu0  ;;  %v5021_v62 = vld [vmem:[%s6645_s3 + $0x1e4] sm:$0xf] }
 0x417   : > { %v6016_v63 = vadd.f32 %v1720_v1, %v1562_v45  ;;  %v4436_v1 = vld [vmem:[%s6645_s3 + $0x1e8] sm:$0xf0] }
 0x418   : > { %v4439_v45 = vor.u32 %v5021_v62, %v4436_v1 }
 0x41c   : > { %v6018_v35 = vpop.f32.mrf.mxu3 }
 0x41d   : > { %v1827_v42 = vpop.f32.mrf.mxu0 }
 0x424   : > { %v1791_v48 = vpop.f32.mrf.mxu3 }
 0x425   : > { %v1821_v13 = vadd.f32 %v1820_v44, %v1791_v48  ;;  %v1830_v57 = vpop.f32.mrf.mxu0  ;;  %v5018_v48 = vld [vmem:[%s6645_s3 + $0x1c4] sm:$0xf0] }
 0x42c   : > { %v1793_v7 = vpop.f32.mrf.mxu3 }
 0x42d   : > { %v1823_v21 = vadd.f32 %v1822_v9, %v1793_v7  ;;  %v1832_v58 = vpop.f32.mrf.mxu0  ;;  %v4418_v9 = vld [vmem:[%s6645_s3 + $0x1c0] sm:$0xf] }
 0x42f   : > { %v1840_v52 = vpack.c.bf16 %v1823_v21, %v1821_v13  ;;  %v4419_v21 = vor.u32 %v5018_v48, %v4418_v9  ;;  %v5027_v9 = vld [vmem:[%s6645_s3 + $0x204] sm:$0xf0]  ;;  %v5026_v48 = vld [vmem:[%s6645_s3 + $0x204] sm:$0xf] }
 0x431   : > { %4354 = vmatmul.msk.bf16.vlgmr.msrb.gmra.mxu1 %vm1137_vm1, %v1840_v52 }
 0x432   : > { %2318 = vmatpush.bf16.msrb.mxu1 %v5412_v6  ;;  %v5017_v6 = vld [vmem:[%s6645_s3 + $0x1c4] sm:$0xf] }
 0x434   : > { %v1796_v41 = vpop.f32.mrf.mxu3 }
 0x435   : > { %v1826_v11 = vadd.f32 %v1825_v59, %v1796_v41  ;;  %v1835_v0 = vpop.f32.mrf.mxu0 }
 0x436   : > { %2319 = vmatpush.bf16.msrb.mxu1 %v5419_v22  ;;  %v4420_v22 = vld [vmem:[%s6645_s3 + $0x1c8] sm:$0xf0] }
 0x43a   : > { %2320 = vmatpush.bf16.msrb.mxu1 %v5427_v30  ;;  %v4423_v30 = vor.u32 %v5017_v6, %v4420_v22 }
 0x43c   : > { %v1798_v12 = vpop.f32.mrf.mxu3  ;;  %2157 = vmatmul.bf16.vlgmr.msrb.gmra.mxu2 %v4423_v30 }
 0x43d   : > { %v1828_v34 = vadd.f32 %v1827_v42, %v1798_v12  ;;  %v1837_v31 = vpop.f32.mrf.mxu0  ;;  %v5023_v12 = vld [vmem:[%s6645_s3 + $0x1f4] sm:$0xf] }
 0x43e   : > { %2321 = vmatpush.bf16.msrb.mxu1 %v5436_v33 }
 0x43f   : > { %v1841_v38 = vpack.c.bf16 %v1828_v34, %v1826_v11  ;;  %v4444_v11 = vld [vmem:[%s6645_s3 + $0x1f8] sm:$0xf0] }
 0x440   : > { %v4447_v34 = vor.u32 %v5023_v12, %v4444_v11  ;;  %v5029_v12 = vld [vmem:[%s6645_s3 + $0x214] sm:$0xf0]  ;;  %v5028_v11 = vld [vmem:[%s6645_s3 + $0x214] sm:$0xf] }
 0x441   : > { %4355 = vmatmul.msk.bf16.gmra.mxu1 %vm1137_vm1, %v1841_v38  ;;  %v5020_v38 = vld [vmem:[%s6645_s3 + $0x1d4] sm:$0xf0] }
 0x442   : > { %2322 = vmatpush.bf16.msrb.mxu1 %v5448_v37  ;;  %v6035_v37 = vpop.f32.mrf.mxu2 }
 0x444   : > { %v1801_v26 = vpop.f32.mrf.mxu3 }
 0x445   : > { %v1831_v27 = vadd.f32 %v1830_v57, %v1801_v26  ;;  %v4426_v57 = vld [vmem:[%s6645_s3 + $0x1d0] sm:$0xf] }
 0x446   : > { %2323 = vmatpush.bf16.msrb.mxu1 %v5460_v43  ;;  %v5019_v43 = vld [vmem:[%s6645_s3 + $0x1d4] sm:$0xf]  ;;  %v4427_v30 = vor.u32 %v5020_v38, %v4426_v57 }
 0x44a   : > { %2324 = vmatpush.bf16.msrb.mxu1 %v5467_v46  ;;  %v4428_v46 = vld [vmem:[%s6645_s3 + $0x1d8] sm:$0xf0]  ;;  %v1960_v23 = vpop.f32.mrf.mxu2 }
 0x44b   : > { %v4431_v36 = vor.u32 %v5019_v43, %v4428_v46 }
 0x44c   : > { %v1803_v33 = vpop.f32.mrf.mxu3 }
 0x44d   : > { %v1833_v32 = vadd.f32 %v1832_v58, %v1803_v33  ;;  %2162 = vmatmul.bf16.gmra.mxu2 %v4431_v36 }
 0x44e   : > { %2325 = vmatpush.bf16.msrb.mxu1 %v5490_v51 }
 0x44f   : > { %v1842_v18 = vpack.c.bf16 %v1833_v32, %v1831_v27 }
 0x451   : > { %4356 = vmatmul.msk.bf16.gmra.mxu1 %vm1137_vm1, %v1842_v18  ;;  %v4434_v18 = vld [vmem:[%s6645_s3 + $0x1e0] sm:$0xf] }
 0x452   : > { %v1962_v8 = vpop.f32.mrf.mxu2 }
 0x454   : > { %v1806_v20 = vpop.f32.mrf.mxu3 }
 0x455   : > { %v1836_v19 = vadd.f32 %v1835_v0, %v1806_v20  ;;  %v5022_v0 = vld [vmem:[%s6645_s3 + $0x1e4] sm:$0xf0] }
 0x45a   : > { %v1965_v44 = vpop.f32.mrf.mxu2 }
 0x45c   : > { %v1808_v28 = vpop.f32.mrf.mxu3 }
 0x45d   : > { %v1838_v51 = vadd.f32 %v1837_v31, %v1808_v28  ;;  %2167 = vmatmul.bf16.gmra.mxu2 %v4439_v45 }
 0x45f   : > { %v1843_v16 = vpack.c.bf16 %v1838_v51, %v1836_v19  ;;  %v4442_v19 = vld [vmem:[%s6645_s3 + $0x1f0] sm:$0xf]  ;;  %v5024_v51 = vld [vmem:[%s6645_s3 + $0x1f4] sm:$0xf0] }
 0x460   : > { %v4443_v1 = vor.u32 %v5024_v51, %v4442_v19 }
 0x461   : > { %4357 = vmatmul.msk.bf16.gmra.mxu1 %vm1137_vm1, %v1843_v16 }
 0x462   : > { %v1967_v41 = vpop.f32.mrf.mxu2 }
 0x464   : > { %v1989_v15 = vpop.f32.mrf.mxu3 }
 0x465   : > { %v1990_v7 = vadd.f32 %v1989_v15, %v1960_v23  ;;  %v4435_v23 = vor.u32 %v5022_v0, %v4434_v18 }
 0x46a   : > { %v1970_v58 = vpop.f32.mrf.mxu2 }
 0x46c   : > { %v1991_v59 = vpop.f32.mrf.mxu3 }
 0x46d   : > { %v1992_v13 = vadd.f32 %v1991_v59, %v1962_v8  ;;  %2172 = vmatmul.bf16.gmra.mxu2 %v4447_v34  ;;  %v4470_v59 = vld [vmem:[%s6645_s3 + $0x208] sm:$0xf0] }
 0x46f   : > { %v2009_v52 = vpack.c.bf16 %v1992_v13, %v1990_v7  ;;  %v4473_v13 = vor.u32 %v5026_v48, %v4470_v59 }
 0x471   : > { %4404 = vmatmul.msk.bf16.vlgmr.msrb.gmra.mxu0 %vm1137_vm1, %v2009_v52  ;;  %2128 = vmatmul.bf16.vlgmr.msra.gmra.mxu1 %v4419_v21 }
 0x472   : > { %v1972_v32 = vpop.f32.mrf.mxu2 }
 0x474   : > { %v1994_v42 = vpop.f32.mrf.mxu3 }
 0x475   : > { %v1995_v6 = vadd.f32 %v1994_v42, %v1965_v44  ;;  %v4468_v44 = vld [vmem:[%s6645_s3 + $0x200] sm:$0xf]  ;;  %v4476_v42 = vld [vmem:[%s6645_s3 + $0x210] sm:$0xf] }
 0x476   : > { %v4469_v7 = vor.u32 %v5027_v9, %v4468_v44  ;;  %v4477_v34 = vor.u32 %v5029_v12, %v4476_v42 }
 0x47a   : > { %v1975_v31 = vpop.f32.mrf.mxu2 }
 0x47c   : > { %v1996_v26 = vpop.f32.mrf.mxu3 }
 0x47d   : > { %v1997_v22 = vadd.f32 %v1996_v26, %v1967_v41 }
 0x47f   : > { %v2010_v33 = vpack.c.bf16 %v1997_v22, %v1995_v6  ;;  %v4484_v22 = vld [vmem:[%s6645_s3 + $0x220] sm:$0xf] }
 0x481   : > { %4405 = vmatmul.msk.bf16.gmra.mxu0 %vm1137_vm1, %v2010_v33  ;;  %2133 = vmatmul.bf16.gmra.mxu1 %v4427_v30  ;;  %v5031_v30 = vld [vmem:[%s6645_s3 + $0x224] sm:$0xf0] }
 0x482   : > { %v1977_v16 = vpop.f32.mrf.mxu2  ;;  %v4485_v33 = vor.u32 %v5031_v30, %v4484_v22 }
 0x484   : > { %v1999_v27 = vpop.f32.mrf.mxu3 }
 0x485   : > { %v2000_v43 = vadd.f32 %v1999_v27, %v1970_v58  ;;  %v5030_v58 = vld [vmem:[%s6645_s3 + $0x224] sm:$0xf] }
 0x48c   : > { %v2001_v20 = vpop.f32.mrf.mxu3 }
 0x48d   : > { %v2002_v46 = vadd.f32 %v2001_v20, %v1972_v32  ;;  %v5025_v20 = vld [vmem:[%s6646_s4 + $0x38] sm:$0xff] }
 0x48e   : > { %2210 = vmatpush.bf16.msra.mxu3 %v5025_v20 }
 0x48f   : > { %v2011_v36 = vpack.c.bf16 %v2002_v46, %v2000_v43  ;;  %v4492_v43 = vld [vmem:[%s6645_s3 + $0x230] sm:$0xf]  ;;  %v5033_v46 = vld [vmem:[%s6645_s3 + $0x234] sm:$0xf0] }
 0x491   : > { %4406 = vmatmul.msk.bf16.gmra.mxu0 %vm1137_vm1, %v2011_v36  ;;  %2138 = vmatmul.bf16.gmra.mxu1 %v4435_v23  ;;  %v4494_v23 = vld [vmem:[%s6645_s3 + $0x238] sm:$0xf0]  ;;  %v4493_v36 = vor.u32 %v5033_v46, %v4492_v43 }
 0x494   : > { %v2004_v28 = vpop.f32.mrf.mxu3 }
 0x495   : > { %v2005_v15 = vadd.f32 %v2004_v28, %v1975_v31 }
 0x49c   : > { %v2006_v8 = vpop.f32.mrf.mxu3 }
 0x49d   : > { %v2007_v62 = vadd.f32 %v2006_v8, %v1977_v16 }
 0x49f   : > { %v2012_v45 = vpack.c.bf16 %v2007_v62, %v2005_v15 }
 0x4a1   : > { %4407 = vmatmul.msk.bf16.gmra.mxu0 %vm1137_vm1, %v2012_v45  ;;  %2143 = vmatmul.bf16.gmra.mxu1 %v4443_v1 }
 0x4ae   : > { %v1874_v21 = vpop.f32.mrf.mxu1 }
 0x4af   : > { %v1894_v52 = vadd.f32 %v1874_v21, %v5976_v29  ;;  %v4478_v29 = vld [vmem:[%s6645_s3 + $0x218] sm:$0xf0] }
 0x4b0   : > { %v4481_v57 = vor.u32 %v5028_v11, %v4478_v29 }
 0x4b1   : > { %2297 = vmatmul.bf16.vlgmr.msra.gmra.mxu0 %v4469_v7  ;;  %2326 = vmatmul.bf16.vlgmr.msrb.gmra.mxu1 %v4473_v13 }
 0x4b6   : > { %v6099_v41 = vpop.f32.mrf.mxu1 }
 0x4be   : > { %v1879_v38 = vpop.f32.mrf.mxu1 }
 0x4bf   : > { %v1896_v26 = vadd.f32 %v1879_v38, %v5994_v10  ;;  %v4486_v10 = vld [vmem:[%s6645_s3 + $0x228] sm:$0xf0]  ;;  %v2158_v28 = vpop.f32.mrf.mxu2  ;;  %v5034_v38 = vld [vmem:[%s6646_s4 + $0x40] sm:$0xff] }
 0x4c0   : > { %v4489_v27 = vor.u32 %v5030_v58, %v4486_v10  ;;  %2379 = vmatpush.bf16.msra.mxu2 %v5034_v38 }
 0x4c1   : > { %2302 = vmatmul.bf16.gmra.mxu0 %v4477_v34  ;;  %2331 = vmatmul.bf16.gmra.mxu1 %v4481_v57 }
 0x4c6   : > { %v6114_v6 = vpop.f32.mrf.mxu1 }
 0x4c7   : > { %v2160_v8 = vpop.f32.mrf.mxu2 }
 0x4ce   : > { %v1884_v32 = vpop.f32.mrf.mxu1 }
 0x4cf   : > { %v1898_v18 = vadd.f32 %v1884_v32, %v6004_v56  ;;  %v5032_v56 = vld [vmem:[%s6645_s3 + $0x234] sm:$0xf] }
 0x4d0   : > { %v4497_v31 = vor.u32 %v5032_v56, %v4494_v23  ;;  %v2163_v45 = vpop.f32.mrf.mxu2 }
 0x4d1   : > { %2307 = vmatmul.bf16.gmra.mxu0 %v4485_v33  ;;  %2336 = vmatmul.bf16.gmra.mxu1 %v4489_v27 }
 0x4d6   : > { %v6129_v0 = vpop.f32.mrf.mxu1 }
 0x4d8   : > { %v2165_v13 = vpop.f32.mrf.mxu2 }
 0x4de   : > { %v1889_v19 = vpop.f32.mrf.mxu1 }
 0x4df   : > { %v1900_v51 = vadd.f32 %v1889_v19, %v6016_v63 }
 0x4e0   : > { %v2168_v12 = vpop.f32.mrf.mxu2 }
 0x4e1   : > { %2312 = vmatmul.bf16.gmra.mxu0 %v4493_v36  ;;  %2341 = vmatmul.bf16.gmra.mxu1 %v4497_v31 }
 0x4e6   : > { %v6147_v16 = vpop.f32.mrf.mxu1 }
 0x4ee   : > { %v2043_v15 = vpop.f32.mrf.mxu0  ;;  %v2129_v62 = vpop.f32.mrf.mxu1 }
 0x4ef   : > { %v6149_v1 = vadd.f32 %v2043_v15, %v1894_v52  ;;  %v2159_v48 = vadd.f32 %v2158_v28, %v2129_v62 }
 0x4f6   : > { %v6151_v44 = vpop.f32.mrf.mxu0  ;;  %v2131_v9 = vpop.f32.mrf.mxu1 }
 0x4f7   : > { %v2161_v59 = vadd.f32 %v2160_v8, %v2131_v9 }
 0x4f9   : > { %v2178_v7 = vpack.c.bf16 %v2161_v59, %v2159_v48 }
 0x4fb   : > { %4454 = vmatmul.msk.bf16.vlgmr.msra.gmra.mxu3 %vm1137_vm1, %v2178_v7 }
 0x4fe   : > { %v2048_v63 = vpop.f32.mrf.mxu0  ;;  %v2134_v21 = vpop.f32.mrf.mxu1 }
 0x4ff   : > { %v6154_v42 = vadd.f32 %v2048_v63, %v1896_v26  ;;  %v2164_v52 = vadd.f32 %v2163_v45, %v2134_v21  ;;  %v2170_v26 = vpop.f32.mrf.mxu2 }
 0x506   : > { %v6156_v11 = vpop.f32.mrf.mxu0  ;;  %v2136_v29 = vpop.f32.mrf.mxu1 }
 0x507   : > { %v2166_v34 = vadd.f32 %v2165_v13, %v2136_v29  ;;  %v2173_v43 = vpop.f32.mrf.mxu2 }
 0x509   : > { %v2179_v57 = vpack.c.bf16 %v2166_v34, %v2164_v52 }
 0x50b   : > { %4455 = vmatmul.msk.bf16.gmra.mxu3 %vm1137_vm1, %v2179_v57 }
 0x50e   : > { %v2053_v22 = vpop.f32.mrf.mxu0  ;;  %v2139_v30 = vpop.f32.mrf.mxu1 }
 0x50f   : > { %v6162_v58 = vadd.f32 %v2053_v22, %v1898_v18  ;;  %v2169_v27 = vadd.f32 %v2168_v12, %v2139_v30  ;;  %v2175_v36 = vpop.f32.mrf.mxu2 }
 0x516   : > { %v6164_v10 = vpop.f32.mrf.mxu0  ;;  %v2141_v33 = vpop.f32.mrf.mxu1 }
 0x517   : > { %v2171_v32 = vadd.f32 %v2170_v26, %v2141_v33 }
 0x519   : > { %v2180_v20 = vpack.c.bf16 %v2171_v32, %v2169_v27 }
 0x51b   : > { %4456 = vmatmul.msk.bf16.gmra.mxu3 %vm1137_vm1, %v2180_v20 }
 0x51e   : > { %v2058_v46 = vpop.f32.mrf.mxu0  ;;  %v2144_v56 = vpop.f32.mrf.mxu1 }
 0x51f   : > { %v6167_v23 = vadd.f32 %v2058_v46, %v1900_v51  ;;  %v2174_v18 = vadd.f32 %v2173_v43, %v2144_v56 }
 0x526   : > { %v6169_v31 = vpop.f32.mrf.mxu0  ;;  %v2146_v28 = vpop.f32.mrf.mxu1 }
 0x527   : > { %v2176_v19 = vadd.f32 %v2175_v36, %v2146_v28 }
 0x529   : > { %v2181_v8 = vpack.c.bf16 %v2176_v19, %v2174_v18 }
 0x52b   : > { %4457 = vmatmul.msk.bf16.gmra.mxu3 %vm1137_vm1, %v2181_v8  ;;  %v1209_v8 = vadd.f32 %v5772_v60, %v5756_v54  ;;  %v1214_v60 = vadd.f32 %v5795_v24, %v5786_v50 }
 0x52e   : > { %v2298_v15 = vpop.f32.mrf.mxu0  ;;  %v2327_v62 = vpop.f32.mrf.mxu1 }
 0x52f   : > { %v2328_v48 = vadd.f32 %v2327_v62, %v2298_v15  ;;  %v1388_v15 = vadd.f32 %v5921_v4, %v1209_v8 }
 0x531   : > { %v1557_v62 = vadd.f32 %v5990_v61, %v1388_v15 }
 0x536   : > { %v2300_v45 = vpop.f32.mrf.mxu0  ;;  %v2329_v9 = vpop.f32.mrf.mxu1 }
 0x537   : > { %v2330_v59 = vadd.f32 %v2329_v9, %v2300_v45  ;;  %v1726_v9 = vadd.f32 %v5974_v14, %v1557_v62  ;;  %v1390_v14 = vadd.f32 %v5942_v40, %v1214_v60 }
 0x539   : > { %v2347_v7 = vpack.c.bf16 %v2330_v59, %v2328_v48 }
 0x53b   : > { %4504 = vmatmul.msk.bf16.vlgmr.msra.gmra.mxu2 %vm1137_vm1, %v2347_v7  ;;  %v1895_v7 = vadd.f32 %v6099_v41, %v1726_v9 }
 0x53e   : > { %v2303_v51 = vpop.f32.mrf.mxu0  ;;  %v2332_v13 = vpop.f32.mrf.mxu1 }
 0x53f   : > { %v2333_v12 = vadd.f32 %v2332_v13, %v2303_v51  ;;  %v2064_v51 = vadd.f32 %v6151_v44, %v1895_v7  ;;  %v1559_v44 = vadd.f32 %v6002_v53, %v1390_v14  ;;  %v1219_v53 = vadd.f32 %v5825_v2, %v5833_v55  ;;  %v5045_v2 = vld [vmem:[%s6649_s7 + $0x10] sm:$0xff] }
 0x546   : > { %v2305_v63 = vpop.f32.mrf.mxu0  ;;  %v2334_v21 = vpop.f32.mrf.mxu1 }
 0x547   : > { %v2335_v29 = vadd.f32 %v2334_v21, %v2305_v63 }
 0x549   : > { %v2348_v52 = vpack.c.bf16 %v2335_v29, %v2333_v12 }
 0x54b   : > { %4505 = vmatmul.msk.bf16.gmra.mxu2 %vm1137_vm1, %v2348_v52 }
 0x54e   : > { %v2308_v34 = vpop.f32.mrf.mxu0  ;;  %v2337_v57 = vpop.f32.mrf.mxu1 }
 0x54f   : > { %v2338_v30 = vadd.f32 %v2337_v57, %v2308_v34  ;;  %v1728_v34 = vadd.f32 %v5992_v3, %v1559_v44  ;;  %v5038_v44 = vld [vmem:[%s6648_s6 + $0x18] sm:$0xff] }
 0x551   : > { %v1897_v57 = vadd.f32 %v6114_v6, %v1728_v34  ;;  %v5046_v6 = vld [vmem:[%s6649_s7 + $0x18] sm:$0xff]  ;;  %v5049_v34 = vld [vmem:[%s6648_s6 + $0x50] sm:$0xff] }
 0x552   : > { %2620 = vmatpush.bf16.msra.mxu1 %v5046_v6 }
 0x553   : > { %v2066_v24 = vadd.f32 %v6156_v11, %v1897_v57  ;;  %v5040_v57 = vld [vmem:[%s6649_s7 + $0x8] sm:$0xff] }
 0x554   : > { %2673 = vmatpush.bf16.msrb.mxu2 %v5040_v57 }
 0x556   : > { %v2310_v38 = vpop.f32.mrf.mxu0  ;;  %v2339_v22 = vpop.f32.mrf.mxu1  ;;  %2621 = vmatpush.bf16.msra.mxu1 %v5045_v2 }
 0x557   : > { %v2340_v26 = vadd.f32 %v2339_v22, %v2310_v38 }
 0x559   : > { %v2349_v33 = vpack.c.bf16 %v2340_v26, %v2338_v30 }
 0x55b   : > { %4506 = vmatmul.msk.bf16.gmra.mxu2 %vm1137_vm1, %v2349_v33 }
 0x55e   : > { %v2313_v27 = vpop.f32.mrf.mxu0  ;;  %v2342_v32 = vpop.f32.mrf.mxu1 }
 0x55f   : > { %v2343_v46 = vadd.f32 %v2342_v32, %v2313_v27  ;;  %v1392_v27 = vadd.f32 %v5957_v5, %v1219_v53 }
 0x566   : > { %v2315_v20 = vpop.f32.mrf.mxu0  ;;  %v2344_v43 = vpop.f32.mrf.mxu1 }
 0x567   : > { %v2345_v56 = vadd.f32 %v2344_v43, %v2315_v20 }
 0x569   : > { %v2350_v36 = vpack.c.bf16 %v2345_v56, %v2343_v46 }
 0x56b   : > { %4507 = vmatmul.msk.bf16.gmra.mxu2 %vm1137_vm1, %v2350_v36 }
 0x57e   : > { %v2212_v28 = vpop.f32.mrf.mxu3 }
 0x57f   : > { %v2232_v18 = vadd.f32 %v2212_v28, %v6149_v1  ;;  %v6187_v1 = vld [vmem:[%s6647_s5] ss:$0 sm:$0xff] }
 0x586   : > { %v2214_v19 = vpop.f32.mrf.mxu3 }
 0x587   : > { %v2233_v13 = vadd.f32 %v2214_v19, %v2064_v51  ;;  %v1224_v19 = vadd.f32 %v5906_v47, %v5840_v25 }
 0x58e   : > { %v2217_v59 = vpop.f32.mrf.mxu3 }
 0x58f   : > { %v2234_v50 = vadd.f32 %v2217_v59, %v6154_v42  ;;  %v1561_v42 = vadd.f32 %v6014_v39, %v1392_v27 }
 0x591   : > { %v1730_v5 = vadd.f32 %v6006_v17, %v1561_v42 }
 0x593   : > { %v1899_v46 = vadd.f32 %v6129_v0, %v1730_v5 }
 0x595   : > { %v2068_v39 = vadd.f32 %v6164_v10, %v1899_v46 }
 0x596   : > { %v2219_v41 = vpop.f32.mrf.mxu3 }
 0x597   : > { %v2235_v22 = vadd.f32 %v2219_v41, %v2066_v24  ;;  %v5043_v41 = vld [vmem:[%s6648_s6 + $0x30] sm:$0xff]  ;;  %v5050_v24 = vld [vmem:[%s6648_s6 + $0x58] sm:$0xff] }
 0x59e   : > { %v2222_v40 = vpop.f32.mrf.mxu3 }
 0x59f   : > { %v2236_v56 = vadd.f32 %v2222_v40, %v6162_v58 }
 0x5a6   : > { %v2224_v55 = vpop.f32.mrf.mxu3 }
 0x5a7   : > { %v2237_v28 = vadd.f32 %v2224_v55, %v2068_v39  ;;  %v5051_v39 = vld [vmem:[%s6649_s7 + $0x20] sm:$0xff] }
 0x5ae   : > { %v2227_v62 = vpop.f32.mrf.mxu3 }
 0x5af   : > { %v2238_v25 = vadd.f32 %v2227_v62, %v6167_v23  ;;  %v5036_v23 = vld [vmem:[%s6648_s6 + $0x8] sm:$0xff] }
 0x5b6   : > { %v2229_v47 = vpop.f32.mrf.mxu3 }
 0x5be   : > { %v2381_v45 = vpop.f32.mrf.mxu2 }
 0x5bf   : > { %v2401_v48 = vadd.f32 %v2381_v45, %v2232_v18  ;;  %v1394_v45 = vadd.f32 %v5972_v49, %v1224_v19 }
 0x5c1   : > { %v2413_v4 = vadd.f32 %v6187_v1, %v2401_v48  ;;  %v1563_v0 = vadd.f32 %v6018_v35, %v1394_v45 }
 0x5c3   : > { %v2421_v21 = vmax.f32 %v2413_v4, 0.0  ;;  %v1732_v59 = vadd.f32 %v6035_v37, %v1563_v0  ;;  %v5035_v37 = vld [vmem:[%s6648_s6] sm:$0xff] }
 0x5c4   : > { %v5053_v0 = vld [vmem:[%s6648_s6 + $0x60] sm:$0xff] }
 0x5c5   : > { %v1901_v7 = vadd.f32 %v6147_v16, %v1732_v59  ;;  %v5041_v16 = vld [vmem:[%s6648_s6 + $0x20] sm:$0xff] }
 0x5c6   : > { %v2383_v54 = vpop.f32.mrf.mxu2 }
 0x5c7   : > { %v2402_v61 = vadd.f32 %v2383_v54, %v2233_v13  ;;  %v2070_v51 = vadd.f32 %v6169_v31, %v1901_v7  ;;  %v5042_v31 = vld [vmem:[%s6648_s6 + $0x28] sm:$0xff] }
 0x5c8   : > { %v5054_v7 = vld [vmem:[%s6648_s6 + $0x68] sm:$0xff] }
 0x5c9   : > { %v2414_v63 = vadd.f32 %v6187_v1, %v2402_v61  ;;  %v2239_v49 = vadd.f32 %v2229_v47, %v2070_v51 }
 0x5cb   : > { %v2422_v12 = vmax.f32 %v2414_v63, 0.0 }
 0x5cd   : > { %v6195_v29 = vpack.c.bf16 %v2422_v12, %v2421_v21  ;;  %v5044_v21 = vld [vmem:[%s6648_s6 + $0x38] sm:$0xff]  ;;  %v5047_v12 = vld [vmem:[%s6648_s6 + $0x40] sm:$0xff] }
 0x5ce   : > { %v2386_v52 = vpop.f32.mrf.mxu2 }
 0x5cf   : > { %v2403_v38 = vadd.f32 %v2386_v52, %v2234_v50  ;;  %v5048_v52 = vld [vmem:[%s6648_s6 + $0x48] sm:$0xff]  ;;  %v5039_v50 = vld [vmem:[%s6649_s7] sm:$0xff] }
 0x5d0   : > { %2674 = vmatpush.bf16.msrb.mxu2 %v5039_v50 }
 0x5d1   : > { %v2415_v26 = vadd.f32 %v6187_v1, %v2403_v38  ;;  %v5059_v38 = vld [vmem:[%s6648_s6 + $0x80] sm:$0xff] }
 0x5d3   : > { %v2423_v11 = vmax.f32 %v2415_v26, 0.0 }
 0x5d6   : > { %v2388_v30 = vpop.f32.mrf.mxu2 }
 0x5d7   : > { %v2404_v33 = vadd.f32 %v2388_v30, %v2235_v22 }
 0x5d9   : > { %v2416_v3 = vadd.f32 %v6187_v1, %v2404_v33 }
 0x5db   : > { %v2424_v32 = vmax.f32 %v2416_v3, 0.0 }
 0x5dd   : > { %v6210_v20 = vpack.c.bf16 %v2424_v32, %v2423_v11 }
 0x5de   : > { %v2391_v43 = vpop.f32.mrf.mxu2 }
 0x5df   : > { %v2405_v36 = vadd.f32 %v2391_v43, %v2236_v56  ;;  %v5052_v43 = vld [vmem:[%s6649_s7 + $0x28] sm:$0xff] }
 0x5e1   : > { %v2417_v8 = vadd.f32 %v6187_v1, %v2405_v36 }
 0x5e3   : > { %v2425_v9 = vmax.f32 %v2417_v8, 0.0 }
 0x5e6   : > { %v2393_v18 = vpop.f32.mrf.mxu2 }
 0x5e7   : > { %v2406_v15 = vadd.f32 %v2393_v18, %v2237_v28 }
 0x5e9   : > { %v2418_v17 = vadd.f32 %v6187_v1, %v2406_v15  ;;  %v5060_v15 = vld [vmem:[%s6648_s6 + $0x88] sm:$0xff] }
 0x5eb   : > { %v2426_v58 = vmax.f32 %v2418_v17, 0.0 }
 0x5ed   : > { %v6225_v48 = vpack.c.bf16 %v2426_v58, %v2425_v9  ;;  %v5061_v9 = vld [vmem:[%s6648_s6 + $0x90] sm:$0xff] }
 0x5ee   : > { %v2396_v10 = vpop.f32.mrf.mxu2 }
 0x5ef   : > { %v2407_v13 = vadd.f32 %v2396_v10, %v2238_v25  ;;  %v5062_v25 = vld [vmem:[%s6648_s6 + $0x98] sm:$0xff] }
 0x5f1   : > { %v2419_v60 = vadd.f32 %v6187_v1, %v2407_v13 }
 0x5f3   : > { %v2427_v61 = vmax.f32 %v2419_v60, 0.0 }
 0x5f6   : > { %v2398_v54 = vpop.f32.mrf.mxu2 }
 0x5f7   : > { %v2408_v35 = vadd.f32 %v2398_v54, %v2239_v49  ;;  %v5055_v49 = vld [vmem:[%s6648_s6 + $0x70] sm:$0xff]  ;;  %v5071_v54 = vld [vmem:[%s6648_s6 + $0xc0] sm:$0xff] }
 0x5f9   : > { %v2420_v4 = vadd.f32 %v6187_v1, %v2408_v35  ;;  %v5037_v1 = vld [vmem:[%s6648_s6 + $0x10] sm:$0xff] }
 0x5fb   : > { %v2428_v14 = vmax.f32 %v2420_v4, 0.0 }
 0x5fd   : > { %v6233_v63 = vpack.c.bf16 %v2428_v14, %v2427_v61  ;;  %v5056_v61 = vld [vmem:[%s6648_s6 + $0x78] sm:$0xff]  ;;  %v5072_v14 = vld [vmem:[%s6648_s6 + $0xc8] sm:$0xff] }
 0x5ff   : > { %2478 = vmatpush.bf16.msrb.mxu3 %v6233_v63  ;;  %2556 = vmatpush.bf16.msrb.mxu0 %v6233_v63 }
 0x600   : > { %2881 = vmatpush.bf16.msrb.mxu1 %v6233_v63 }
 0x603   : > { %2479 = vmatpush.bf16.msrb.mxu3 %v6225_v48  ;;  %2557 = vmatpush.bf16.msrb.mxu0 %v6225_v48 }
 0x604   : > { %2882 = vmatpush.bf16.msrb.mxu1 %v6225_v48 }
 0x607   : > { %2480 = vmatpush.bf16.msrb.mxu3 %v6210_v20  ;;  %2558 = vmatpush.bf16.msrb.mxu0 %v6210_v20 }
 0x608   : > { %2883 = vmatpush.bf16.msrb.mxu1 %v6210_v20 }
 0x60b   : > { %2481 = vmatpush.bf16.msrb.mxu3 %v6195_v29  ;;  %2559 = vmatpush.bf16.msrb.mxu0 %v6195_v29 }
 0x60c   : > { %2884 = vmatpush.bf16.msrb.mxu1 %v6195_v29 }
 0x60e   : > { %4524 = vmatmul.msk.bf16.vlgmr.msrb.gmra.mxu3 %vm2461_vm2, %v5035_v37  ;;  %4552 = vmatmul.msk.bf16.vlgmr.msrb.gmra.mxu0 %vm2461_vm2, %v5041_v16 }
 0x60f   : > { %2741 = vmatpush.bf16.msra.mxu3 %v6233_v63  ;;  %2805 = vmatpush.bf16.msra.mxu0 %v5052_v43 }
 0x613   : > { %2742 = vmatpush.bf16.msra.mxu3 %v6225_v48  ;;  %2806 = vmatpush.bf16.msra.mxu0 %v5051_v39 }
 0x617   : > { %2743 = vmatpush.bf16.msra.mxu3 %v6210_v20 }
 0x61b   : > { %2744 = vmatpush.bf16.msra.mxu3 %v6195_v29 }
 0x61e   : > { %4525 = vmatmul.msk.bf16.gmra.mxu3 %vm2461_vm2, %v5036_v23  ;;  %4553 = vmatmul.msk.bf16.gmra.mxu0 %vm2461_vm2, %v5042_v31  ;;  %v5065_v23 = vld [vmem:[%s6648_s6 + $0xa0] sm:$0xff] }
 0x61f   : > { %3021 = vmatpush.bf16.msrb.mxu3 %v6233_v63 }
 0x623   : > { %3022 = vmatpush.bf16.msrb.mxu3 %v6225_v48 }
 0x627   : > { %3023 = vmatpush.bf16.msrb.mxu3 %v6210_v20 }
 0x62b   : > { %3024 = vmatpush.bf16.msrb.mxu3 %v6195_v29 }
 0x62e   : > { %4526 = vmatmul.msk.bf16.gmra.mxu3 %vm2461_vm2, %v5037_v1  ;;  %4554 = vmatmul.msk.bf16.gmra.mxu0 %vm2461_vm2, %v5043_v41  ;;  %v5073_v1 = vld [vmem:[%s6648_s6 + $0xd0] sm:$0xff] }
 0x63e   : > { %4527 = vmatmul.msk.bf16.gmra.mxu3 %vm2461_vm2, %v5038_v44  ;;  %4555 = vmatmul.msk.bf16.gmra.mxu0 %vm2461_vm2, %v5044_v21 }
 0x64e   : > { %4608 = vmatmul.msk.bf16.vlgmr.msra.gmra.mxu3 %vm2461_vm2, %v5047_v12  ;;  %v5066_v12 = vld [vmem:[%s6648_s6 + $0xa8] sm:$0xff] }
 0x64f   : > { %3301 = vmatpush.bf16.msra.mxu3 %v6233_v63 }
 0x653   : > { %3302 = vmatpush.bf16.msra.mxu3 %v6225_v48 }
 0x657   : > { %3303 = vmatpush.bf16.msra.mxu3 %v6210_v20 }
 0x65b   : > { %3304 = vmatpush.bf16.msra.mxu3 %v6195_v29 }
 0x65e   : > { %4609 = vmatmul.msk.bf16.gmra.mxu3 %vm2461_vm2, %v5048_v52 }
 0x66e   : > { %4610 = vmatmul.msk.bf16.gmra.mxu3 %vm2461_vm2, %v5049_v34  ;;  %v5074_v34 = vld [vmem:[%s6648_s6 + $0xd8] sm:$0xff] }
 0x67e   : > { %4611 = vmatmul.msk.bf16.gmra.mxu3 %vm2461_vm2, %v5050_v24  ;;  %v5058_v24 = vld [vmem:[%s6649_s7 + $0x38] sm:$0xff] }
 0x67f   : > { %2945 = vmatpush.bf16.msra.mxu2 %v5058_v24 }
 0x68b   : > { %v2561_v40 = vpop.f32.mrf.mxu0 }
 0x68e   : > { %4696 = vmatmul.msk.bf16.vlgmr.msrb.gmra.mxu3 %vm2461_vm2, %v5059_v38 }
 0x68f   : > { %3581 = vmatpush.bf16.msrb.mxu3 %v6233_v63 }
 0x691   : > { %v2483_v22 = vpop.f32.mrf.mxu3 }
 0x693   : > { %3582 = vmatpush.bf16.msrb.mxu3 %v6225_v48  ;;  %v2563_v30 = vpop.f32.mrf.mxu0 }
 0x694   : > { %v2581_v53 = vpack.c.bf16 %v2563_v30, %v2561_v40 }
 0x696   : > { %4568 = vmatmul.msk.bf16.vlgmr.msra.gmra.mxu1 %vm719_vm0, %v2581_v53  ;;  %v5083_v53 = vld [vmem:[%s6648_s6 + $0x100] sm:$0xff] }
 0x697   : > { %3161 = vmatpush.bf16.msra.mxu1 %v6233_v63  ;;  %3583 = vmatpush.bf16.msrb.mxu3 %v6210_v20 }
 0x699   : > { %v2485_v26 = vpop.f32.mrf.mxu3 }
 0x69a   : > { %v2503_v33 = vpack.c.bf16 %v2485_v26, %v2483_v22  ;;  %v5067_v22 = vld [vmem:[%s6648_s6 + $0xb0] sm:$0xff] }
 0x69b   : > { %3162 = vmatpush.bf16.msra.mxu1 %v6225_v48  ;;  %3584 = vmatpush.bf16.msrb.mxu3 %v6195_v29  ;;  %v2566_v27 = vpop.f32.mrf.mxu0 }
 0x69c   : > { %4580 = vmatmul.msk.bf16.vlgmr.msrb.gmra.mxu2 %vm719_vm0, %v2503_v33 }
 0x69e   : > { %4697 = vmatmul.msk.bf16.gmra.mxu3 %vm2461_vm2, %v5060_v15 }
 0x69f   : > { %3163 = vmatpush.bf16.msra.mxu1 %v6210_v20 }
 0x6a1   : > { %v2488_v3 = vpop.f32.mrf.mxu3 }
 0x6a3   : > { %3164 = vmatpush.bf16.msra.mxu1 %v6195_v29  ;;  %v2568_v6 = vpop.f32.mrf.mxu0 }
 0x6a4   : > { %v2582_v42 = vpack.c.bf16 %v2568_v6, %v2566_v27  ;;  %v5057_v27 = vld [vmem:[%s6649_s7 + $0x30] sm:$0xff]  ;;  %v5064_v6 = vld [vmem:[%s6649_s7 + $0x48] sm:$0xff] }
 0x6a5   : > { %2946 = vmatpush.bf16.msra.mxu2 %v5057_v27  ;;  %3085 = vmatpush.bf16.msrb.mxu0 %v5064_v6  ;;  %v5075_v27 = vld [vmem:[%s6649_s7 + $0x60] sm:$0xff] }
 0x6a6   : > { %4569 = vmatmul.msk.bf16.gmra.mxu1 %vm719_vm0, %v2582_v42 }
 0x6a9   : > { %v2490_v11 = vpop.f32.mrf.mxu3 }
 0x6aa   : > { %v2504_v32 = vpack.c.bf16 %v2490_v11, %v2488_v3 }
 0x6ab   : > { %v2571_v2 = vpop.f32.mrf.mxu0 }
 0x6ac   : > { %4581 = vmatmul.msk.bf16.gmra.mxu2 %vm719_vm0, %v2504_v32  ;;  %v5068_v32 = vld [vmem:[%s6648_s6 + $0xb8] sm:$0xff] }
 0x6ae   : > { %4698 = vmatmul.msk.bf16.gmra.mxu3 %vm2461_vm2, %v5061_v9 }
 0x6b1   : > { %v2493_v55 = vpop.f32.mrf.mxu3 }
 0x6b3   : > { %v2573_v5 = vpop.f32.mrf.mxu0 }
 0x6b4   : > { %v2583_v46 = vpack.c.bf16 %v2573_v5, %v2571_v2 }
 0x6b6   : > { %4570 = vmatmul.msk.bf16.gmra.mxu1 %vm719_vm0, %v2583_v46  ;;  %v5084_v46 = vld [vmem:[%s6648_s6 + $0x108] sm:$0xff] }
 0x6b9   : > { %v2495_v56 = vpop.f32.mrf.mxu3 }
 0x6ba   : > { %v2505_v36 = vpack.c.bf16 %v2495_v56, %v2493_v55  ;;  %v5063_v55 = vld [vmem:[%s6649_s7 + $0x40] sm:$0xff] }
 0x6bb   : > { %v2576_v28 = vpop.f32.mrf.mxu0  ;;  %3086 = vmatpush.bf16.msrb.mxu0 %v5063_v55 }
 0x6bc   : > { %4582 = vmatmul.msk.bf16.gmra.mxu2 %vm719_vm0, %v2505_v36 }
 0x6be   : > { %4699 = vmatmul.msk.bf16.gmra.mxu3 %vm2461_vm2, %v5062_v25 }
 0x6c1   : > { %v2498_v18 = vpop.f32.mrf.mxu3 }
 0x6c3   : > { %v2578_v19 = vpop.f32.mrf.mxu0 }
 0x6c4   : > { %v2584_v8 = vpack.c.bf16 %v2578_v19, %v2576_v28  ;;  %v5077_v19 = vld [vmem:[%s6648_s6 + $0xe0] sm:$0xff] }
 0x6c6   : > { %4571 = vmatmul.msk.bf16.gmra.mxu1 %vm719_vm0, %v2584_v8 }
 0x6c9   : > { %v2500_v62 = vpop.f32.mrf.mxu3 }
 0x6ca   : > { %v2506_v45 = vpack.c.bf16 %v2500_v62, %v2498_v18 }
 0x6cc   : > { %4583 = vmatmul.msk.bf16.gmra.mxu2 %vm719_vm0, %v2506_v45  ;;  %v5085_v45 = vld [vmem:[%s6648_s6 + $0x110] sm:$0xff] }
 0x6ce   : > { %4784 = vmatmul.msk.bf16.vlgmr.msra.gmra.mxu3 %vm2461_vm2, %v5071_v54 }
 0x6d1   : > { %v2746_v17 = vpop.f32.mrf.mxu3 }
 0x6d6   : > { %4652 = vmatmul.msk.bf16.vlgmr.msrb.gmra.mxu1 %vm2461_vm2, %v5053_v0 }
 0x6d7   : > { %3441 = vmatpush.bf16.msrb.mxu1 %v6233_v63 }
 0x6d9   : > { %v2748_v58 = vpop.f32.mrf.mxu3 }
 0x6da   : > { %v2766_v10 = vpack.c.bf16 %v2748_v58, %v2746_v17 }
 0x6db   : > { %3442 = vmatpush.bf16.msrb.mxu1 %v6225_v48 }
 0x6dc   : > { %4624 = vmatmul.msk.bf16.vlgmr.msra.gmra.mxu0 %vm719_vm0, %v2766_v10 }
 0x6de   : > { %4785 = vmatmul.msk.bf16.gmra.mxu3 %vm2461_vm2, %v5072_v14 }
 0x6df   : > { %3443 = vmatpush.bf16.msrb.mxu1 %v6210_v20 }
 0x6e1   : > { %v2751_v59 = vpop.f32.mrf.mxu3 }
 0x6e3   : > { %3444 = vmatpush.bf16.msrb.mxu1 %v6195_v29 }
 0x6e6   : > { %4653 = vmatmul.msk.bf16.gmra.mxu1 %vm2461_vm2, %v5054_v7  ;;  %v5078_v7 = vld [vmem:[%s6648_s6 + $0xe8] sm:$0xff] }
 0x6e9   : > { %v2753_v47 = vpop.f32.mrf.mxu3 }
 0x6ea   : > { %v2767_v51 = vpack.c.bf16 %v2753_v47, %v2751_v59 }
 0x6ec   : > { %4625 = vmatmul.msk.bf16.gmra.mxu0 %vm719_vm0, %v2767_v51 }
 0x6ee   : > { %4786 = vmatmul.msk.bf16.gmra.mxu3 %vm2461_vm2, %v5073_v1 }
 0x6f1   : > { %v2756_v13 = vpop.f32.mrf.mxu3 }
 0x6f6   : > { %4654 = vmatmul.msk.bf16.gmra.mxu1 %vm2461_vm2, %v5055_v49 }
 0x6f9   : > { %v2758_v60 = vpop.f32.mrf.mxu3 }
 0x6fa   : > { %v2768_v35 = vpack.c.bf16 %v2758_v60, %v2756_v13  ;;  %v5086_v13 = vld [vmem:[%s6648_s6 + $0x118] sm:$0xff] }
 0x6fc   : > { %4626 = vmatmul.msk.bf16.gmra.mxu0 %vm719_vm0, %v2768_v35 }
 0x6fe   : > { %4787 = vmatmul.msk.bf16.gmra.mxu3 %vm2461_vm2, %v5074_v34 }
 0x701   : > { %v2761_v4 = vpop.f32.mrf.mxu3 }
 0x706   : > { %4655 = vmatmul.msk.bf16.gmra.mxu1 %vm2461_vm2, %v5056_v61  ;;  %v5070_v61 = vld [vmem:[%s6649_s7 + $0x58] sm:$0xff] }
 0x707   : > { %3225 = vmatpush.bf16.msrb.mxu2 %v5070_v61 }
 0x709   : > { %v2763_v37 = vpop.f32.mrf.mxu3 }
 0x70a   : > { %v2769_v16 = vpack.c.bf16 %v2763_v37, %v2761_v4  ;;  %v5079_v37 = vld [vmem:[%s6648_s6 + $0xf0] sm:$0xff] }
 0x70c   : > { %4627 = vmatmul.msk.bf16.gmra.mxu0 %vm719_vm0, %v2769_v16 }
 0x70e   : > { %4872 = vmatmul.msk.bf16.vlgmr.msrb.gmra.mxu3 %vm2461_vm2, %v5083_v53 }
 0x711   : > { %v3026_v3 = vpop.f32.mrf.mxu3 }
 0x713   : > { %v2623_v31 = vpop.f32.mrf.mxu1 }
 0x716   : > { %4740 = vmatmul.msk.bf16.vlgmr.msra.gmra.mxu1 %vm2461_vm2, %v5065_v23  ;;  %v5069_v23 = vld [vmem:[%s6649_s7 + $0x50] sm:$0xff] }
 0x717   : > { %3226 = vmatpush.bf16.msrb.mxu2 %v5069_v23 }
 0x719   : > { %v3028_v43 = vpop.f32.mrf.mxu3 }
 0x71a   : > { %v3046_v5 = vpack.c.bf16 %v3028_v43, %v3026_v3 }
 0x71b   : > { %v6391_v41 = vpop.f32.mrf.mxu1 }
 0x71c   : > { %4712 = vmatmul.msk.bf16.vlgmr.msrb.gmra.mxu0 %vm719_vm0, %v3046_v5 }
 0x71e   : > { %4873 = vmatmul.msk.bf16.gmra.mxu3 %vm2461_vm2, %v5084_v46 }
 0x71f   : > { %v2676_v44 = vpop.f32.mrf.mxu2 }
 0x720   : > { %v2677_v21 = vadd.f32 %v2676_v44, %v2623_v31  ;;  %v5082_v31 = vld [vmem:[%s6649_s7 + $0x78] sm:$0xff] }
 0x721   : > { %v3031_v36 = vpop.f32.mrf.mxu3 }
 0x723   : > { %v2628_v52 = vpop.f32.mrf.mxu1 }
 0x726   : > { %4741 = vmatmul.msk.bf16.gmra.mxu1 %vm2461_vm2, %v5066_v12 }
 0x727   : > { %v6400_v57 = vpop.f32.mrf.mxu2 }
 0x729   : > { %v3033_v15 = vpop.f32.mrf.mxu3 }
 0x72a   : > { %v3047_v62 = vpack.c.bf16 %v3033_v15, %v3031_v36 }
 0x72b   : > { %v6403_v50 = vpop.f32.mrf.mxu1 }
 0x72c   : > { %4713 = vmatmul.msk.bf16.gmra.mxu0 %vm719_vm0, %v3047_v62 }
 0x72e   : > { %4874 = vmatmul.msk.bf16.gmra.mxu3 %vm2461_vm2, %v5085_v45 }
 0x72f   : > { %v2681_v38 = vpop.f32.mrf.mxu2 }
 0x730   : > { %v2682_v40 = vadd.f32 %v2681_v38, %v2628_v52  ;;  %v5081_v38 = vld [vmem:[%s6649_s7 + $0x70] sm:$0xff] }
 0x731   : > { %v3036_v10 = vpop.f32.mrf.mxu3 }
 0x733   : > { %v2633_v30 = vpop.f32.mrf.mxu1 }
 0x736   : > { %4742 = vmatmul.msk.bf16.gmra.mxu1 %vm2461_vm2, %v5067_v22 }
 0x737   : > { %v6415_v26 = vpop.f32.mrf.mxu2 }
 0x739   : > { %v3038_v47 = vpop.f32.mrf.mxu3 }
 0x73a   : > { %v3048_v51 = vpack.c.bf16 %v3038_v47, %v3036_v10  ;;  %v5087_v47 = vld [vmem:[%s6649_s7 + $0x80] sm:$0xff] }
 0x73b   : > { %v6418_v33 = vpop.f32.mrf.mxu1 }
 0x73c   : > { %4714 = vmatmul.msk.bf16.gmra.mxu0 %vm719_vm0, %v3048_v51 }
 0x73e   : > { %4875 = vmatmul.msk.bf16.gmra.mxu3 %vm2461_vm2, %v5086_v13 }
 0x73f   : > { %v2686_v42 = vpop.f32.mrf.mxu2 }
 0x740   : > { %v2687_v11 = vadd.f32 %v2686_v42, %v2633_v30  ;;  %v5080_v30 = vld [vmem:[%s6648_s6 + $0xf8] sm:$0xff] }
 0x741   : > { %v3041_v4 = vpop.f32.mrf.mxu3 }
 0x743   : > { %v2638_v2 = vpop.f32.mrf.mxu1 }
 0x746   : > { %4743 = vmatmul.msk.bf16.gmra.mxu1 %vm2461_vm2, %v5068_v32 }
 0x747   : > { %v6436_v56 = vpop.f32.mrf.mxu2 }
 0x749   : > { %v3043_v1 = vpop.f32.mrf.mxu3 }
 0x74a   : > { %v3049_v44 = vpack.c.bf16 %v3043_v1, %v3041_v4 }
 0x74b   : > { %v6440_v39 = vpop.f32.mrf.mxu1 }
 0x74c   : > { %4715 = vmatmul.msk.bf16.gmra.mxu0 %vm719_vm0, %v3049_v44 }
 0x74f   : > { %v2691_v28 = vpop.f32.mrf.mxu2 }
 0x750   : > { %v6442_v18 = vadd.f32 %v2691_v28, %v2638_v2 }
 0x751   : > { %v3306_v24 = vpop.f32.mrf.mxu3 }
 0x753   : > { %v2886_v8 = vpop.f32.mrf.mxu1 }
 0x756   : > { %4828 = vmatmul.msk.bf16.vlgmr.msrb.gmra.mxu1 %vm2461_vm2, %v5077_v19 }
 0x757   : > { %v2693_v1 = vpop.f32.mrf.mxu2 }
 0x759   : > { %v2808_v17 = vpop.f32.mrf.mxu0  ;;  %v3308_v3 = vpop.f32.mrf.mxu3 }
 0x75a   : > { %v6453_v0 = vadd.f32 %v2808_v17, %v2677_v21  ;;  %v3326_v6 = vpack.c.bf16 %v3308_v3, %v3306_v24 }
 0x75b   : > { %v2888_v9 = vpop.f32.mrf.mxu1 }
 0x75c   : > { %v2906_v58 = vpack.c.bf16 %v2888_v9, %v2886_v8 }
 0x75e   : > { %4668 = vmatmul.msk.bf16.vlgmr.msra.gmra.mxu2 %vm719_vm0, %v2906_v58 }
 0x75f   : > { %3505 = vmatpush.bf16.msra.mxu2 %v5082_v31 }
 0x761   : > { %v6456_v59 = vpop.f32.mrf.mxu0  ;;  %v3311_v55 = vpop.f32.mrf.mxu3 }
 0x763   : > { %v2891_v25 = vpop.f32.mrf.mxu1  ;;  %3506 = vmatpush.bf16.msra.mxu2 %v5081_v38 }
 0x766   : > { %4829 = vmatmul.msk.bf16.gmra.mxu1 %vm2461_vm2, %v5078_v7 }
 0x769   : > { %v2813_v49 = vpop.f32.mrf.mxu0  ;;  %v3313_v5 = vpop.f32.mrf.mxu3 }
 0x76a   : > { %v6467_v54 = vadd.f32 %v2813_v49, %v2682_v40  ;;  %v5076_v40 = vld [vmem:[%s6649_s7 + $0x68] sm:$0xff]  ;;  %v3327_v46 = vpack.c.bf16 %v3313_v5, %v3311_v55 }
 0x76b   : > { %v2893_v60 = vpop.f32.mrf.mxu1  ;;  %3365 = vmatpush.bf16.msra.mxu0 %v5076_v40 }
 0x76c   : > { %v2907_v35 = vpack.c.bf16 %v2893_v60, %v2891_v25 }
 0x76e   : > { %4669 = vmatmul.msk.bf16.gmra.mxu2 %vm719_vm0, %v2907_v35 }
 0x76f   : > { %3366 = vmatpush.bf16.msra.mxu0 %v5075_v27 }
 0x771   : > { %v6473_v14 = vpop.f32.mrf.mxu0  ;;  %v3316_v19 = vpop.f32.mrf.mxu3 }
 0x772   : > { %4800 = vmatmul.msk.bf16.vlgmr.msra.gmra.mxu0 %vm719_vm0, %v3326_v6  ;;  %v2679_v6 = vadd.f32 %v6400_v57, %v6391_v41 }
 0x773   : > { %v2896_v16 = vpop.f32.mrf.mxu1 }
 0x776   : > { %4830 = vmatmul.msk.bf16.gmra.mxu1 %vm2461_vm2, %v5079_v37 }
 0x779   : > { %v2818_v21 = vpop.f32.mrf.mxu0  ;;  %v3318_v8 = vpop.f32.mrf.mxu3 }
 0x77a   : > { %v6486_v12 = vadd.f32 %v2818_v21, %v2687_v11  ;;  %v3328_v15 = vpack.c.bf16 %v3318_v8, %v3316_v19  ;;  %v2684_v8 = vadd.f32 %v6415_v26, %v6403_v50  ;;  %v2689_v50 = vadd.f32 %v6436_v56, %v6418_v33 }
 0x77b   : > { %v2898_v52 = vpop.f32.mrf.mxu1 }
 0x77c   : > { %v2908_v34 = vpack.c.bf16 %v2898_v52, %v2896_v16 }
 0x77e   : > { %4670 = vmatmul.msk.bf16.gmra.mxu2 %vm719_vm0, %v2908_v34 }
 0x781   : > { %v6495_v22 = vpop.f32.mrf.mxu0  ;;  %v3321_v17 = vpop.f32.mrf.mxu3 }
 0x782   : > { %4801 = vmatmul.msk.bf16.gmra.mxu0 %vm719_vm0, %v3327_v46  ;;  %v2833_v26 = vadd.f32 %v6495_v22, %v2689_v50 }
 0x783   : > { %v2901_v53 = vpop.f32.mrf.mxu1 }
 0x786   : > { %4831 = vmatmul.msk.bf16.gmra.mxu1 %vm2461_vm2, %v5080_v30 }
 0x789   : > { %v2823_v42 = vpop.f32.mrf.mxu0  ;;  %v3323_v58 = vpop.f32.mrf.mxu3 }
 0x78a   : > { %v6506_v11 = vadd.f32 %v2823_v42, %v6442_v18  ;;  %v3329_v10 = vpack.c.bf16 %v3323_v58, %v3321_v17  ;;  %v2829_v42 = vadd.f32 %v6456_v59, %v2679_v6 }
 0x78b   : > { %v2903_v32 = vpop.f32.mrf.mxu1 }
 0x78c   : > { %v2909_v2 = vpack.c.bf16 %v2903_v32, %v2901_v53 }
 0x78e   : > { %4671 = vmatmul.msk.bf16.gmra.mxu2 %vm719_vm0, %v2909_v2 }
 0x791   : > { %v3586_v7 = vpop.f32.mrf.mxu3  ;;  %v6518_v25 = vpop.f32.mrf.mxu0 }
 0x792   : > { %4802 = vmatmul.msk.bf16.gmra.mxu0 %vm719_vm0, %v3328_v15  ;;  %v2831_v15 = vadd.f32 %v6473_v14, %v2684_v8 }
 0x793   : > { %v3166_v43 = vpop.f32.mrf.mxu1 }
 0x799   : > { %v3588_v51 = vpop.f32.mrf.mxu3  ;;  %v3088_v13 = vpop.f32.mrf.mxu0 }
 0x79a   : > { %v3606_v49 = vpack.c.bf16 %v3588_v51, %v3586_v7 }
 0x79b   : > { %v3168_v36 = vpop.f32.mrf.mxu1 }
 0x79c   : > { %v3186_v28 = vpack.c.bf16 %v3168_v36, %v3166_v43 }
 0x79e   : > { %4756 = vmatmul.msk.bf16.vlgmr.msrb.gmra.mxu2 %vm719_vm0, %v3186_v28 }
 0x79f   : > { %3776 = vmatpush.bf16.msrb.mxu2 %v6233_v63 }
 0x7a1   : > { %v3591_v4 = vpop.f32.mrf.mxu3  ;;  %v3090_v61 = vpop.f32.mrf.mxu0 }
 0x7a2   : > { %4803 = vmatmul.msk.bf16.gmra.mxu0 %vm719_vm0, %v3329_v10 }
 0x7a3   : > { %3777 = vmatpush.bf16.msrb.mxu2 %v6225_v48  ;;  %v3171_v18 = vpop.f32.mrf.mxu1 }
 0x7a7   : > { %3778 = vmatpush.bf16.msrb.mxu2 %v6210_v20 }
 0x7a9   : > { %v3593_v16 = vpop.f32.mrf.mxu3  ;;  %v3093_v23 = vpop.f32.mrf.mxu0 }
 0x7aa   : > { %v3607_v31 = vpack.c.bf16 %v3593_v16, %v3591_v4  ;;  %v2694_v4 = vadd.f32 %v2693_v1, %v6440_v39  ;;  %v5126_v16 = vmov 1015037056  }
 0x7ab   : > { %3779 = vmatpush.bf16.msrb.mxu2 %v6195_v29  ;;  %v3173_v62 = vpop.f32.mrf.mxu1  ;;  %v5088_v29 = vld [vmem:[%s6649_s7 + $0x88] sm:$0xff] }
 0x7ac   : > { %v3187_v45 = vpack.c.bf16 %v3173_v62, %v3171_v18  ;;  %3645 = vmatpush.bf16.msrb.mxu0 %v5088_v29  ;;  %v2835_v33 = vadd.f32 %v6518_v25, %v2694_v4 }
 0x7ae   : > { %4757 = vmatmul.msk.bf16.gmra.mxu2 %vm719_vm0, %v3187_v45 }
 0x7b0   : > { %3646 = vmatpush.bf16.msrb.mxu0 %v5087_v47 }
 0x7b1   : > { %v3596_v52 = vpop.f32.mrf.mxu3  ;;  %v3095_v34 = vpop.f32.mrf.mxu0 }
 0x7b3   : > { %v3176_v9 = vpop.f32.mrf.mxu1  ;;  %4888 = vmatmul.msk.bf16.vlgmr.msrb.gmra.mxu0 %vm719_vm0, %v3606_v49 }
 0x7b9   : > { %v3598_v53 = vpop.f32.mrf.mxu3  ;;  %v3098_v27 = vpop.f32.mrf.mxu0 }
 0x7ba   : > { %v3608_v3 = vpack.c.bf16 %v3598_v53, %v3596_v52 }
 0x7bb   : > { %v3178_v48 = vpop.f32.mrf.mxu1 }
 0x7bc   : > { %v3188_v63 = vpack.c.bf16 %v3178_v48, %v3176_v9 }
 0x7be   : > { %4758 = vmatmul.msk.bf16.gmra.mxu2 %vm719_vm0, %v3188_v63 }
 0x7c1   : > { %v3601_v46 = vpop.f32.mrf.mxu3 }
 0x7c3   : > { %v3181_v20 = vpop.f32.mrf.mxu1  ;;  %4889 = vmatmul.msk.bf16.gmra.mxu0 %vm719_vm0, %v3607_v31 }
 0x7c9   : > { %v3603_v41 = vpop.f32.mrf.mxu3 }
 0x7ca   : > { %v3609_v59 = vpack.c.bf16 %v3603_v41, %v3601_v46 }
 0x7cb   : > { %v3183_v60 = vpop.f32.mrf.mxu1 }
 0x7cc   : > { %v3189_v35 = vpack.c.bf16 %v3183_v60, %v3181_v20 }
 0x7ce   : > { %4759 = vmatmul.msk.bf16.gmra.mxu2 %vm719_vm0, %v3189_v35 }
 0x7d3   : > { %v3446_v37 = vpop.f32.mrf.mxu1  ;;  %4890 = vmatmul.msk.bf16.gmra.mxu0 %vm719_vm0, %v3608_v3 }
 0x7db   : > { %v3448_v44 = vpop.f32.mrf.mxu1 }
 0x7dc   : > { %v3466_v21 = vpack.c.bf16 %v3448_v44, %v3446_v37 }
 0x7de   : > { %4844 = vmatmul.msk.bf16.vlgmr.msra.gmra.mxu2 %vm719_vm0, %v3466_v21 }
 0x7e1   : > { %v2948_v24 = vpop.f32.mrf.mxu2 }
 0x7e2   : > { %v2968_v38 = vadd.f32 %v2948_v24, %v6453_v0  ;;  %v3100_v0 = vpop.f32.mrf.mxu0 }
 0x7e3   : > { %v3451_v40 = vpop.f32.mrf.mxu1  ;;  %4891 = vmatmul.msk.bf16.gmra.mxu0 %vm719_vm0, %v3609_v59  ;;  %v5116_v59 = vld [vmem:[%s6650_s8] ss:$0 sm:$0xff] }
 0x7e4   : > { %v3108_v30 = vadd.f32 %v3088_v13, %v2968_v38 }
 0x7e9   : > { %v2950_v32 = vpop.f32.mrf.mxu2 }
 0x7ea   : > { %v2969_v2 = vadd.f32 %v2950_v32, %v2829_v42  ;;  %v3103_v57 = vpop.f32.mrf.mxu0  ;;  %v5090_v42 = vld [vmem:[%s6651_s9 + $0x8] sm:$0xff]  ;;  %v5089_v32 = vld [vmem:[%s6651_s9] sm:$0xff] }
 0x7eb   : > { %v3453_v55 = vpop.f32.mrf.mxu1  ;;  %3738 = vmatpush.bf16.msra.mxu1 %v5090_v42 }
 0x7ec   : > { %v6536_v43 = vadd.f32 %v3090_v61, %v2969_v2  ;;  %v3467_v5 = vpack.c.bf16 %v3453_v55, %v3451_v40 }
 0x7ee   : > { %4845 = vmatmul.msk.bf16.gmra.mxu2 %vm719_vm0, %v3467_v5 }
 0x7ef   : > { %3739 = vmatpush.bf16.msra.mxu1 %v5089_v32 }
 0x7f1   : > { %v2953_v36 = vpop.f32.mrf.mxu2 }
 0x7f2   : > { %v2970_v28 = vadd.f32 %v2953_v36, %v6467_v54  ;;  %v3105_v10 = vpop.f32.mrf.mxu0 }
 0x7f3   : > { %v3456_v19 = vpop.f32.mrf.mxu1 }
 0x7f4   : > { %v3110_v18 = vadd.f32 %v3093_v23, %v2970_v28 }
 0x7f9   : > { %v2955_v62 = vpop.f32.mrf.mxu2 }
 0x7fa   : > { %v2971_v45 = vadd.f32 %v2955_v62, %v2831_v15  ;;  %v3368_v29 = vpop.f32.mrf.mxu0 }
 0x7fb   : > { %v3458_v17 = vpop.f32.mrf.mxu1 }
 0x7fc   : > { %v6544_v9 = vadd.f32 %v3095_v34, %v2971_v45  ;;  %v3468_v58 = vpack.c.bf16 %v3458_v17, %v3456_v19 }
 0x7fe   : > { %4846 = vmatmul.msk.bf16.gmra.mxu2 %vm719_vm0, %v3468_v58 }
 0x801   : > { %v2958_v54 = vpop.f32.mrf.mxu2 }
 0x802   : > { %v2972_v48 = vadd.f32 %v2958_v54, %v6486_v12  ;;  %v3370_v49 = vpop.f32.mrf.mxu0 }
 0x803   : > { %v3461_v63 = vpop.f32.mrf.mxu1 }
 0x804   : > { %v3112_v7 = vadd.f32 %v3098_v27, %v2972_v48 }
 0x809   : > { %v2960_v14 = vpop.f32.mrf.mxu2 }
 0x80a   : > { %v2973_v20 = vadd.f32 %v2960_v14, %v2833_v26  ;;  %v3373_v61 = vpop.f32.mrf.mxu0  ;;  %v5092_v26 = vld [vmem:[%s6653_s11 + $0x8] sm:$0xff] }
 0x80b   : > { %v3463_v47 = vpop.f32.mrf.mxu1  ;;  %3812 = vmatpush.bf16.msra.mxu3 %v5092_v26 }
 0x80c   : > { %v6551_v51 = vadd.f32 %v3100_v0, %v2973_v20  ;;  %v3469_v13 = vpack.c.bf16 %v3463_v47, %v3461_v63 }
 0x80e   : > { %4847 = vmatmul.msk.bf16.gmra.mxu2 %vm719_vm0, %v3469_v13 }
 0x811   : > { %v2963_v60 = vpop.f32.mrf.mxu2 }
 0x812   : > { %v2974_v12 = vadd.f32 %v2963_v60, %v6506_v11  ;;  %v3375_v31 = vpop.f32.mrf.mxu0 }
 0x814   : > { %v3114_v35 = vadd.f32 %v3103_v57, %v2974_v12 }
 0x819   : > { %v2965_v56 = vpop.f32.mrf.mxu2 }
 0x81a   : > { %v2975_v22 = vadd.f32 %v2965_v56, %v2835_v33  ;;  %v3378_v34 = vpop.f32.mrf.mxu0 }
 0x81c   : > { %v6557_v37 = vadd.f32 %v3105_v10, %v2975_v22 }
 0x81e   : > { %4904 = vmatmul.msk.bf16.vlgmr.msrb.gmra.mxu2 %vm2461_vm2, %v5126_v16 }
 0x821   : > { %v3228_v23 = vpop.f32.mrf.mxu2 }
 0x822   : > { %v3248_v44 = vadd.f32 %v3228_v23, %v3108_v30  ;;  %v3380_v39 = vpop.f32.mrf.mxu0 }
 0x824   : > { %v3388_v21 = vadd.f32 %v3368_v29, %v3248_v44 }
 0x829   : > { %v3230_v52 = vpop.f32.mrf.mxu2 }
 0x82a   : > { %v3383_v40 = vpop.f32.mrf.mxu0  ;;  %v3249_v28 = vadd.f32 %v3230_v52, %v6536_v43 }
 0x82c   : > { %v3389_v41 = vadd.f32 %v3370_v49, %v3249_v28 }
 0x831   : > { %v3233_v11 = vpop.f32.mrf.mxu2 }
 0x832   : > { %v3250_v24 = vadd.f32 %v3233_v11, %v3110_v18  ;;  %v6560_v6 = vpop.f32.mrf.mxu0 }
 0x834   : > { %v3390_v38 = vadd.f32 %v3373_v61, %v3250_v24 }
 0x839   : > { %v3235_v1 = vpop.f32.mrf.mxu2 }
 0x83a   : > { %v3648_v55 = vpop.f32.mrf.mxu0  ;;  %v3251_v43 = vadd.f32 %v3235_v1, %v6544_v9  ;;  %v5091_v9 = vld [vmem:[%s6653_s11] sm:$0xff] }
 0x83b   : > { %3813 = vmatpush.bf16.msra.mxu3 %v5091_v9 }
 0x83c   : > { %v3391_v29 = vadd.f32 %v3375_v31, %v3251_v43 }
 0x841   : > { %v3238_v25 = vpop.f32.mrf.mxu2 }
 0x842   : > { %v3252_v53 = vadd.f32 %v3238_v25, %v3112_v7  ;;  %v3650_v0 = vpop.f32.mrf.mxu0 }
 0x844   : > { %v3392_v27 = vadd.f32 %v3378_v34, %v3252_v53 }
 0x849   : > { %v3240_v3 = vpop.f32.mrf.mxu2 }
 0x84a   : > { %v3653_v18 = vpop.f32.mrf.mxu0  ;;  %v3253_v33 = vadd.f32 %v3240_v3, %v6551_v51 }
 0x84c   : > { %v3393_v16 = vadd.f32 %v3380_v39, %v3253_v33  ;;  %v3860_v33 = vld [vmem:[%s6658_s16] sm:$0x1] }
 0x851   : > { %v3243_v30 = vpop.f32.mrf.mxu2 }
 0x852   : > { %v3254_v2 = vadd.f32 %v3243_v30, %v3114_v35  ;;  %v3655_v48 = vpop.f32.mrf.mxu0 }
 0x854   : > { %v3394_v5 = vadd.f32 %v3383_v40, %v3254_v2 }
 0x859   : > { %v3245_v46 = vpop.f32.mrf.mxu2 }
 0x85a   : > { %v3658_v47 = vpop.f32.mrf.mxu0  ;;  %v3255_v25 = vadd.f32 %v3245_v46, %v6557_v37 }
 0x85c   : > { %v3395_v51 = vadd.f32 %v6560_v6, %v3255_v25  ;;  %v5117_v6 = vld [vmem:[%s6652_s10] ss:$0 sm:$0xff] }
 0x861   : > { %v3508_v36 = vpop.f32.mrf.mxu2 }
 0x862   : > { %v3528_v19 = vadd.f32 %v3508_v36, %v3388_v21  ;;  %v3660_v22 = vpop.f32.mrf.mxu0 }
 0x864   : > { %v3668_v57 = vadd.f32 %v3648_v55, %v3528_v19 }
 0x866   : > { %v3680_v62 = vadd.f32 %v5116_v59, %v3668_v57 }
 0x868   : > { %v3688_v58 = vmax.f32 %v3680_v62, 0.0 }
 0x869   : > { %v3510_v8 = vpop.f32.mrf.mxu2 }
 0x86a   : > { %v3529_v15 = vadd.f32 %v3510_v8, %v3389_v41  ;;  %v3663_v11 = vpop.f32.mrf.mxu0  ;;  %v5094_v8 = vld [vmem:[%s6655_s13 + $0x8] sm:$0xff] }
 0x86b   : > { %3847 = vmatpush.bf16.msra.mxu2 %v5094_v8 }
 0x86c   : > { %v3669_v45 = vadd.f32 %v3650_v0, %v3529_v15 }
 0x86e   : > { %v3681_v17 = vadd.f32 %v5116_v59, %v3669_v45  ;;  %v5093_v45 = vld [vmem:[%s6655_s13] sm:$0xff] }
 0x86f   : > { %3848 = vmatpush.bf16.msra.mxu2 %v5093_v45 }
 0x870   : > { %v3689_v10 = vmax.f32 %v3681_v17, 0.0  ;;  %v5096_v17 = vld [vmem:[%s6657_s15 + $0x8] sm:$0xff] }
 0x871   : > { %v3513_v54 = vpop.f32.mrf.mxu2  ;;  %3882 = vmatpush.bf16.msrb.mxu3 %v5096_v17 }
 0x872   : > { %v3696_v63 = vpack.c.bf16 %v3689_v10, %v3688_v58  ;;  %v3530_v7 = vadd.f32 %v3513_v54, %v3390_v38  ;;  %v3665_v3 = vpop.f32.mrf.mxu0 }
 0x874   : > { %4900 = vmatmul.msk.bf16.vlgmr.msra.gmra.mxu1 %vm719_vm0, %v3696_v63  ;;  %v3670_v50 = vadd.f32 %v3653_v18, %v3530_v7  ;;  %v3790_v7 = vld [vmem:[%s6654_s12] sm:$0x1] }
 0x876   : > { %v3682_v13 = vadd.f32 %v5116_v59, %v3670_v50 }
 0x878   : > { %v3690_v12 = vmax.f32 %v3682_v13, 0.0 }
 0x879   : > { %v3515_v14 = vpop.f32.mrf.mxu2 }
 0x87a   : > { %v3531_v20 = vadd.f32 %v3515_v14, %v3391_v29 }
 0x87c   : > { %v3671_v49 = vadd.f32 %v3655_v48, %v3531_v20 }
 0x87e   : > { %v3683_v60 = vadd.f32 %v5116_v59, %v3671_v49  ;;  %v5095_v49 = vld [vmem:[%s6657_s15] sm:$0xff] }
 0x87f   : > { %3883 = vmatpush.bf16.msrb.mxu3 %v5095_v49 }
 0x880   : > { %v3691_v35 = vmax.f32 %v3683_v60, 0.0  ;;  %v3825_v60 = vld [vmem:[%s6656_s14] sm:$0x1] }
 0x881   : > { %v3518_v4 = vpop.f32.mrf.mxu2 }
 0x882   : > { %v3697_v61 = vpack.c.bf16 %v3691_v35, %v3690_v12  ;;  %v3532_v56 = vadd.f32 %v3518_v4, %v3392_v27 }
 0x884   : > { %4901 = vmatmul.msk.bf16.gmra.mxu1 %vm719_vm0, %v3697_v61  ;;  %v3672_v23 = vadd.f32 %v3658_v47, %v3532_v56 }
 0x886   : > { %v3684_v21 = vadd.f32 %v5116_v59, %v3672_v23 }
 0x888   : > { %v3692_v24 = vmax.f32 %v3684_v21, 0.0 }
 0x889   : > { %v3520_v31 = vpop.f32.mrf.mxu2 }
 0x88a   : > { %v3533_v44 = vadd.f32 %v3520_v31, %v3393_v16 }
 0x88c   : > { %v3673_v52 = vadd.f32 %v3660_v22, %v3533_v44 }
 0x88e   : > { %v3685_v34 = vadd.f32 %v5116_v59, %v3673_v52 }
 0x890   : > { %v3693_v38 = vmax.f32 %v3685_v34, 0.0 }
 0x891   : > { %v3523_v1 = vpop.f32.mrf.mxu2 }
 0x892   : > { %v3698_v40 = vpack.c.bf16 %v3693_v38, %v3692_v24  ;;  %v3534_v53 = vadd.f32 %v3523_v1, %v3394_v5 }
 0x894   : > { %4902 = vmatmul.msk.bf16.gmra.mxu1 %vm719_vm0, %v3698_v40  ;;  %v3674_v39 = vadd.f32 %v3663_v11, %v3534_v53 }
 0x896   : > { %v3686_v30 = vadd.f32 %v5116_v59, %v3674_v39 }
 0x898   : > { %v3694_v55 = vmax.f32 %v3686_v30, 0.0 }
 0x899   : > { %v3525_v27 = vpop.f32.mrf.mxu2 }
 0x89a   : > { %v3535_v42 = vadd.f32 %v3525_v27, %v3395_v51 }
 0x89c   : > { %v3675_v32 = vadd.f32 %v3665_v3, %v3535_v42 }
 0x89e   : > { %v3687_v2 = vadd.f32 %v5116_v59, %v3675_v32 }
 0x8a0   : > { %v3695_v0 = vmax.f32 %v3687_v2, 0.0 }
 0x8a1   : > { %v3781_v36 = vpop.f32.mrf.mxu2 }
 0x8a2   : > { %v3699_v28 = vpack.c.bf16 %v3695_v0, %v3694_v55  ;;  %v3785_v19 = vpack.c.bf16 %v3781_v36, %v3781_v36 }
 0x8a4   : > { %4903 = vmatmul.msk.bf16.gmra.mxu1 %vm719_vm0, %v3699_v28  ;;  %4913 = vmatmul.msk.bf16.vlgmr.msra.gmra.mxu3 %vm719_vm0, %v3785_v19 }
 0x8a9   : > { %v3783_v37 = vpop.f32.mrf.mxu2 }
 0x8f1   : > { %v3741_v5 = vpop.f32.mrf.mxu1 }
 0x8f2   : > { %v3742_v46 = vadd.f32 %v5117_v6, %v3741_v5 }
 0x8f4   : > { %3761 = vst.msk [vmem:[%s6594_s26] sm:$0xff] %vm1137_vm1, %v3742_v46 }
 0x8f9   : > { %v3743_v18 = vpop.f32.mrf.mxu1 }
 0x8fa   : > { %v3744_v41 = vadd.f32 %v5117_v6, %v3743_v18 }
 0x8fc   : > { %3762 = vst.msk [vmem:[%s6594_s26 + $0x8] sm:$0xff] %vm1137_vm1, %v3744_v41 }
 0x901   : > { %v3746_v57 = vpop.f32.mrf.mxu1 }
 0x902   : > { %v3747_v59 = vadd.f32 %v5117_v6, %v3746_v57 }
 0x904   : > { %3763 = vst.msk [vmem:[%s6594_s26 + $0x10] sm:$0xff] %vm1137_vm1, %v3747_v59 }
 0x909   : > { %v3748_v15 = vpop.f32.mrf.mxu1 }
 0x90a   : > { %v3749_v62 = vadd.f32 %v5117_v6, %v3748_v15 }
 0x90c   : > { %3764 = vst.msk [vmem:[%s6594_s26 + $0x18] sm:$0xff] %vm1137_vm1, %v3749_v62 }
 0x911   : > { %v3751_v58 = vpop.f32.mrf.mxu1 }
 0x912   : > { %v3752_v10 = vadd.f32 %v5117_v6, %v3751_v58 }
 0x914   : > { %3765 = vst.msk [vmem:[%s6594_s26 + $0x20] sm:$0xff] %vm1137_vm1, %v3752_v10 }
 0x919   : > { %v3753_v54 = vpop.f32.mrf.mxu1 }
 0x91a   : > { %v3754_v48 = vadd.f32 %v5117_v6, %v3753_v54 }
 0x91c   : > { %3766 = vst.msk [vmem:[%s6594_s26 + $0x28] sm:$0xff] %vm1137_vm1, %v3754_v48 }
 0x921   : > { %v3756_v63 = vpop.f32.mrf.mxu1 }
 0x922   : > { %v3757_v43 = vadd.f32 %v5117_v6, %v3756_v63 }
 0x924   : > { %3767 = vst.msk [vmem:[%s6594_s26 + $0x30] sm:$0xff] %vm1137_vm1, %v3757_v43 }
 0x927   : > { %v3815_v29 = vpop.f32.mrf.mxu3 }
 0x928   : > { %v3816_v50 = vadd.f32 %v3815_v29, %v3790_v7 }
 0x929   : > { %v3758_v26 = vpop.f32.mrf.mxu1 }
 0x92a   : > { %v3759_v14 = vadd.f32 %v5117_v6, %v3758_v26  ;;  %v3819_v20 = vmax.f32 %v3816_v50, 0.0 }
 0x92c   : > { %3768 = vst.msk [vmem:[%s6594_s26 + $0x38] sm:$0xff] %vm1137_vm1, %v3759_v14  ;;  %v3820_v47 = vpack.c.bf16 %v3819_v20, %v3819_v20 }
 0x92e   : > { %4922 = vmatmul.msk.bf16.vlgmr.msra.gmra.mxu2 %vm719_vm0, %v3820_v47 }
 0x92f   : > { %v3817_v13 = vpop.f32.mrf.mxu3 }
 0x9b1   : > { %v3850_v12 = vpop.f32.mrf.mxu2 }
 0x9b2   : > { %v3851_v35 = vadd.f32 %v3850_v12, %v3825_v60 }
 0x9b4   : > { %v3854_v4 = vmax.f32 %v3851_v35, 0.0 }
 0x9b6   : > { %v3855_v9 = vpack.c.bf16 %v3854_v4, %v3854_v4 }
 0x9b8   : > { %4931 = vmatmul.msk.bf16.vlgmr.msrb.gmra.mxu3 %vm719_vm0, %v3855_v9 }
 0x9b9   : > { %v3852_v61 = vpop.f32.mrf.mxu2 }
 0xa3b   : > { %v3885_v56 = vpop.f32.mrf.mxu3 }
 0xa3c   : > { %v3886_v22 = vadd.f32 %v3885_v56, %v3860_v33 }
 0xa3e   : > { %3890 = vst.msk [vmem:[%s584_s20] sm:$0x1] %vm3889_vm3, %v3886_v22 }
 0xa43   : > { %v3887_v16 = vpop.f32.mrf.mxu3 }
 0xa44 PF: > { %s29_s27 = sadd.s32 1, %s5124_s27  }
 0xa45   : > { %p26_p4 = scmp.ge.s32.totalorder %s29_s27, 4  }
 0xa47   :  { %28 = sbr.rel (!%p26_p4) target bundleno = 4 (0x4), region = 162 }

</bundles_post_ra>
